<compile_context>
chip_gen: v7x
topology: tpu7x:2x2x1
jax: 0.10.0
libtpu: 0.0.40
codegen_flags: <defaults>
</compile_context>

<pallas_src>
import math
from functools import partial

import jax
import jax.numpy as jnp
from jax.experimental import pallas as pl
from jax.experimental.pallas import tpu as pltpu

_LN_EPS = 1e-5                    # torch.nn.LayerNorm default eps
_VMEM_LIMIT = 64 * 1024 * 1024    # raised scoped-VMEM limit for the fused kernels


def _round_up(x, m):
    return ((x + m - 1) // m) * m


def _row_block(m, prefer=(256, 128, 64, 32, 16, 8)):
    """Largest preferred sublane-aligned tile that divides m (else full m)."""
    for t in prefer:
        if m > t and m % t == 0:
            return t
    return m


def _col_block(n, prefer=(512, 256, 128)):
    """Largest preferred lane-aligned tile that divides n (else full n)."""
    for t in prefer:
        if n > t and n % t == 0:
            return t
    return n


# ----------------------------------------------------------------------------
# In-kernel helpers (all f32 elementwise math)
# ----------------------------------------------------------------------------
def _layernorm(x, g, b):
    mean = jnp.mean(x, axis=-1, keepdims=True)
    xc = x - mean
    var = jnp.mean(xc * xc, axis=-1, keepdims=True)
    return xc * jax.lax.rsqrt(var + _LN_EPS) * g + b


def _gelu_tanh(x):
    # tanh-approx GELU: transcendental goes to the EUP slot; small (<1e-3 rel)
    # delta vs torch's exact-erf GELU.
    c = math.sqrt(2.0 / math.pi)
    return 0.5 * x * (1.0 + jnp.tanh(c * (x + 0.044715 * x * x * x)))


# ----------------------------------------------------------------------------
# Pallas kernels
# ----------------------------------------------------------------------------
def _matmul_bias_kernel(x_ref, w_ref, b_ref, o_ref):
    acc = jnp.dot(x_ref[...].astype(jnp.bfloat16), w_ref[...],
                  preferred_element_type=jnp.float32)
    o_ref[...] = (acc + b_ref[...]).astype(o_ref.dtype)


def _matmul_bias_res_kernel(x_ref, w_ref, b_ref, r_ref, o_ref):
    acc = jnp.dot(x_ref[...].astype(jnp.bfloat16), w_ref[...],
                  preferred_element_type=jnp.float32)
    o_ref[...] = (acc + b_ref[...] + r_ref[...].astype(jnp.float32)).astype(o_ref.dtype)


def linear(x2d, w, b, residual=None, out_dtype=jnp.bfloat16):
    """(M,K)@(K,N)+b [+residual] -> (M,N); bf16 MXU operands, f32 accumulation."""
    M, K = x2d.shape
    N = w.shape[1]
    tm, tn = _row_block(M), _col_block(N)
    grid = (M // tm, N // tn)
    w = w if w.dtype == jnp.bfloat16 else w.astype(jnp.bfloat16)
    in_specs = [
        pl.BlockSpec((tm, K), lambda i, j: (i, 0)),
        pl.BlockSpec((K, tn), lambda i, j: (0, j)),
        pl.BlockSpec((1, tn), lambda i, j: (0, j)),
    ]
    args = [x2d, w, b.reshape(1, N).astype(jnp.float32)]
    kernel = _matmul_bias_kernel
    if residual is not None:
        in_specs.append(pl.BlockSpec((tm, tn), lambda i, j: (i, j)))
        args.append(residual)
        kernel = _matmul_bias_res_kernel
    return pl.pallas_call(
        kernel,
        grid=grid,
        in_specs=in_specs,
        out_specs=pl.BlockSpec((tm, tn), lambda i, j: (i, j)),
        out_shape=jax.ShapeDtypeStruct((M, N), out_dtype),
        compiler_params=pltpu.CompilerParams(
            dimension_semantics=("parallel", "parallel")),
    )(*args)


def _ln_matmul_kernel(x_ref, g_ref, bln_ref, w_ref, b_ref, o_ref):
    x = x_ref[...].astype(jnp.float32)
    y = _layernorm(x, g_ref[...], bln_ref[...])
    acc = jnp.dot(y.astype(jnp.bfloat16), w_ref[...],
                  preferred_element_type=jnp.float32)
    o_ref[...] = (acc + b_ref[...]).astype(o_ref.dtype)


def ln_linear(x2d, g, bln, w, b):
    """Fused LayerNorm(x) @ w + b (QKV projection).  Row-tiled only, so LN stats
    are computed exactly once per row tile (no per-column recompute)."""
    M, K = x2d.shape
    N = w.shape[1]
    tm = _row_block(M)
    w = w if w.dtype == jnp.bfloat16 else w.astype(jnp.bfloat16)
    return pl.pallas_call(
        _ln_matmul_kernel,
        grid=(M // tm,),
        in_specs=[
            pl.BlockSpec((tm, K), lambda i: (i, 0)),
            pl.BlockSpec((1, K), lambda i: (0, 0)),
            pl.BlockSpec((1, K), lambda i: (0, 0)),
            pl.BlockSpec((K, N), lambda i: (0, 0)),
            pl.BlockSpec((1, N), lambda i: (0, 0)),
        ],
        out_specs=pl.BlockSpec((tm, N), lambda i: (i, 0)),
        out_shape=jax.ShapeDtypeStruct((M, N), jnp.bfloat16),
        compiler_params=pltpu.CompilerParams(
            dimension_semantics=("parallel",),
            vmem_limit_bytes=_VMEM_LIMIT),
    )(x2d,
      g.reshape(1, K).astype(jnp.float32), bln.reshape(1, K).astype(jnp.float32),
      w, b.reshape(1, N).astype(jnp.float32))


def _mlp_block_kernel(x_ref, g_ref, bln_ref, w1_ref, b1_ref, w2_ref, b2_ref, o_ref):
    x = x_ref[...].astype(jnp.float32)                    # residual-stream input
    y = _layernorm(x, g_ref[...], bln_ref[...])
    h = jnp.dot(y.astype(jnp.bfloat16), w1_ref[...],
                preferred_element_type=jnp.float32) + b1_ref[...]
    h = _gelu_tanh(h)
    out = jnp.dot(h.astype(jnp.bfloat16), w2_ref[...],
                  preferred_element_type=jnp.float32) + b2_ref[...]
    o_ref[...] = (x + out).astype(o_ref.dtype)            # fused residual add


def mlp_block(x2d, g, bln, w1, b1, w2, b2):
    """Fused LN -> fc1 -> GELU(tanh) -> fc2 -> +residual, tiled over rows only."""
    M, D = x2d.shape
    Hd = w1.shape[1]
    tm = _row_block(M, prefer=(128, 256, 64, 32, 16, 8))   # smaller tiles: VMEM headroom
    w1 = w1 if w1.dtype == jnp.bfloat16 else w1.astype(jnp.bfloat16)
    w2 = w2 if w2.dtype == jnp.bfloat16 else w2.astype(jnp.bfloat16)
    return pl.pallas_call(
        _mlp_block_kernel,
        grid=(M // tm,),
        in_specs=[
            pl.BlockSpec((tm, D), lambda i: (i, 0)),
            pl.BlockSpec((1, D), lambda i: (0, 0)),
            pl.BlockSpec((1, D), lambda i: (0, 0)),
            pl.BlockSpec((D, Hd), lambda i: (0, 0)),
            pl.BlockSpec((1, Hd), lambda i: (0, 0)),
            pl.BlockSpec((Hd, D), lambda i: (0, 0)),
            pl.BlockSpec((1, D), lambda i: (0, 0)),
        ],
        out_specs=pl.BlockSpec((tm, D), lambda i: (i, 0)),
        out_shape=jax.ShapeDtypeStruct((M, D), jnp.bfloat16),
        compiler_params=pltpu.CompilerParams(
            dimension_semantics=("parallel",),
            vmem_limit_bytes=_VMEM_LIMIT),
    )(x2d,
      g.reshape(1, D).astype(jnp.float32), bln.reshape(1, D).astype(jnp.float32),
      w1, b1.reshape(1, Hd).astype(jnp.float32),
      w2, b2.reshape(1, D).astype(jnp.float32))


def _attn_kernel(qkv_ref, o_ref, *, num_heads, head_dim, scale, l_real):
    """Multi-head attention for one batch element directly from the packed
    (L, 3D) QKV buffer; heads are sliced in VMEM (no XLA transposes)."""
    Lp = qkv_ref.shape[1]
    D = num_heads * head_dim

    neg = None
    if l_real < Lp:   # mask padded key tokens (static at trace time)
        key_ids = jax.lax.broadcasted_iota(jnp.int32, (Lp, Lp), 1)
        neg = jnp.where(key_ids < l_real, 0.0, -1e30).astype(jnp.float32)

    for h in range(num_heads):
        q = qkv_ref[0, :, h * head_dim:(h + 1) * head_dim].astype(jnp.float32) * scale
        k = qkv_ref[0, :, D + h * head_dim:D + (h + 1) * head_dim].astype(jnp.bfloat16)
        v = qkv_ref[0, :, 2 * D + h * head_dim:2 * D + (h + 1) * head_dim].astype(jnp.bfloat16)
        s = jax.lax.dot_general(q.astype(jnp.bfloat16), k,
                                (((1,), (1,)), ((), ())),
                                preferred_element_type=jnp.float32)      # (Lp, Lp)
        if neg is not None:
            s = s + neg
        s = s - jnp.max(s, axis=-1, keepdims=True)
        p = jnp.exp(s)
        inv = pl.reciprocal(jnp.sum(p, axis=-1, keepdims=True), approx=True)
        p = (p * inv).astype(jnp.bfloat16)
        o = jnp.dot(p, v, preferred_element_type=jnp.float32)            # (Lp, Dh)
        o_ref[0, :, h * head_dim:(h + 1) * head_dim] = o.astype(o_ref.dtype)


def attention(qkv3d, num_heads, head_dim, l_real):
    """qkv3d: (B, L, 3D) packed -> (B, L, D) attention output; grid over B."""
    B, L, threeD = qkv3d.shape
    D = num_heads * head_dim
    scale = head_dim ** -0.5
    return pl.pallas_call(
        partial(_attn_kernel, num_heads=num_heads, head_dim=head_dim,
                scale=scale, l_real=l_real),
        grid=(B,),
        in_specs=[pl.BlockSpec((1, L, threeD), lambda b: (b, 0, 0))],
        out_specs=pl.BlockSpec((1, L, D), lambda b: (b, 0, 0)),
        out_shape=jax.ShapeDtypeStruct((B, L, D), jnp.bfloat16),
        compiler_params=pltpu.CompilerParams(
            dimension_semantics=("parallel",),
            vmem_limit_bytes=_VMEM_LIMIT),
    )(qkv3d)


def _pool_norm_kernel(x_ref, g_ref, b_ref, o_ref, *, l_real):
    x = x_ref[0].astype(jnp.float32)                        # (Lp, D)
    Lp = x.shape[0]
    row_ids = jax.lax.broadcasted_iota(jnp.int32, (Lp, 1), 0)
    keep = (row_ids >= 1) & (row_ids < l_real)              # patch tokens only
    pooled = jnp.sum(jnp.where(keep, x, 0.0), axis=0, keepdims=True) \
        * (1.0 / (l_real - 1))
    o_ref[0] = _layernorm(pooled, g_ref[...], b_ref[...]).astype(o_ref.dtype)


def pool_and_norm(x3d, g, b, l_real):
    B, L, D = x3d.shape
    out = pl.pallas_call(
        partial(_pool_norm_kernel, l_real=l_real),
        grid=(B,),
        in_specs=[
            pl.BlockSpec((1, L, D), lambda i: (i, 0, 0)),
            pl.BlockSpec((1, D), lambda i: (0, 0)),
            pl.BlockSpec((1, D), lambda i: (0, 0)),
        ],
        out_specs=pl.BlockSpec((1, 1, D), lambda i: (i, 0, 0)),
        out_shape=jax.ShapeDtypeStruct((B, 1, D), jnp.float32),
        compiler_params=pltpu.CompilerParams(dimension_semantics=("parallel",)),
    )(x3d, g.reshape(1, D).astype(jnp.float32), b.reshape(1, D).astype(jnp.float32))
    return out[:, 0, :]


# ----------------------------------------------------------------------------
# Plain-JAX glue (Fourier expansions, pos-embed resize)
# ----------------------------------------------------------------------------
def fourier_expansion(x, d, lower, upper):
    """Aurora-style Fourier expansion: (...,) -> (..., d)."""
    wavelengths = jnp.logspace(math.log10(lower), math.log10(upper), d // 2,
                               dtype=jnp.float32)
    prod = x[..., None].astype(jnp.float32) * (2.0 * math.pi / wavelengths)
    return jnp.concatenate([jnp.sin(prod), jnp.cos(prod)], axis=-1)


def resize_abs_pos_embed(pos_embed, new_size, old_size, num_prefix_tokens=1):
    if new_size == old_size[0] and new_size == old_size[1]:
        return pos_embed
    prefix = pos_embed[:, :num_prefix_tokens]
    grid = pos_embed[:, num_prefix_tokens:].reshape(1, old_size[0], old_size[1], -1)
    grid = jax.image.resize(grid, (1, new_size, new_size, grid.shape[-1]), method="bicubic")
    grid = grid.reshape(1, new_size * new_size, -1)
    return jnp.concatenate([prefix, grid], axis=1)


# ----------------------------------------------------------------------------
# Dynamic (hyper-network) patch embedding — spectral mode
# ----------------------------------------------------------------------------
def dynamic_patch_embed_spectral(x, waves, bandwidths, p, ks, embed_dim, wv_planes):
    B, C, H, W = x.shape
    wv_feats = fourier_expansion(waves, wv_planes, 1.0, 20000.0)        # (C, 128)
    bw_feats = fourier_expansion(bandwidths, wv_planes, 1.0, 20000.0)   # (C, 128)
    feats = wv_feats + bw_feats

    # FCResLayer-style refinement (Pallas matmuls + ReLU glue)
    h = jax.nn.relu(linear(feats, p["fc1_w"], p["fc1_b"], out_dtype=jnp.float32))
    h = linear(h, p["fc2_w"], p["fc2_b"], out_dtype=jnp.float32)
    feats = jax.nn.relu(h + feats)

    # TODO(synk): TransformerWeightGenerator (source not in the provided module) is
    # replaced by a deterministic linear hyper-network producing the conv kernel/bias.
    w_flat = linear(feats, p["gen_w"], p["gen_b"], out_dtype=jnp.float32)    # (C, ks*ks*D)
    bias = linear(jnp.mean(feats, axis=0, keepdims=True), p["bias_w"], p["bias_b"],
                  out_dtype=jnp.float32)[0]
    scaler = 0.01
    conv_w = (w_flat.reshape(C * ks * ks, embed_dim) * scaler).astype(jnp.bfloat16)
    conv_b = bias * scaler

    # patchify (== conv2d with stride == kernel) then project with a Pallas matmul
    # TODO(synk): fuse the im2col into the matmul via a (B, ph, pw) element-block
    # BlockSpec grid to avoid the XLA-side materialization of the patch matrix.
    ph, pw = H // ks, W // ks
    patches = (x.reshape(B, C, ph, ks, pw, ks)
               .transpose(0, 2, 4, 1, 3, 5)
               .reshape(B * ph * pw, C * ks * ks))
    tokens = linear(patches, conv_w, conv_b, out_dtype=jnp.float32)
    return tokens.reshape(B, ph * pw, embed_dim), waves


# ----------------------------------------------------------------------------
# Transformer block (timm ViT Block semantics) — 4 Pallas calls per block
# ----------------------------------------------------------------------------
def vit_block(x, p, num_heads, l_real):
    B, L, D = x.shape
    Dh = D // num_heads
    x2d = x.reshape(B * L, D)

    # fused LayerNorm + QKV projection (bf16 out)
    qkv = ln_linear(x2d, p["norm1_g"], p["norm1_b"], p["qkv_w"], p["qkv_b"])  # (B*L, 3D)

    # attention consumes the packed QKV directly; heads are sliced in VMEM
    a = attention(qkv.reshape(B, L, 3 * D), num_heads, Dh, l_real)            # (B, L, D)

    # out-projection with the residual add fused as an epilogue
    x2d = linear(a.reshape(B * L, D), p["proj_w"], p["proj_b"], residual=x2d)

    # fused LN -> fc1 -> GELU -> fc2 -> +residual
    x2d = mlp_block(x2d, p["norm2_g"], p["norm2_b"],
                    p["fc1_w"], p["fc1_b"], p["fc2_w"], p["fc2_b"])
    return x2d.reshape(B, L, D)


# ----------------------------------------------------------------------------
# Full forward (jit-friendly: no host-side data-dependent branching)
# ----------------------------------------------------------------------------
def copernicus_fm_vit_forward(params, cfg, x, meta_info, waves, bandwidths,
                              language_embed=None, input_mode="spectral",
                              kernel_size=None):
    D = cfg["embed_dim"]

    if input_mode == "spectral":
        ks = kernel_size if kernel_size is not None else cfg["patch_size"]
        x_tok, _ = dynamic_patch_embed_spectral(
            x, waves, bandwidths, params["patch_embed_spectral"], ks, D,
            cfg["wv_planes"])
    elif input_mode == "variable":
        # TODO(synk): Dynamic_MLP_OFA_variable (language-embedding hypernetwork)
        # source not provided with the module; not implemented.
        raise NotImplementedError("variable input mode not implemented")
    else:
        raise ValueError(input_mode)

    B, num_patches, _ = x_tok.shape
    n_sqrt = int(math.sqrt(num_patches))
    n_sqrt_orig = int(math.sqrt(cfg["num_patches"]))
    pos_embed = resize_abs_pos_embed(params["pos_embed"], n_sqrt,
                                     (n_sqrt_orig, n_sqrt_orig), num_prefix_tokens=1)

    lons, lats, times, areas = (meta_info[:, 0], meta_info[:, 1],
                                meta_info[:, 2], meta_info[:, 3])

    # coordinate embedding ('lonlat'); NaN fallback resolved on-device with where
    lon_e = fourier_expansion(lons + 180.0, D // 2, 1e-4, 720.0)
    lat_e = fourier_expansion(lats + 90.0, D // 2, 1e-4, 720.0)
    ce = jnp.concatenate([lon_e, lat_e], axis=-1)
    if ce.shape[-1] < D:
        ce = jnp.concatenate(
            [ce, jnp.zeros((ce.shape[0], D - ce.shape[-1]), jnp.float32)], axis=-1)
    ce = ce[:, None, :]
    coord_nan = jnp.any(jnp.isnan(lons)) | jnp.any(jnp.isnan(lats))
    coord_embed = jnp.where(coord_nan, params["coord_token"], ce)
    coord_embed = linear(coord_embed.reshape(-1, D), params["coord_fc_w"],
                         params["coord_fc_b"], out_dtype=jnp.float32).reshape(-1, 1, D)

    # area / scale embedding
    ae = fourier_expansion(areas, D, 0.001, 5.1e8)[:, None, :]
    area_embed = jnp.where(jnp.any(jnp.isnan(areas)), params["scale_token"], ae)
    area_embed = linear(area_embed.reshape(-1, D), params["scale_fc_w"],
                        params["scale_fc_b"], out_dtype=jnp.float32).reshape(-1, 1, D)

    # time embedding
    te = fourier_expansion(times, D, 1.0, 365.25)[:, None, :]
    time_embed = jnp.where(jnp.any(jnp.isnan(times)), params["time_token"], te)
    time_embed = linear(time_embed.reshape(-1, D), params["time_fc_w"],
                        params["time_fc_b"], out_dtype=jnp.float32).reshape(-1, 1, D)

    pos = pos_embed + coord_embed + area_embed + time_embed            # (B, P+1, D)
    x_tok = x_tok + pos[:, 1:, :]
    cls_tokens = jnp.broadcast_to(params["cls_token"] + pos[:, :1, :], (B, 1, D))
    x_seq = jnp.concatenate([cls_tokens, x_tok], axis=1)               # (B, P+1, D)

    # pad the token axis to a sublane/lane friendly length; residual stream -> bf16
    L_real = num_patches + 1
    L_pad = _round_up(L_real, 8) if L_real <= 128 else _round_up(L_real, 128)
    if L_pad != L_real:
        x_seq = jnp.pad(x_seq, ((0, 0), (0, L_pad - L_real), (0, 0)))
    x_seq = x_seq.astype(jnp.bfloat16)

    for blk in params["blocks"]:
        x_seq = vit_block(x_seq, blk, cfg["num_heads"], L_real)

    # global pool (mean over real patch tokens) + fc_norm, fused in one Pallas kernel
    outcome = pool_and_norm(x_seq, params["fc_norm_g"], params["fc_norm_b"], L_real)

    # head: num_classes == 0 -> Identity; head_drop is a no-op at eval
    return outcome, outcome


# ----------------------------------------------------------------------------
# Deterministic parameter init (shapes follow the module's __init__)
# Weight matrices are pre-cast to bf16 once; LN params / biases / tokens stay f32.
# ----------------------------------------------------------------------------
def init_params(key, *, img_size=16, patch_size=8, embed_dim=32, depth=2,
                num_heads=4, mlp_ratio=4.0, wv_planes=128):
    num_patches = (img_size // patch_size) ** 2
    hidden = int(embed_dim * mlp_ratio)
    ks = patch_size

    keys = iter(jax.random.split(key, 128))

    def nrm(shape, std=0.02, dtype=jnp.float32):
        return (std * jax.random.normal(next(keys), shape)).astype(dtype)

    def wmat(shape):
        return nrm(shape, dtype=jnp.bfloat16)

    def zeros(shape):
        return jnp.zeros(shape, jnp.float32)

    def ones(shape):
        return jnp.ones(shape, jnp.float32)

    cfg = dict(img_size=img_size, patch_size=patch_size, embed_dim=embed_dim,
               depth=depth, num_heads=num_heads, mlp_ratio=mlp_ratio,
               wv_planes=wv_planes, num_patches=num_patches)

    params = {
        "patch_embed_spectral": {
            "fc1_w": wmat((wv_planes, wv_planes)), "fc1_b": zeros((wv_planes,)),
            "fc2_w": wmat((wv_planes, wv_planes)), "fc2_b": zeros((wv_planes,)),
            "gen_w": wmat((wv_planes, ks * ks * embed_dim)),
            "gen_b": zeros((ks * ks * embed_dim,)),
            "bias_w": wmat((wv_planes, embed_dim)), "bias_b": zeros((embed_dim,)),
        },
        "cls_token": nrm((1, 1, embed_dim)),
        "pos_embed": nrm((1, num_patches + 1, embed_dim)),
        "coord_token": nrm((1, 1, embed_dim)),
        "scale_token": nrm((1, 1, embed_dim)),
        "time_token": nrm((1, 1, embed_dim)),
        "coord_fc_w": wmat((embed_dim, embed_dim)), "coord_fc_b": zeros((embed_dim,)),
        "scale_fc_w": wmat((embed_dim, embed_dim)), "scale_fc_b": zeros((embed_dim,)),
        "time_fc_w": wmat((embed_dim, embed_dim)), "time_fc_b": zeros((embed_dim,)),
        "fc_norm_g": ones((embed_dim,)), "fc_norm_b": zeros((embed_dim,)),
        "blocks": [],
    }
    for _ in range(depth):
        params["blocks"].append({
            "norm1_g": ones((embed_dim,)), "norm1_b": zeros((embed_dim,)),
            "qkv_w": wmat((embed_dim, 3 * embed_dim)), "qkv_b": zeros((3 * embed_dim,)),
            "proj_w": wmat((embed_dim, embed_dim)), "proj_b": zeros((embed_dim,)),
            "norm2_g": ones((embed_dim,)), "norm2_b": zeros((embed_dim,)),
            "fc1_w": wmat((embed_dim, hidden)), "fc1_b": zeros((hidden,)),
            "fc2_w": wmat((hidden, embed_dim)), "fc2_b": zeros((embed_dim,)),
        })
    return cfg, params


# ----------------------------------------------------------------------------
if __name__ == "__main__":
    key = jax.random.PRNGKey(0)
    kp, kx = jax.random.split(key)

    cfg, params = init_params(kp, img_size=16, patch_size=8, embed_dim=32,
                              depth=2, num_heads=4, mlp_ratio=4.0, wv_planes=128)

    B, C, H, W = 2, 4, 16, 16
    x = jax.random.normal(kx, (B, C, H, W), jnp.float32)
    meta_info = jnp.array([[10.0, 50.0, 120.0, 1.0],
                           [-60.0, -20.0, 300.0, 250000.0]], jnp.float32)
    waves = jnp.array([490.0, 560.0, 665.0, 842.0], jnp.float32)    # central wavelength (nm)
    bws = jnp.array([65.0, 35.0, 30.0, 115.0], jnp.float32)         # bandwidth (nm)

    fwd = jax.jit(lambda p, xx, mi, wv, bw: copernicus_fm_vit_forward(
        p, cfg, xx, mi, wv, bw, language_embed=None,
        input_mode="spectral", kernel_size=None))

    out, feats = fwd(params, x, meta_info, waves, bws)
    jax.block_until_ready(out)
    assert out.shape == (B, 32) and feats.shape == (B, 32)
    assert bool(jnp.all(jnp.isfinite(out)))
    print("KERNEL_OK")
</pallas_src>

<mosaic_0001>
module attributes {stable_mosaic.version = 11 : i64} {
  func.func @_matmul_bias_kernel(%arg0: i32, %arg1: i32, %arg2: memref<4x128xf32, #tpu.memory_space<vmem>>, %arg3: memref<128x128xbf16, #tpu.memory_space<vmem>>, %arg4: memref<1x128xf32, #tpu.memory_space<vmem>>, %arg5: memref<4x128xf32, #tpu.memory_space<vmem>>) attributes {dimension_semantics = [#tpu.dimension_semantics<parallel>, #tpu.dimension_semantics<parallel>], iteration_bounds = array<i64: 1, 1>, scalar_prefetch = 0 : i64, scratch_operands = 0 : i64, tpu.core_type = #tpu.core_type<tc>, window_params = [{transform_indices = @transform_0, window_bounds = array<i64: 4, 128>}, {transform_indices = @transform_1, window_bounds = array<i64: 128, 128>}, {transform_indices = @transform_2, window_bounds = array<i64: 1, 128>}, {transform_indices = @transform_3, window_bounds = array<i64: 4, 128>}]} {
    %c0 = arith.constant 0 : index
    %c0_0 = arith.constant 0 : index
    %0 = vector.load %arg2[%c0, %c0_0] : memref<4x128xf32, #tpu.memory_space<vmem>>, vector<4x128xf32>
    %1 = arith.truncf %0 : vector<4x128xf32> to vector<4x128xbf16>
    %c0_1 = arith.constant 0 : index
    %c0_2 = arith.constant 0 : index
    %2 = vector.load %arg3[%c0_1, %c0_2] : memref<128x128xbf16, #tpu.memory_space<vmem>>, vector<128x128xbf16>
    %cst = arith.constant dense<0.000000e+00> : vector<4x128xf32>
    %3 = tpu.matmul %1, %2, %cst {dimension_numbers = #tpu.dot_dimension_numbers<[1], [0], [0], [1], [0, 0, 1, 1], [], []>} : vector<4x128xbf16>, vector<128x128xbf16>, vector<4x128xf32> -> vector<4x128xf32>
    %c0_3 = arith.constant 0 : index
    %c0_4 = arith.constant 0 : index
    %4 = vector.load %arg4[%c0_3, %c0_4] : memref<1x128xf32, #tpu.memory_space<vmem>>, vector<1x128xf32>
    %5 = vector.broadcast %4 : vector<1x128xf32> to vector<4x128xf32>
    %6 = arith.addf %3, %5 : vector<4x128xf32>
    %c0_5 = arith.constant 0 : index
    %c0_6 = arith.constant 0 : index
    %7 = vector.load %arg5[%c0_5, %c0_6] : memref<4x128xf32, #tpu.memory_space<vmem>>, vector<4x128xf32>
    tpu.vector_store %arg5[%c0_5, %c0_6], %6 {strides = array<i32>} : memref<4x128xf32, #tpu.memory_space<vmem>>, vector<4x128xf32>,
    return
  }
  func.func @transform_0(%arg0: i32, %arg1: i32) -> (i32, i32) {
    %c0_i32 = arith.constant 0 : i32
    %c0_i32_0 = arith.constant 0 : i32
    return %arg0, %c0_i32 : i32, i32
  }
  func.func @transform_1(%arg0: i32, %arg1: i32) -> (i32, i32) {
    %c0_i32 = arith.constant 0 : i32
    %c0_i32_0 = arith.constant 0 : i32
    return %c0_i32, %arg1 : i32, i32
  }
  func.func @transform_2(%arg0: i32, %arg1: i32) -> (i32, i32) {
    %c0_i32 = arith.constant 0 : i32
    %c0_i32_0 = arith.constant 0 : i32
    return %c0_i32, %arg1 : i32, i32
  }
  func.func @transform_3(%arg0: i32, %arg1: i32) -> (i32, i32) {
    %c0_i32 = arith.constant 0 : i32
    return %arg0, %arg1 : i32, i32
  }
}

module attributes {stable_mosaic.version = 11 : i64} {
  func.func @_matmul_bias_kernel(%arg0: i32, %arg1: i32, %arg2: memref<4x128xf32, #tpu.memory_space<vmem>>, %arg3: memref<128x512xbf16, #tpu.memory_space<vmem>>, %arg4: memref<1x512xf32, #tpu.memory_space<vmem>>, %arg5: memref<4x512xf32, #tpu.memory_space<vmem>>) attributes {dimension_semantics = [#tpu.dimension_semantics<parallel>, #tpu.dimension_semantics<parallel>], iteration_bounds = array<i64: 1, 4>, scalar_prefetch = 0 : i64, scratch_operands = 0 : i64, tpu.core_type = #tpu.core_type<tc>, window_params = [{transform_indices = @transform_0, window_bounds = array<i64: 4, 128>}, {transform_indices = @transform_1, window_bounds = array<i64: 128, 512>}, {transform_indices = @transform_2, window_bounds = array<i64: 1, 512>}, {transform_indices = @transform_3, window_bounds = array<i64: 4, 512>}]} {
    %c0 = arith.constant 0 : index
    %c0_0 = arith.constant 0 : index
    %0 = vector.load %arg2[%c0, %c0_0] : memref<4x128xf32, #tpu.memory_space<vmem>>, vector<4x128xf32>
    %1 = arith.truncf %0 : vector<4x128xf32> to vector<4x128xbf16>
    %c0_1 = arith.constant 0 : index
    %c0_2 = arith.constant 0 : index
    %2 = vector.load %arg3[%c0_1, %c0_2] : memref<128x512xbf16, #tpu.memory_space<vmem>>, vector<128x512xbf16>
    %cst = arith.constant dense<0.000000e+00> : vector<4x512xf32>
    %3 = tpu.matmul %1, %2, %cst {dimension_numbers = #tpu.dot_dimension_numbers<[1], [0], [0], [1], [0, 0, 1, 1], [], []>} : vector<4x128xbf16>, vector<128x512xbf16>, vector<4x512xf32> -> vector<4x512xf32>
    %c0_3 = arith.constant 0 : index
    %c0_4 = arith.constant 0 : index
    %4 = vector.load %arg4[%c0_3, %c0_4] : memref<1x512xf32, #tpu.memory_space<vmem>>, vector<1x512xf32>
    %5 = vector.broadcast %4 : vector<1x512xf32> to vector<4x512xf32>
    %6 = arith.addf %3, %5 : vector<4x512xf32>
    %c0_5 = arith.constant 0 : index
    %c0_6 = arith.constant 0 : index
    %7 = vector.load %arg5[%c0_5, %c0_6] : memref<4x512xf32, #tpu.memory_space<vmem>>, vector<4x512xf32>
    tpu.vector_store %arg5[%c0_5, %c0_6], %6 {strides = array<i32>} : memref<4x512xf32, #tpu.memory_space<vmem>>, vector<4x512xf32>,
    return
  }
  func.func @transform_0(%arg0: i32, %arg1: i32) -> (i32, i32) {
    %c0_i32 = arith.constant 0 : i32
    %c0_i32_0 = arith.constant 0 : i32
    return %arg0, %c0_i32 : i32, i32
  }
  func.func @transform_1(%arg0: i32, %arg1: i32) -> (i32, i32) {
    %c0_i32 = arith.constant 0 : i32
    %c0_i32_0 = arith.constant 0 : i32
    return %c0_i32, %arg1 : i32, i32
  }
  func.func @transform_2(%arg0: i32, %arg1: i32) -> (i32, i32) {
    %c0_i32 = arith.constant 0 : i32
    %c0_i32_0 = arith.constant 0 : i32
    return %c0_i32, %arg1 : i32, i32
  }
  func.func @transform_3(%arg0: i32, %arg1: i32) -> (i32, i32) {
    %c0_i32 = arith.constant 0 : i32
    return %arg0, %arg1 : i32, i32
  }
}

module attributes {stable_mosaic.version = 11 : i64} {
  func.func @_matmul_bias_kernel(%arg0: i32, %arg1: i32, %arg2: memref<1x128xf32, #tpu.memory_space<vmem>>, %arg3: memref<128x32xbf16, #tpu.memory_space<vmem>>, %arg4: memref<1x32xf32, #tpu.memory_space<vmem>>, %arg5: memref<1x32xf32, #tpu.memory_space<vmem>>) attributes {dimension_semantics = [#tpu.dimension_semantics<parallel>, #tpu.dimension_semantics<parallel>], iteration_bounds = array<i64: 1, 1>, scalar_prefetch = 0 : i64, scratch_operands = 0 : i64, tpu.core_type = #tpu.core_type<tc>, window_params = [{transform_indices = @transform_0, window_bounds = array<i64: 1, 128>}, {transform_indices = @transform_1, window_bounds = array<i64: 128, 32>}, {transform_indices = @transform_2, window_bounds = array<i64: 1, 32>}, {transform_indices = @transform_3, window_bounds = array<i64: 1, 32>}]} {
    %c0 = arith.constant 0 : index
    %c0_0 = arith.constant 0 : index
    %0 = vector.load %arg2[%c0, %c0_0] : memref<1x128xf32, #tpu.memory_space<vmem>>, vector<1x128xf32>
    %1 = arith.truncf %0 : vector<1x128xf32> to vector<1x128xbf16>
    %c0_1 = arith.constant 0 : index
    %c0_2 = arith.constant 0 : index
    %2 = vector.load %arg3[%c0_1, %c0_2] : memref<128x32xbf16, #tpu.memory_space<vmem>>, vector<128x32xbf16>
    %cst = arith.constant dense<0.000000e+00> : vector<1x32xf32>
    %3 = tpu.matmul %1, %2, %cst {dimension_numbers = #tpu.dot_dimension_numbers<[1], [0], [0], [1], [0, 0, 1, 1], [], []>} : vector<1x128xbf16>, vector<128x32xbf16>, vector<1x32xf32> -> vector<1x32xf32>
    %c0_3 = arith.constant 0 : index
    %c0_4 = arith.constant 0 : index
    %4 = vector.load %arg4[%c0_3, %c0_4] : memref<1x32xf32, #tpu.memory_space<vmem>>, vector<1x32xf32>
    %5 = arith.addf %3, %4 : vector<1x32xf32>
    %c0_5 = arith.constant 0 : index
    %c0_6 = arith.constant 0 : index
    %6 = vector.load %arg5[%c0_5, %c0_6] : memref<1x32xf32, #tpu.memory_space<vmem>>, vector<1x32xf32>
    tpu.vector_store %arg5[%c0_5, %c0_6], %5 {strides = array<i32>} : memref<1x32xf32, #tpu.memory_space<vmem>>, vector<1x32xf32>,
    return
  }
  func.func @transform_0(%arg0: i32, %arg1: i32) -> (i32, i32) {
    %c0_i32 = arith.constant 0 : i32
    %c0_i32_0 = arith.constant 0 : i32
    return %arg0, %c0_i32 : i32, i32
  }
  func.func @transform_1(%arg0: i32, %arg1: i32) -> (i32, i32) {
    %c0_i32 = arith.constant 0 : i32
    %c0_i32_0 = arith.constant 0 : i32
    return %c0_i32, %arg1 : i32, i32
  }
  func.func @transform_2(%arg0: i32, %arg1: i32) -> (i32, i32) {
    %c0_i32 = arith.constant 0 : i32
    %c0_i32_0 = arith.constant 0 : i32
    return %c0_i32, %arg1 : i32, i32
  }
  func.func @transform_3(%arg0: i32, %arg1: i32) -> (i32, i32) {
    %c0_i32 = arith.constant 0 : i32
    return %arg0, %arg1 : i32, i32
  }
}

module attributes {stable_mosaic.version = 11 : i64} {
  func.func @_matmul_bias_kernel(%arg0: i32, %arg1: i32, %arg2: memref<8x256xf32, #tpu.memory_space<vmem>>, %arg3: memref<256x32xbf16, #tpu.memory_space<vmem>>, %arg4: memref<1x32xf32, #tpu.memory_space<vmem>>, %arg5: memref<8x32xf32, #tpu.memory_space<vmem>>) attributes {dimension_semantics = [#tpu.dimension_semantics<parallel>, #tpu.dimension_semantics<parallel>], iteration_bounds = array<i64: 1, 1>, scalar_prefetch = 0 : i64, scratch_operands = 0 : i64, tpu.core_type = #tpu.core_type<tc>, window_params = [{transform_indices = @transform_0, window_bounds = array<i64: 8, 256>}, {transform_indices = @transform_1, window_bounds = array<i64: 256, 32>}, {transform_indices = @transform_2, window_bounds = array<i64: 1, 32>}, {transform_indices = @transform_3, window_bounds = array<i64: 8, 32>}]} {
    %c0 = arith.constant 0 : index
    %c0_0 = arith.constant 0 : index
    %0 = vector.load %arg2[%c0, %c0_0] : memref<8x256xf32, #tpu.memory_space<vmem>>, vector<8x256xf32>
    %1 = arith.truncf %0 : vector<8x256xf32> to vector<8x256xbf16>
    %c0_1 = arith.constant 0 : index
    %c0_2 = arith.constant 0 : index
    %2 = vector.load %arg3[%c0_1, %c0_2] : memref<256x32xbf16, #tpu.memory_space<vmem>>, vector<256x32xbf16>
    %cst = arith.constant dense<0.000000e+00> : vector<8x32xf32>
    %3 = tpu.matmul %1, %2, %cst {dimension_numbers = #tpu.dot_dimension_numbers<[1], [0], [0], [1], [0, 0, 1, 1], [], []>} : vector<8x256xbf16>, vector<256x32xbf16>, vector<8x32xf32> -> vector<8x32xf32>
    %c0_3 = arith.constant 0 : index
    %c0_4 = arith.constant 0 : index
    %4 = vector.load %arg4[%c0_3, %c0_4] : memref<1x32xf32, #tpu.memory_space<vmem>>, vector<1x32xf32>
    %5 = vector.broadcast %4 : vector<1x32xf32> to vector<8x32xf32>
    %6 = arith.addf %3, %5 : vector<8x32xf32>
    %c0_5 = arith.constant 0 : index
    %c0_6 = arith.constant 0 : index
    %7 = vector.load %arg5[%c0_5, %c0_6] : memref<8x32xf32, #tpu.memory_space<vmem>>, vector<8x32xf32>
    tpu.vector_store %arg5[%c0_5, %c0_6], %6 {strides = array<i32>} : memref<8x32xf32, #tpu.memory_space<vmem>>, vector<8x32xf32>,
    return
  }
  func.func @transform_0(%arg0: i32, %arg1: i32) -> (i32, i32) {
    %c0_i32 = arith.constant 0 : i32
    %c0_i32_0 = arith.constant 0 : i32
    return %arg0, %c0_i32 : i32, i32
  }
  func.func @transform_1(%arg0: i32, %arg1: i32) -> (i32, i32) {
    %c0_i32 = arith.constant 0 : i32
    %c0_i32_0 = arith.constant 0 : i32
    return %c0_i32, %arg1 : i32, i32
  }
  func.func @transform_2(%arg0: i32, %arg1: i32) -> (i32, i32) {
    %c0_i32 = arith.constant 0 : i32
    %c0_i32_0 = arith.constant 0 : i32
    return %c0_i32, %arg1 : i32, i32
  }
  func.func @transform_3(%arg0: i32, %arg1: i32) -> (i32, i32) {
    %c0_i32 = arith.constant 0 : i32
    return %arg0, %arg1 : i32, i32
  }
}

module attributes {stable_mosaic.version = 11 : i64} {
  func.func @_matmul_bias_kernel(%arg0: i32, %arg1: i32, %arg2: memref<2x32xf32, #tpu.memory_space<vmem>>, %arg3: memref<32x32xbf16, #tpu.memory_space<vmem>>, %arg4: memref<1x32xf32, #tpu.memory_space<vmem>>, %arg5: memref<2x32xf32, #tpu.memory_space<vmem>>) attributes {dimension_semantics = [#tpu.dimension_semantics<parallel>, #tpu.dimension_semantics<parallel>], iteration_bounds = array<i64: 1, 1>, scalar_prefetch = 0 : i64, scratch_operands = 0 : i64, tpu.core_type = #tpu.core_type<tc>, window_params = [{transform_indices = @transform_0, window_bounds = array<i64: 2, 32>}, {transform_indices = @transform_1, window_bounds = array<i64: 32, 32>}, {transform_indices = @transform_2, window_bounds = array<i64: 1, 32>}, {transform_indices = @transform_3, window_bounds = array<i64: 2, 32>}]} {
    %c0 = arith.constant 0 : index
    %c0_0 = arith.constant 0 : index
    %0 = vector.load %arg2[%c0, %c0_0] : memref<2x32xf32, #tpu.memory_space<vmem>>, vector<2x32xf32>
    %1 = arith.truncf %0 : vector<2x32xf32> to vector<2x32xbf16>
    %c0_1 = arith.constant 0 : index
    %c0_2 = arith.constant 0 : index
    %2 = vector.load %arg3[%c0_1, %c0_2] : memref<32x32xbf16, #tpu.memory_space<vmem>>, vector<32x32xbf16>
    %cst = arith.constant dense<0.000000e+00> : vector<2x32xf32>
    %3 = tpu.matmul %1, %2, %cst {dimension_numbers = #tpu.dot_dimension_numbers<[1], [0], [0], [1], [0, 0, 1, 1], [], []>} : vector<2x32xbf16>, vector<32x32xbf16>, vector<2x32xf32> -> vector<2x32xf32>
    %c0_3 = arith.constant 0 : index
    %c0_4 = arith.constant 0 : index
    %4 = vector.load %arg4[%c0_3, %c0_4] : memref<1x32xf32, #tpu.memory_space<vmem>>, vector<1x32xf32>
    %5 = vector.broadcast %4 : vector<1x32xf32> to vector<2x32xf32>
    %6 = arith.addf %3, %5 : vector<2x32xf32>
    %c0_5 = arith.constant 0 : index
    %c0_6 = arith.constant 0 : index
    %7 = vector.load %arg5[%c0_5, %c0_6] : memref<2x32xf32, #tpu.memory_space<vmem>>, vector<2x32xf32>
    tpu.vector_store %arg5[%c0_5, %c0_6], %6 {strides = array<i32>} : memref<2x32xf32, #tpu.memory_space<vmem>>, vector<2x32xf32>,
    return
  }
  func.func @transform_0(%arg0: i32, %arg1: i32) -> (i32, i32) {
    %c0_i32 = arith.constant 0 : i32
    %c0_i32_0 = arith.constant 0 : i32
    return %arg0, %c0_i32 : i32, i32
  }
  func.func @transform_1(%arg0: i32, %arg1: i32) -> (i32, i32) {
    %c0_i32 = arith.constant 0 : i32
    %c0_i32_0 = arith.constant 0 : i32
    return %c0_i32, %arg1 : i32, i32
  }
  func.func @transform_2(%arg0: i32, %arg1: i32) -> (i32, i32) {
    %c0_i32 = arith.constant 0 : i32
    %c0_i32_0 = arith.constant 0 : i32
    return %c0_i32, %arg1 : i32, i32
  }
  func.func @transform_3(%arg0: i32, %arg1: i32) -> (i32, i32) {
    %c0_i32 = arith.constant 0 : i32
    return %arg0, %arg1 : i32, i32
  }
}

module attributes {stable_mosaic.version = 11 : i64} {
  func.func @_matmul_bias_res_kernel(%arg0: i32, %arg1: i32, %arg2: memref<8x32xbf16, #tpu.memory_space<vmem>>, %arg3: memref<32x32xbf16, #tpu.memory_space<vmem>>, %arg4: memref<1x32xf32, #tpu.memory_space<vmem>>, %arg5: memref<8x32xbf16, #tpu.memory_space<vmem>>, %arg6: memref<8x32xbf16, #tpu.memory_space<vmem>>) attributes {dimension_semantics = [#tpu.dimension_semantics<parallel>, #tpu.dimension_semantics<parallel>], iteration_bounds = array<i64: 2, 1>, scalar_prefetch = 0 : i64, scratch_operands = 0 : i64, tpu.core_type = #tpu.core_type<tc>, window_params = [{transform_indices = @transform_0, window_bounds = array<i64: 8, 32>}, {transform_indices = @transform_1, window_bounds = array<i64: 32, 32>}, {transform_indices = @transform_2, window_bounds = array<i64: 1, 32>}, {transform_indices = @transform_3, window_bounds = array<i64: 8, 32>}, {transform_indices = @transform_4, window_bounds = array<i64: 8, 32>}]} {
    %c0 = arith.constant 0 : index
    %c0_0 = arith.constant 0 : index
    %0 = vector.load %arg2[%c0, %c0_0] : memref<8x32xbf16, #tpu.memory_space<vmem>>, vector<8x32xbf16>
    %c0_1 = arith.constant 0 : index
    %c0_2 = arith.constant 0 : index
    %1 = vector.load %arg3[%c0_1, %c0_2] : memref<32x32xbf16, #tpu.memory_space<vmem>>, vector<32x32xbf16>
    %cst = arith.constant dense<0.000000e+00> : vector<8x32xf32>
    %2 = tpu.matmul %0, %1, %cst {dimension_numbers = #tpu.dot_dimension_numbers<[1], [0], [0], [1], [0, 0, 1, 1], [], []>} : vector<8x32xbf16>, vector<32x32xbf16>, vector<8x32xf32> -> vector<8x32xf32>
    %c0_3 = arith.constant 0 : index
    %c0_4 = arith.constant 0 : index
    %3 = vector.load %arg4[%c0_3, %c0_4] : memref<1x32xf32, #tpu.memory_space<vmem>>, vector<1x32xf32>
    %4 = vector.broadcast %3 : vector<1x32xf32> to vector<8x32xf32>
    %5 = arith.addf %2, %4 : vector<8x32xf32>
    %c0_5 = arith.constant 0 : index
    %c0_6 = arith.constant 0 : index
    %6 = vector.load %arg5[%c0_5, %c0_6] : memref<8x32xbf16, #tpu.memory_space<vmem>>, vector<8x32xbf16>
    %7 = arith.extf %6 : vector<8x32xbf16> to vector<8x32xf32>
    %8 = arith.addf %5, %7 : vector<8x32xf32>
    %9 = arith.truncf %8 : vector<8x32xf32> to vector<8x32xbf16>
    %c0_7 = arith.constant 0 : index
    %c0_8 = arith.constant 0 : index
    %10 = vector.load %arg6[%c0_7, %c0_8] : memref<8x32xbf16, #tpu.memory_space<vmem>>, vector<8x32xbf16>
    tpu.vector_store %arg6[%c0_7, %c0_8], %9 {strides = array<i32>} : memref<8x32xbf16, #tpu.memory_space<vmem>>, vector<8x32xbf16>,
    return
  }
  func.func @transform_0(%arg0: i32, %arg1: i32) -> (i32, i32) {
    %c0_i32 = arith.constant 0 : i32
    %c0_i32_0 = arith.constant 0 : i32
    return %arg0, %c0_i32 : i32, i32
  }
  func.func @transform_1(%arg0: i32, %arg1: i32) -> (i32, i32) {
    %c0_i32 = arith.constant 0 : i32
    %c0_i32_0 = arith.constant 0 : i32
    return %c0_i32, %arg1 : i32, i32
  }
  func.func @transform_2(%arg0: i32, %arg1: i32) -> (i32, i32) {
    %c0_i32 = arith.constant 0 : i32
    %c0_i32_0 = arith.constant 0 : i32
    return %c0_i32, %arg1 : i32, i32
  }
  func.func @transform_3(%arg0: i32, %arg1: i32) -> (i32, i32) {
    %c0_i32 = arith.constant 0 : i32
    return %arg0, %arg1 : i32, i32
  }
  func.func @transform_4(%arg0: i32, %arg1: i32) -> (i32, i32) {
    %c0_i32 = arith.constant 0 : i32
    return %arg0, %arg1 : i32, i32
  }
}

module attributes {stable_mosaic.version = 11 : i64} {
  func.func @_attn_kernel(%arg0: i32, %arg1: memref<1x8x96xbf16, #tpu.memory_space<vmem>>, %arg2: memref<1x8x32xbf16, #tpu.memory_space<vmem>>) attributes {dimension_semantics = [#tpu.dimension_semantics<parallel>], iteration_bounds = array<i64: 2>, scalar_prefetch = 0 : i64, scratch_operands = 0 : i64, tpu.core_type = #tpu.core_type<tc>, window_params = [{transform_indices = @transform_0, window_bounds = array<i64: 1, 8, 96>}, {transform_indices = @transform_1, window_bounds = array<i64: 1, 8, 32>}]} {
    %0 = tpu.iota {dimensions = array<i32: 1>} : vector<8x8xi32>
    %c5_i32 = arith.constant 5 : i32
    %1 = vector.broadcast %c5_i32 : i32 to vector<8x8xi32>
    %2 = arith.cmpi slt, %0, %1 : vector<8x8xi32>
    %cst = arith.constant 0.000000e+00 : f32
    %cst_0 = arith.constant -1.000000e+30 : f32
    %3 = vector.broadcast %cst : f32 to vector<8x8xf32>
    %4 = vector.broadcast %cst_0 : f32 to vector<8x8xf32>
    %5 = arith.select %2, %3, %4 : vector<8x8xi1>, vector<8x8xf32>
    %c0 = arith.constant 0 : index
    %c0_1 = arith.constant 0 : index
    %c0_2 = arith.constant 0 : index
    %6 = vector.load %arg1[%c0, %c0_1, %c0_2] : memref<1x8x96xbf16, #tpu.memory_space<vmem>>, vector<1x8x8xbf16>
    %7 = vector.shape_cast %6 : vector<1x8x8xbf16> to vector<8x8xbf16>
    %8 = arith.extf %7 : vector<8x8xbf16> to vector<8x8xf32>
    %cst_3 = arith.constant 0.353553385 : f32
    %9 = vector.broadcast %cst_3 : f32 to vector<8x8xf32>
    %10 = arith.mulf %8, %9 : vector<8x8xf32>
    %c0_4 = arith.constant 0 : index
    %c0_5 = arith.constant 0 : index
    %c32 = arith.constant 32 : index
    %11 = vector.load %arg1[%c0_4, %c0_5, %c32] : memref<1x8x96xbf16, #tpu.memory_space<vmem>>, vector<1x8x8xbf16>
    %12 = vector.shape_cast %11 : vector<1x8x8xbf16> to vector<8x8xbf16>
    %c0_6 = arith.constant 0 : index
    %c0_7 = arith.constant 0 : index
    %c64 = arith.constant 64 : index
    %13 = vector.load %arg1[%c0_6, %c0_7, %c64] : memref<1x8x96xbf16, #tpu.memory_space<vmem>>, vector<1x8x8xbf16>
    %14 = vector.shape_cast %13 : vector<1x8x8xbf16> to vector<8x8xbf16>
    %15 = arith.truncf %10 : vector<8x8xf32> to vector<8x8xbf16>
    %cst_8 = arith.constant dense<0.000000e+00> : vector<8x8xf32>
    %16 = tpu.matmul %15, %12, %cst_8 {dimension_numbers = #tpu.dot_dimension_numbers<[1], [1], [0], [0], [0, 0, 1, 0], [], []>} : vector<8x8xbf16>, vector<8x8xbf16>, vector<8x8xf32> -> vector<8x8xf32>
    %17 = arith.addf %16, %5 : vector<8x8xf32>
    %cst_9 = arith.constant dense<0xFF800000> : vector<8xf32>
    %18 = vector.multi_reduction <maximumf>, %17, %cst_9 [1] : vector<8x8xf32> to vector<8xf32>
    %19 = vector.shape_cast %18 : vector<8xf32> to vector<8x1xf32>
    %20 = vector.broadcast %19 : vector<8x1xf32> to vector<8x8xf32>
    %21 = arith.subf %17, %20 : vector<8x8xf32>
    %22 = math.exp %21 : vector<8x8xf32>
    %cst_10 = arith.constant dense<0.000000e+00> : vector<8xf32>
    %23 = vector.multi_reduction <add>, %22, %cst_10 [1] : vector<8x8xf32> to vector<8xf32>
    %24 = vector.shape_cast %23 : vector<8xf32> to vector<8x1xf32>
    %25 = tpu.reciprocal %24 {approx = true} : vector<8x1xf32> -> vector<8x1xf32>
    %26 = vector.broadcast %25 : vector<8x1xf32> to vector<8x8xf32>
    %27 = arith.mulf %22, %26 : vector<8x8xf32>
    %28 = arith.truncf %27 : vector<8x8xf32> to vector<8x8xbf16>
    %cst_11 = arith.constant dense<0.000000e+00> : vector<8x8xf32>
    %29 = tpu.matmul %28, %14, %cst_11 {dimension_numbers = #tpu.dot_dimension_numbers<[1], [0], [0], [1], [0, 0, 1, 1], [], []>} : vector<8x8xbf16>, vector<8x8xbf16>, vector<8x8xf32> -> vector<8x8xf32>
    %30 = arith.truncf %29 : vector<8x8xf32> to vector<8x8xbf16>
    %c0_12 = arith.constant 0 : index
    %c0_13 = arith.constant 0 : index
    %c0_14 = arith.constant 0 : index
    %31 = vector.load %arg2[%c0_12, %c0_13, %c0_14] : memref<1x8x32xbf16, #tpu.memory_space<vmem>>, vector<1x8x8xbf16>
    %32 = vector.shape_cast %31 : vector<1x8x8xbf16> to vector<8x8xbf16>
    %33 = vector.shape_cast %30 : vector<8x8xbf16> to vector<1x8x8xbf16>
    tpu.vector_store %arg2[%c0_12, %c0_13, %c0_14], %33 {strides = array<i32>} : memref<1x8x32xbf16, #tpu.memory_space<vmem>>, vector<1x8x8xbf16>,
    %c0_15 = arith.constant 0 : index
    %c0_16 = arith.constant 0 : index
    %c8 = arith.constant 8 : index
    %34 = vector.load %arg1[%c0_15, %c0_16, %c8] : memref<1x8x96xbf16, #tpu.memory_space<vmem>>, vector<1x8x8xbf16>
    %35 = vector.shape_cast %34 : vector<1x8x8xbf16> to vector<8x8xbf16>
    %36 = arith.extf %35 : vector<8x8xbf16> to vector<8x8xf32>
    %cst_17 = arith.constant 0.353553385 : f32
    %37 = vector.broadcast %cst_17 : f32 to vector<8x8xf32>
    %38 = arith.mulf %36, %37 : vector<8x8xf32>
    %c0_18 = arith.constant 0 : index
    %c0_19 = arith.constant 0 : index
    %c40 = arith.constant 40 : index
    %39 = vector.load %arg1[%c0_18, %c0_19, %c40] : memref<1x8x96xbf16, #tpu.memory_space<vmem>>, vector<1x8x8xbf16>
    %40 = vector.shape_cast %39 : vector<1x8x8xbf16> to vector<8x8xbf16>
    %c0_20 = arith.constant 0 : index
    %c0_21 = arith.constant 0 : index
    %c72 = arith.constant 72 : index
    %41 = vector.load %arg1[%c0_20, %c0_21, %c72] : memref<1x8x96xbf16, #tpu.memory_space<vmem>>, vector<1x8x8xbf16>
    %42 = vector.shape_cast %41 : vector<1x8x8xbf16> to vector<8x8xbf16>
    %43 = arith.truncf %38 : vector<8x8xf32> to vector<8x8xbf16>
    %cst_22 = arith.constant dense<0.000000e+00> : vector<8x8xf32>
    %44 = tpu.matmul %43, %40, %cst_22 {dimension_numbers = #tpu.dot_dimension_numbers<[1], [1], [0], [0], [0, 0, 1, 0], [], []>} : vector<8x8xbf16>, vector<8x8xbf16>, vector<8x8xf32> -> vector<8x8xf32>
    %45 = arith.addf %44, %5 : vector<8x8xf32>
    %cst_23 = arith.constant dense<0xFF800000> : vector<8xf32>
    %46 = vector.multi_reduction <maximumf>, %45, %cst_23 [1] : vector<8x8xf32> to vector<8xf32>
    %47 = vector.shape_cast %46 : vector<8xf32> to vector<8x1xf32>
    %48 = vector.broadcast %47 : vector<8x1xf32> to vector<8x8xf32>
    %49 = arith.subf %45, %48 : vector<8x8xf32>
    %50 = math.exp %49 : vector<8x8xf32>
    %cst_24 = arith.constant dense<0.000000e+00> : vector<8xf32>
    %51 = vector.multi_reduction <add>, %50, %cst_24 [1] : vector<8x8xf32> to vector<8xf32>
    %52 = vector.shape_cast %51 : vector<8xf32> to vector<8x1xf32>
    %53 = tpu.reciprocal %52 {approx = true} : vector<8x1xf32> -> vector<8x1xf32>
    %54 = vector.broadcast %53 : vector<8x1xf32> to vector<8x8xf32>
    %55 = arith.mulf %50, %54 : vector<8x8xf32>
    %56 = arith.truncf %55 : vector<8x8xf32> to vector<8x8xbf16>
    %cst_25 = arith.constant dense<0.000000e+00> : vector<8x8xf32>
    %57 = tpu.matmul %56, %42, %cst_25 {dimension_numbers = #tpu.dot_dimension_numbers<[1], [0], [0], [1], [0, 0, 1, 1], [], []>} : vector<8x8xbf16>, vector<8x8xbf16>, vector<8x8xf32> -> vector<8x8xf32>
    %58 = arith.truncf %57 : vector<8x8xf32> to vector<8x8xbf16>
    %c0_26 = arith.constant 0 : index
    %c0_27 = arith.constant 0 : index
    %c8_28 = arith.constant 8 : index
    %59 = vector.load %arg2[%c0_26, %c0_27, %c8_28] : memref<1x8x32xbf16, #tpu.memory_space<vmem>>, vector<1x8x8xbf16>
    %60 = vector.shape_cast %59 : vector<1x8x8xbf16> to vector<8x8xbf16>
    %61 = vector.shape_cast %58 : vector<8x8xbf16> to vector<1x8x8xbf16>
    tpu.vector_store %arg2[%c0_26, %c0_27, %c8_28], %61 {strides = array<i32>} : memref<1x8x32xbf16, #tpu.memory_space<vmem>>, vector<1x8x8xbf16>,
    %c0_29 = arith.constant 0 : index
    %c0_30 = arith.constant 0 : index
    %c16 = arith.constant 16 : index
    %62 = vector.load %arg1[%c0_29, %c0_30, %c16] : memref<1x8x96xbf16, #tpu.memory_space<vmem>>, vector<1x8x8xbf16>
    %63 = vector.shape_cast %62 : vector<1x8x8xbf16> to vector<8x8xbf16>
    %64 = arith.extf %63 : vector<8x8xbf16> to vector<8x8xf32>
    %cst_31 = arith.constant 0.353553385 : f32
    %65 = vector.broadcast %cst_31 : f32 to vector<8x8xf32>
    %66 = arith.mulf %64, %65 : vector<8x8xf32>
    %c0_32 = arith.constant 0 : index
    %c0_33 = arith.constant 0 : index
    %c48 = arith.constant 48 : index
    %67 = vector.load %arg1[%c0_32, %c0_33, %c48] : memref<1x8x96xbf16, #tpu.memory_space<vmem>>, vector<1x8x8xbf16>
    %68 = vector.shape_cast %67 : vector<1x8x8xbf16> to vector<8x8xbf16>
    %c0_34 = arith.constant 0 : index
    %c0_35 = arith.constant 0 : index
    %c80 = arith.constant 80 : index
    %69 = vector.load %arg1[%c0_34, %c0_35, %c80] : memref<1x8x96xbf16, #tpu.memory_space<vmem>>, vector<1x8x8xbf16>
    %70 = vector.shape_cast %69 : vector<1x8x8xbf16> to vector<8x8xbf16>
    %71 = arith.truncf %66 : vector<8x8xf32> to vector<8x8xbf16>
    %cst_36 = arith.constant dense<0.000000e+00> : vector<8x8xf32>
    %72 = tpu.matmul %71, %68, %cst_36 {dimension_numbers = #tpu.dot_dimension_numbers<[1], [1], [0], [0], [0, 0, 1, 0], [], []>} : vector<8x8xbf16>, vector<8x8xbf16>, vector<8x8xf32> -> vector<8x8xf32>
    %73 = arith.addf %72, %5 : vector<8x8xf32>
    %cst_37 = arith.constant dense<0xFF800000> : vector<8xf32>
    %74 = vector.multi_reduction <maximumf>, %73, %cst_37 [1] : vector<8x8xf32> to vector<8xf32>
    %75 = vector.shape_cast %74 : vector<8xf32> to vector<8x1xf32>
    %76 = vector.broadcast %75 : vector<8x1xf32> to vector<8x8xf32>
    %77 = arith.subf %73, %76 : vector<8x8xf32>
    %78 = math.exp %77 : vector<8x8xf32>
    %cst_38 = arith.constant dense<0.000000e+00> : vector<8xf32>
    %79 = vector.multi_reduction <add>, %78, %cst_38 [1] : vector<8x8xf32> to vector<8xf32>
    %80 = vector.shape_cast %79 : vector<8xf32> to vector<8x1xf32>
    %81 = tpu.reciprocal %80 {approx = true} : vector<8x1xf32> -> vector<8x1xf32>
    %82 = vector.broadcast %81 : vector<8x1xf32> to vector<8x8xf32>
    %83 = arith.mulf %78, %82 : vector<8x8xf32>
    %84 = arith.truncf %83 : vector<8x8xf32> to vector<8x8xbf16>
    %cst_39 = arith.constant dense<0.000000e+00> : vector<8x8xf32>
    %85 = tpu.matmul %84, %70, %cst_39 {dimension_numbers = #tpu.dot_dimension_numbers<[1], [0], [0], [1], [0, 0, 1, 1], [], []>} : vector<8x8xbf16>, vector<8x8xbf16>, vector<8x8xf32> -> vector<8x8xf32>
    %86 = arith.truncf %85 : vector<8x8xf32> to vector<8x8xbf16>
    %c0_40 = arith.constant 0 : index
    %c0_41 = arith.constant 0 : index
    %c16_42 = arith.constant 16 : index
    %87 = vector.load %arg2[%c0_40, %c0_41, %c16_42] : memref<1x8x32xbf16, #tpu.memory_space<vmem>>, vector<1x8x8xbf16>
    %88 = vector.shape_cast %87 : vector<1x8x8xbf16> to vector<8x8xbf16>
    %89 = vector.shape_cast %86 : vector<8x8xbf16> to vector<1x8x8xbf16>
    tpu.vector_store %arg2[%c0_40, %c0_41, %c16_42], %89 {strides = array<i32>} : memref<1x8x32xbf16, #tpu.memory_space<vmem>>, vector<1x8x8xbf16>,
    %c0_43 = arith.constant 0 : index
    %c0_44 = arith.constant 0 : index
    %c24 = arith.constant 24 : index
    %90 = vector.load %arg1[%c0_43, %c0_44, %c24] : memref<1x8x96xbf16, #tpu.memory_space<vmem>>, vector<1x8x8xbf16>
    %91 = vector.shape_cast %90 : vector<1x8x8xbf16> to vector<8x8xbf16>
    %92 = arith.extf %91 : vector<8x8xbf16> to vector<8x8xf32>
    %cst_45 = arith.constant 0.353553385 : f32
    %93 = vector.broadcast %cst_45 : f32 to vector<8x8xf32>
    %94 = arith.mulf %92, %93 : vector<8x8xf32>
    %c0_46 = arith.constant 0 : index
    %c0_47 = arith.constant 0 : index
    %c56 = arith.constant 56 : index
    %95 = vector.load %arg1[%c0_46, %c0_47, %c56] : memref<1x8x96xbf16, #tpu.memory_space<vmem>>, vector<1x8x8xbf16>
    %96 = vector.shape_cast %95 : vector<1x8x8xbf16> to vector<8x8xbf16>
    %c0_48 = arith.constant 0 : index
    %c0_49 = arith.constant 0 : index
    %c88 = arith.constant 88 : index
    %97 = vector.load %arg1[%c0_48, %c0_49, %c88] : memref<1x8x96xbf16, #tpu.memory_space<vmem>>, vector<1x8x8xbf16>
    %98 = vector.shape_cast %97 : vector<1x8x8xbf16> to vector<8x8xbf16>
    %99 = arith.truncf %94 : vector<8x8xf32> to vector<8x8xbf16>
    %cst_50 = arith.constant dense<0.000000e+00> : vector<8x8xf32>
    %100 = tpu.matmul %99, %96, %cst_50 {dimension_numbers = #tpu.dot_dimension_numbers<[1], [1], [0], [0], [0, 0, 1, 0], [], []>} : vector<8x8xbf16>, vector<8x8xbf16>, vector<8x8xf32> -> vector<8x8xf32>
    %101 = arith.addf %100, %5 : vector<8x8xf32>
    %cst_51 = arith.constant dense<0xFF800000> : vector<8xf32>
    %102 = vector.multi_reduction <maximumf>, %101, %cst_51 [1] : vector<8x8xf32> to vector<8xf32>
    %103 = vector.shape_cast %102 : vector<8xf32> to vector<8x1xf32>
    %104 = vector.broadcast %103 : vector<8x1xf32> to vector<8x8xf32>
    %105 = arith.subf %101, %104 : vector<8x8xf32>
    %106 = math.exp %105 : vector<8x8xf32>
    %cst_52 = arith.constant dense<0.000000e+00> : vector<8xf32>
    %107 = vector.multi_reduction <add>, %106, %cst_52 [1] : vector<8x8xf32> to vector<8xf32>
    %108 = vector.shape_cast %107 : vector<8xf32> to vector<8x1xf32>
    %109 = tpu.reciprocal %108 {approx = true} : vector<8x1xf32> -> vector<8x1xf32>
    %110 = vector.broadcast %109 : vector<8x1xf32> to vector<8x8xf32>
    %111 = arith.mulf %106, %110 : vector<8x8xf32>
    %112 = arith.truncf %111 : vector<8x8xf32> to vector<8x8xbf16>
    %cst_53 = arith.constant dense<0.000000e+00> : vector<8x8xf32>
    %113 = tpu.matmul %112, %98, %cst_53 {dimension_numbers = #tpu.dot_dimension_numbers<[1], [0], [0], [1], [0, 0, 1, 1], [], []>} : vector<8x8xbf16>, vector<8x8xbf16>, vector<8x8xf32> -> vector<8x8xf32>
    %114 = arith.truncf %113 : vector<8x8xf32> to vector<8x8xbf16>
    %c0_54 = arith.constant 0 : index
    %c0_55 = arith.constant 0 : index
    %c24_56 = arith.constant 24 : index
    %115 = vector.load %arg2[%c0_54, %c0_55, %c24_56] : memref<1x8x32xbf16, #tpu.memory_space<vmem>>, vector<1x8x8xbf16>
    %116 = vector.shape_cast %115 : vector<1x8x8xbf16> to vector<8x8xbf16>
    %117 = vector.shape_cast %114 : vector<8x8xbf16> to vector<1x8x8xbf16>
    tpu.vector_store %arg2[%c0_54, %c0_55, %c24_56], %117 {strides = array<i32>} : memref<1x8x32xbf16, #tpu.memory_space<vmem>>, vector<1x8x8xbf16>,
    return
  }
  func.func @transform_0(%arg0: i32) -> (i32, i32, i32) {
    %c0_i32 = arith.constant 0 : i32
    %c0_i32_0 = arith.constant 0 : i32
    %c0_i32_1 = arith.constant 0 : i32
    return %arg0, %c0_i32, %c0_i32_0 : i32, i32, i32
  }
  func.func @transform_1(%arg0: i32) -> (i32, i32, i32) {
    %c0_i32 = arith.constant 0 : i32
    %c0_i32_0 = arith.constant 0 : i32
    %c0_i32_1 = arith.constant 0 : i32
    return %arg0, %c0_i32, %c0_i32_0 : i32, i32, i32
  }
}

module attributes {stable_mosaic.version = 11 : i64} {
  func.func @_ln_matmul_kernel(%arg0: i32, %arg1: memref<8x32xbf16, #tpu.memory_space<vmem>>, %arg2: memref<1x32xf32, #tpu.memory_space<vmem>>, %arg3: memref<1x32xf32, #tpu.memory_space<vmem>>, %arg4: memref<32x96xbf16, #tpu.memory_space<vmem>>, %arg5: memref<1x96xf32, #tpu.memory_space<vmem>>, %arg6: memref<8x96xbf16, #tpu.memory_space<vmem>>) attributes {dimension_semantics = [#tpu.dimension_semantics<parallel>], iteration_bounds = array<i64: 2>, scalar_prefetch = 0 : i64, scratch_operands = 0 : i64, tpu.core_type = #tpu.core_type<tc>, window_params = [{transform_indices = @transform_0, window_bounds = array<i64: 8, 32>}, {pipeline_mode = #tpu.pipeline_mode<synchronous>, transform_indices = @transform_1, window_bounds = array<i64: 1, 32>}, {pipeline_mode = #tpu.pipeline_mode<synchronous>, transform_indices = @transform_2, window_bounds = array<i64: 1, 32>}, {pipeline_mode = #tpu.pipeline_mode<synchronous>, transform_indices = @transform_3, window_bounds = array<i64: 32, 96>}, {pipeline_mode = #tpu.pipeline_mode<synchronous>, transform_indices = @transform_4, window_bounds = array<i64: 1, 96>}, {transform_indices = @transform_5, window_bounds = array<i64: 8, 96>}]} {
    %c0 = arith.constant 0 : index
    %c0_0 = arith.constant 0 : index
    %0 = vector.load %arg1[%c0, %c0_0] : memref<8x32xbf16, #tpu.memory_space<vmem>>, vector<8x32xbf16>
    %1 = arith.extf %0 : vector<8x32xbf16> to vector<8x32xf32>
    %c0_1 = arith.constant 0 : index
    %c0_2 = arith.constant 0 : index
    %2 = vector.load %arg2[%c0_1, %c0_2] : memref<1x32xf32, #tpu.memory_space<vmem>>, vector<1x32xf32>
    %c0_3 = arith.constant 0 : index
    %c0_4 = arith.constant 0 : index
    %3 = vector.load %arg3[%c0_3, %c0_4] : memref<1x32xf32, #tpu.memory_space<vmem>>, vector<1x32xf32>
    %cst = arith.constant dense<0.000000e+00> : vector<8xf32>
    %4 = vector.multi_reduction <add>, %1, %cst [1] : vector<8x32xf32> to vector<8xf32>
    %5 = vector.shape_cast %4 : vector<8xf32> to vector<8x1xf32>
    %cst_5 = arith.constant 3.200000e+01 : f32
    %6 = vector.broadcast %cst_5 : f32 to vector<8x1xf32>
    %7 = arith.divf %5, %6 : vector<8x1xf32>
    %8 = vector.broadcast %7 : vector<8x1xf32> to vector<8x32xf32>
    %9 = arith.subf %1, %8 : vector<8x32xf32>
    %10 = arith.mulf %9, %9 : vector<8x32xf32>
    %cst_6 = arith.constant dense<0.000000e+00> : vector<8xf32>
    %11 = vector.multi_reduction <add>, %10, %cst_6 [1] : vector<8x32xf32> to vector<8xf32>
    %12 = vector.shape_cast %11 : vector<8xf32> to vector<8x1xf32>
    %cst_7 = arith.constant 3.200000e+01 : f32
    %13 = vector.broadcast %cst_7 : f32 to vector<8x1xf32>
    %14 = arith.divf %12, %13 : vector<8x1xf32>
    %cst_8 = arith.constant 9.99999974E-6 : f32
    %15 = vector.broadcast %cst_8 : f32 to vector<8x1xf32>
    %16 = arith.addf %14, %15 : vector<8x1xf32>
    %17 = math.rsqrt %16 : vector<8x1xf32>
    %18 = vector.broadcast %17 : vector<8x1xf32> to vector<8x32xf32>
    %19 = arith.mulf %9, %18 : vector<8x32xf32>
    %20 = vector.broadcast %2 : vector<1x32xf32> to vector<8x32xf32>
    %21 = arith.mulf %19, %20 : vector<8x32xf32>
    %22 = vector.broadcast %3 : vector<1x32xf32> to vector<8x32xf32>
    %23 = arith.addf %21, %22 : vector<8x32xf32>
    %24 = arith.truncf %23 : vector<8x32xf32> to vector<8x32xbf16>
    %c0_9 = arith.constant 0 : index
    %c0_10 = arith.constant 0 : index
    %25 = vector.load %arg4[%c0_9, %c0_10] : memref<32x96xbf16, #tpu.memory_space<vmem>>, vector<32x96xbf16>
    %cst_11 = arith.constant dense<0.000000e+00> : vector<8x96xf32>
    %26 = tpu.matmul %24, %25, %cst_11 {dimension_numbers = #tpu.dot_dimension_numbers<[1], [0], [0], [1], [0, 0, 1, 1], [], []>} : vector<8x32xbf16>, vector<32x96xbf16>, vector<8x96xf32> -> vector<8x96xf32>
    %c0_12 = arith.constant 0 : index
    %c0_13 = arith.constant 0 : index
    %27 = vector.load %arg5[%c0_12, %c0_13] : memref<1x96xf32, #tpu.memory_space<vmem>>, vector<1x96xf32>
    %28 = vector.broadcast %27 : vector<1x96xf32> to vector<8x96xf32>
    %29 = arith.addf %26, %28 : vector<8x96xf32>
    %30 = arith.truncf %29 : vector<8x96xf32> to vector<8x96xbf16>
    %c0_14 = arith.constant 0 : index
    %c0_15 = arith.constant 0 : index
    %31 = vector.load %arg6[%c0_14, %c0_15] : memref<8x96xbf16, #tpu.memory_space<vmem>>, vector<8x96xbf16>
    tpu.vector_store %arg6[%c0_14, %c0_15], %30 {strides = array<i32>} : memref<8x96xbf16, #tpu.memory_space<vmem>>, vector<8x96xbf16>,
    return
  }
  func.func @transform_0(%arg0: i32) -> (i32, i32) {
    %c0_i32 = arith.constant 0 : i32
    %c0_i32_0 = arith.constant 0 : i32
    return %arg0, %c0_i32 : i32, i32
  }
  func.func @transform_1(%arg0: i32) -> (i32, i32) {
    %c0_i32 = arith.constant 0 : i32
    %c0_i32_0 = arith.constant 0 : i32
    %c0_i32_1 = arith.constant 0 : i32
    return %c0_i32, %c0_i32_0 : i32, i32
  }
  func.func @transform_2(%arg0: i32) -> (i32, i32) {
    %c0_i32 = arith.constant 0 : i32
    %c0_i32_0 = arith.constant 0 : i32
    %c0_i32_1 = arith.constant 0 : i32
    return %c0_i32, %c0_i32_0 : i32, i32
  }
  func.func @transform_3(%arg0: i32) -> (i32, i32) {
    %c0_i32 = arith.constant 0 : i32
    %c0_i32_0 = arith.constant 0 : i32
    %c0_i32_1 = arith.constant 0 : i32
    return %c0_i32, %c0_i32_0 : i32, i32
  }
  func.func @transform_4(%arg0: i32) -> (i32, i32) {
    %c0_i32 = arith.constant 0 : i32
    %c0_i32_0 = arith.constant 0 : i32
    %c0_i32_1 = arith.constant 0 : i32
    return %c0_i32, %c0_i32_0 : i32, i32
  }
  func.func @transform_5(%arg0: i32) -> (i32, i32) {
    %c0_i32 = arith.constant 0 : i32
    %c0_i32_0 = arith.constant 0 : i32
    return %arg0, %c0_i32 : i32, i32
  }
}

module attributes {stable_mosaic.version = 11 : i64} {
  func.func @_mlp_block_kernel(%arg0: i32, %arg1: memref<8x32xbf16, #tpu.memory_space<vmem>>, %arg2: memref<1x32xf32, #tpu.memory_space<vmem>>, %arg3: memref<1x32xf32, #tpu.memory_space<vmem>>, %arg4: memref<32x128xbf16, #tpu.memory_space<vmem>>, %arg5: memref<1x128xf32, #tpu.memory_space<vmem>>, %arg6: memref<128x32xbf16, #tpu.memory_space<vmem>>, %arg7: memref<1x32xf32, #tpu.memory_space<vmem>>, %arg8: memref<8x32xbf16, #tpu.memory_space<vmem>>) attributes {dimension_semantics = [#tpu.dimension_semantics<parallel>], iteration_bounds = array<i64: 2>, scalar_prefetch = 0 : i64, scratch_operands = 0 : i64, tpu.core_type = #tpu.core_type<tc>, window_params = [{transform_indices = @transform_0, window_bounds = array<i64: 8, 32>}, {pipeline_mode = #tpu.pipeline_mode<synchronous>, transform_indices = @transform_1, window_bounds = array<i64: 1, 32>}, {pipeline_mode = #tpu.pipeline_mode<synchronous>, transform_indices = @transform_2, window_bounds = array<i64: 1, 32>}, {pipeline_mode = #tpu.pipeline_mode<synchronous>, transform_indices = @transform_3, window_bounds = array<i64: 32, 128>}, {pipeline_mode = #tpu.pipeline_mode<synchronous>, transform_indices = @transform_4, window_bounds = array<i64: 1, 128>}, {pipeline_mode = #tpu.pipeline_mode<synchronous>, transform_indices = @transform_5, window_bounds = array<i64: 128, 32>}, {pipeline_mode = #tpu.pipeline_mode<synchronous>, transform_indices = @transform_6, window_bounds = array<i64: 1, 32>}, {transform_indices = @transform_7, window_bounds = array<i64: 8, 32>}]} {
    %c0 = arith.constant 0 : index
    %c0_0 = arith.constant 0 : index
    %0 = vector.load %arg1[%c0, %c0_0] : memref<8x32xbf16, #tpu.memory_space<vmem>>, vector<8x32xbf16>
    %1 = arith.extf %0 : vector<8x32xbf16> to vector<8x32xf32>
    %c0_1 = arith.constant 0 : index
    %c0_2 = arith.constant 0 : index
    %2 = vector.load %arg2[%c0_1, %c0_2] : memref<1x32xf32, #tpu.memory_space<vmem>>, vector<1x32xf32>
    %c0_3 = arith.constant 0 : index
    %c0_4 = arith.constant 0 : index
    %3 = vector.load %arg3[%c0_3, %c0_4] : memref<1x32xf32, #tpu.memory_space<vmem>>, vector<1x32xf32>
    %cst = arith.constant dense<0.000000e+00> : vector<8xf32>
    %4 = vector.multi_reduction <add>, %1, %cst [1] : vector<8x32xf32> to vector<8xf32>
    %5 = vector.shape_cast %4 : vector<8xf32> to vector<8x1xf32>
    %cst_5 = arith.constant 3.200000e+01 : f32
    %6 = vector.broadcast %cst_5 : f32 to vector<8x1xf32>
    %7 = arith.divf %5, %6 : vector<8x1xf32>
    %8 = vector.broadcast %7 : vector<8x1xf32> to vector<8x32xf32>
    %9 = arith.subf %1, %8 : vector<8x32xf32>
    %10 = arith.mulf %9, %9 : vector<8x32xf32>
    %cst_6 = arith.constant dense<0.000000e+00> : vector<8xf32>
    %11 = vector.multi_reduction <add>, %10, %cst_6 [1] : vector<8x32xf32> to vector<8xf32>
    %12 = vector.shape_cast %11 : vector<8xf32> to vector<8x1xf32>
    %cst_7 = arith.constant 3.200000e+01 : f32
    %13 = vector.broadcast %cst_7 : f32 to vector<8x1xf32>
    %14 = arith.divf %12, %13 : vector<8x1xf32>
    %cst_8 = arith.constant 9.99999974E-6 : f32
    %15 = vector.broadcast %cst_8 : f32 to vector<8x1xf32>
    %16 = arith.addf %14, %15 : vector<8x1xf32>
    %17 = math.rsqrt %16 : vector<8x1xf32>
    %18 = vector.broadcast %17 : vector<8x1xf32> to vector<8x32xf32>
    %19 = arith.mulf %9, %18 : vector<8x32xf32>
    %20 = vector.broadcast %2 : vector<1x32xf32> to vector<8x32xf32>
    %21 = arith.mulf %19, %20 : vector<8x32xf32>
    %22 = vector.broadcast %3 : vector<1x32xf32> to vector<8x32xf32>
    %23 = arith.addf %21, %22 : vector<8x32xf32>
    %24 = arith.truncf %23 : vector<8x32xf32> to vector<8x32xbf16>
    %c0_9 = arith.constant 0 : index
    %c0_10 = arith.constant 0 : index
    %25 = vector.load %arg4[%c0_9, %c0_10] : memref<32x128xbf16, #tpu.memory_space<vmem>>, vector<32x128xbf16>
    %cst_11 = arith.constant dense<0.000000e+00> : vector<8x128xf32>
    %26 = tpu.matmul %24, %25, %cst_11 {dimension_numbers = #tpu.dot_dimension_numbers<[1], [0], [0], [1], [0, 0, 1, 1], [], []>} : vector<8x32xbf16>, vector<32x128xbf16>, vector<8x128xf32> -> vector<8x128xf32>
    %c0_12 = arith.constant 0 : index
    %c0_13 = arith.constant 0 : index
    %27 = vector.load %arg5[%c0_12, %c0_13] : memref<1x128xf32, #tpu.memory_space<vmem>>, vector<1x128xf32>
    %28 = vector.broadcast %27 : vector<1x128xf32> to vector<8x128xf32>
    %29 = arith.addf %26, %28 : vector<8x128xf32>
    %cst_14 = arith.constant 5.000000e-01 : f32
    %30 = vector.broadcast %cst_14 : f32 to vector<8x128xf32>
    %31 = arith.mulf %30, %29 : vector<8x128xf32>
    %cst_15 = arith.constant 4.471500e-02 : f32
    %32 = vector.broadcast %cst_15 : f32 to vector<8x128xf32>
    %33 = arith.mulf %32, %29 : vector<8x128xf32>
    %34 = arith.mulf %33, %29 : vector<8x128xf32>
    %35 = arith.mulf %34, %29 : vector<8x128xf32>
    %36 = arith.addf %29, %35 : vector<8x128xf32>
    %cst_16 = arith.constant 0.797884583 : f32
    %37 = vector.broadcast %cst_16 : f32 to vector<8x128xf32>
    %38 = arith.mulf %37, %36 : vector<8x128xf32>
    %39 = math.tanh %38 : vector<8x128xf32>
    %cst_17 = arith.constant 1.000000e+00 : f32
    %40 = vector.broadcast %cst_17 : f32 to vector<8x128xf32>
    %41 = arith.addf %40, %39 : vector<8x128xf32>
    %42 = arith.mulf %31, %41 : vector<8x128xf32>
    %43 = arith.truncf %42 : vector<8x128xf32> to vector<8x128xbf16>
    %c0_18 = arith.constant 0 : index
    %c0_19 = arith.constant 0 : index
    %44 = vector.load %arg6[%c0_18, %c0_19] : memref<128x32xbf16, #tpu.memory_space<vmem>>, vector<128x32xbf16>
    %cst_20 = arith.constant dense<0.000000e+00> : vector<8x32xf32>
    %45 = tpu.matmul %43, %44, %cst_20 {dimension_numbers = #tpu.dot_dimension_numbers<[1], [0], [0], [1], [0, 0, 1, 1], [], []>} : vector<8x128xbf16>, vector<128x32xbf16>, vector<8x32xf32> -> vector<8x32xf32>
    %c0_21 = arith.constant 0 : index
    %c0_22 = arith.constant 0 : index
    %46 = vector.load %arg7[%c0_21, %c0_22] : memref<1x32xf32, #tpu.memory_space<vmem>>, vector<1x32xf32>
    %47 = vector.broadcast %46 : vector<1x32xf32> to vector<8x32xf32>
    %48 = arith.addf %45, %47 : vector<8x32xf32>
    %49 = arith.addf %1, %48 : vector<8x32xf32>
    %50 = arith.truncf %49 : vector<8x32xf32> to vector<8x32xbf16>
    %c0_23 = arith.constant 0 : index
    %c0_24 = arith.constant 0 : index
    %51 = vector.load %arg8[%c0_23, %c0_24] : memref<8x32xbf16, #tpu.memory_space<vmem>>, vector<8x32xbf16>
    tpu.vector_store %arg8[%c0_23, %c0_24], %50 {strides = array<i32>} : memref<8x32xbf16, #tpu.memory_space<vmem>>, vector<8x32xbf16>,
    return
  }
  func.func @transform_0(%arg0: i32) -> (i32, i32) {
    %c0_i32 = arith.constant 0 : i32
    %c0_i32_0 = arith.constant 0 : i32
    return %arg0, %c0_i32 : i32, i32
  }
  func.func @transform_1(%arg0: i32) -> (i32, i32) {
    %c0_i32 = arith.constant 0 : i32
    %c0_i32_0 = arith.constant 0 : i32
    %c0_i32_1 = arith.constant 0 : i32
    return %c0_i32, %c0_i32_0 : i32, i32
  }
  func.func @transform_2(%arg0: i32) -> (i32, i32) {
    %c0_i32 = arith.constant 0 : i32
    %c0_i32_0 = arith.constant 0 : i32
    %c0_i32_1 = arith.constant 0 : i32
    return %c0_i32, %c0_i32_0 : i32, i32
  }
  func.func @transform_3(%arg0: i32) -> (i32, i32) {
    %c0_i32 = arith.constant 0 : i32
    %c0_i32_0 = arith.constant 0 : i32
    %c0_i32_1 = arith.constant 0 : i32
    return %c0_i32, %c0_i32_0 : i32, i32
  }
  func.func @transform_4(%arg0: i32) -> (i32, i32) {
    %c0_i32 = arith.constant 0 : i32
    %c0_i32_0 = arith.constant 0 : i32
    %c0_i32_1 = arith.constant 0 : i32
    return %c0_i32, %c0_i32_0 : i32, i32
  }
  func.func @transform_5(%arg0: i32) -> (i32, i32) {
    %c0_i32 = arith.constant 0 : i32
    %c0_i32_0 = arith.constant 0 : i32
    %c0_i32_1 = arith.constant 0 : i32
    return %c0_i32, %c0_i32_0 : i32, i32
  }
  func.func @transform_6(%arg0: i32) -> (i32, i32) {
    %c0_i32 = arith.constant 0 : i32
    %c0_i32_0 = arith.constant 0 : i32
    %c0_i32_1 = arith.constant 0 : i32
    return %c0_i32, %c0_i32_0 : i32, i32
  }
  func.func @transform_7(%arg0: i32) -> (i32, i32) {
    %c0_i32 = arith.constant 0 : i32
    %c0_i32_0 = arith.constant 0 : i32
    return %arg0, %c0_i32 : i32, i32
  }
}

module attributes {stable_mosaic.version = 11 : i64} {
  func.func @_pool_norm_kernel(%arg0: i32, %arg1: memref<1x8x32xbf16, #tpu.memory_space<vmem>>, %arg2: memref<1x32xf32, #tpu.memory_space<vmem>>, %arg3: memref<1x32xf32, #tpu.memory_space<vmem>>, %arg4: memref<1x1x32xf32, #tpu.memory_space<vmem>>) attributes {dimension_semantics = [#tpu.dimension_semantics<parallel>], iteration_bounds = array<i64: 2>, scalar_prefetch = 0 : i64, scratch_operands = 0 : i64, tpu.core_type = #tpu.core_type<tc>, window_params = [{transform_indices = @transform_0, window_bounds = array<i64: 1, 8, 32>}, {pipeline_mode = #tpu.pipeline_mode<synchronous>, transform_indices = @transform_1, window_bounds = array<i64: 1, 32>}, {pipeline_mode = #tpu.pipeline_mode<synchronous>, transform_indices = @transform_2, window_bounds = array<i64: 1, 32>}, {transform_indices = @transform_3, window_bounds = array<i64: 1, 1, 32>}]} {
    %c0 = arith.constant 0 : index
    %c0_0 = arith.constant 0 : index
    %c0_1 = arith.constant 0 : index
    %0 = vector.load %arg1[%c0, %c0_0, %c0_1] : memref<1x8x32xbf16, #tpu.memory_space<vmem>>, vector<1x8x32xbf16>
    %1 = vector.shape_cast %0 : vector<1x8x32xbf16> to vector<8x32xbf16>
    %2 = arith.extf %1 : vector<8x32xbf16> to vector<8x32xf32>
    %3 = tpu.iota {dimensions = array<i32: 0>} : vector<8x1xi32>
    %c1_i32 = arith.constant 1 : i32
    %4 = vector.broadcast %c1_i32 : i32 to vector<8x1xi32>
    %5 = arith.cmpi sge, %3, %4 : vector<8x1xi32>
    %c5_i32 = arith.constant 5 : i32
    %6 = vector.broadcast %c5_i32 : i32 to vector<8x1xi32>
    %7 = arith.cmpi slt, %3, %6 : vector<8x1xi32>
    %8 = arith.andi %5, %7 : vector<8x1xi1>
    %cst = arith.constant 0.000000e+00 : f32
    %9 = vector.shape_cast %8 : vector<8x1xi1> to vector<8x1xi1>
    %10 = vector.broadcast %9 : vector<8x1xi1> to vector<8x32xi1>
    %11 = vector.broadcast %cst : f32 to vector<8x32xf32>
    %12 = arith.select %10, %2, %11 : vector<8x32xi1>, vector<8x32xf32>
    %cst_2 = arith.constant dense<0.000000e+00> : vector<32xf32>
    %13 = vector.multi_reduction <add>, %12, %cst_2 [0] : vector<8x32xf32> to vector<32xf32>
    %14 = vector.shape_cast %13 : vector<32xf32> to vector<1x32xf32>
    %cst_3 = arith.constant 2.500000e-01 : f32
    %15 = vector.broadcast %cst_3 : f32 to vector<1x32xf32>
    %16 = arith.mulf %14, %15 : vector<1x32xf32>
    %c0_4 = arith.constant 0 : index
    %c0_5 = arith.constant 0 : index
    %17 = vector.load %arg2[%c0_4, %c0_5] : memref<1x32xf32, #tpu.memory_space<vmem>>, vector<1x32xf32>
    %c0_6 = arith.constant 0 : index
    %c0_7 = arith.constant 0 : index
    %18 = vector.load %arg3[%c0_6, %c0_7] : memref<1x32xf32, #tpu.memory_space<vmem>>, vector<1x32xf32>
    %cst_8 = arith.constant dense<0.000000e+00> : vector<1xf32>
    %19 = vector.multi_reduction <add>, %16, %cst_8 [1] : vector<1x32xf32> to vector<1xf32>
    %20 = vector.shape_cast %19 : vector<1xf32> to vector<1x1xf32>
    %cst_9 = arith.constant 3.200000e+01 : f32
    %21 = vector.broadcast %cst_9 : f32 to vector<1x1xf32>
    %22 = arith.divf %20, %21 : vector<1x1xf32>
    %23 = vector.broadcast %22 : vector<1x1xf32> to vector<1x32xf32>
    %24 = arith.subf %16, %23 : vector<1x32xf32>
    %25 = arith.mulf %24, %24 : vector<1x32xf32>
    %cst_10 = arith.constant dense<0.000000e+00> : vector<1xf32>
    %26 = vector.multi_reduction <add>, %25, %cst_10 [1] : vector<1x32xf32> to vector<1xf32>
    %27 = vector.shape_cast %26 : vector<1xf32> to vector<1x1xf32>
    %cst_11 = arith.constant 3.200000e+01 : f32
    %28 = vector.broadcast %cst_11 : f32 to vector<1x1xf32>
    %29 = arith.divf %27, %28 : vector<1x1xf32>
    %cst_12 = arith.constant 9.99999974E-6 : f32
    %30 = vector.broadcast %cst_12 : f32 to vector<1x1xf32>
    %31 = arith.addf %29, %30 : vector<1x1xf32>
    %32 = math.rsqrt %31 : vector<1x1xf32>
    %33 = vector.broadcast %32 : vector<1x1xf32> to vector<1x32xf32>
    %34 = arith.mulf %24, %33 : vector<1x32xf32>
    %35 = arith.mulf %34, %17 : vector<1x32xf32>
    %36 = arith.addf %35, %18 : vector<1x32xf32>
    %c0_13 = arith.constant 0 : index
    %c0_14 = arith.constant 0 : index
    %c0_15 = arith.constant 0 : index
    %37 = vector.load %arg4[%c0_13, %c0_14, %c0_15] : memref<1x1x32xf32, #tpu.memory_space<vmem>>, vector<1x1x32xf32>
    %38 = vector.shape_cast %37 : vector<1x1x32xf32> to vector<1x32xf32>
    %39 = vector.shape_cast %36 : vector<1x32xf32> to vector<1x1x32xf32>
    tpu.vector_store %arg4[%c0_13, %c0_14, %c0_15], %39 {strides = array<i32>} : memref<1x1x32xf32, #tpu.memory_space<vmem>>, vector<1x1x32xf32>,
    return
  }
  func.func @transform_0(%arg0: i32) -> (i32, i32, i32) {
    %c0_i32 = arith.constant 0 : i32
    %c0_i32_0 = arith.constant 0 : i32
    %c0_i32_1 = arith.constant 0 : i32
    return %arg0, %c0_i32, %c0_i32_0 : i32, i32, i32
  }
  func.func @transform_1(%arg0: i32) -> (i32, i32) {
    %c0_i32 = arith.constant 0 : i32
    %c0_i32_0 = arith.constant 0 : i32
    %c0_i32_1 = arith.constant 0 : i32
    return %c0_i32, %c0_i32_0 : i32, i32
  }
  func.func @transform_2(%arg0: i32) -> (i32, i32) {
    %c0_i32 = arith.constant 0 : i32
    %c0_i32_0 = arith.constant 0 : i32
    %c0_i32_1 = arith.constant 0 : i32
    return %c0_i32, %c0_i32_0 : i32, i32
  }
  func.func @transform_3(%arg0: i32) -> (i32, i32, i32) {
    %c0_i32 = arith.constant 0 : i32
    %c0_i32_0 = arith.constant 0 : i32
    %c0_i32_1 = arith.constant 0 : i32
    return %arg0, %c0_i32, %c0_i32_0 : i32, i32, i32
  }
}

</mosaic_0001>

<bundles_post_ra>
// kernel: _lambda_.17
= control target key start
LH: loop header
LB: loop body
LE: loop exit
PB: predicated region body
PF: predicated region fallthrough
CT: control target
= control target key end

     0   :  { %v181_v0 = vmov 0.0   ;;  %vm182_vm0 = vmmov 0   ;;  %s236_s1 = inlined_call_operand.vmem [shape: bf16[128,128], index: 1, kind: input, shape index: {}]   ;;  %s237_s0 = inlined_call_operand.vmem [shape: f32[4,128], index: 0, kind: input, shape index: {}]   ;;  %s238_s2 = inlined_call_operand.vmem [shape: f32[1,128], index: 2, kind: input, shape index: {}]   ;;  %s239_s3 = inlined_call_operand.vmem [shape: f32[4,128], index: 3, kind: output, shape index: {}]  }
   0x1   :  { %151 = vmatprep.subr.bf16.mxu0 %v181_v0  ;;  %v173_v1 = vld [vmem:[%s236_s1] sm:$0xff]   ;;  %167 = vmatprep.mubr.msk.bf16.mxu0 %vm182_vm0, %v181_v0  ;;  %v174_v2 = vld [vmem:[%s236_s1 + $0x8] sm:$0xff]   ;;  %v175_v3 = vld [vmem:[%s236_s1 + $0x10] sm:$0xff]  }
   0x2   :  { %152 = vmatpush3.bf16.msra.mxu0 %v173_v1  ;;  %v176_v4 = vld [vmem:[%s236_s1 + $0x18] sm:$0xff]   ;;  %v177_v5 = vld [vmem:[%s236_s1 + $0x20] sm:$0xff]   ;;  %v178_v6 = vld [vmem:[%s236_s1 + $0x28] sm:$0xff]  }
   0x3   :  { %153 = vmatprep.subr.bf16.mxu0 %v181_v0  ;;  %v179_v7 = vld [vmem:[%s236_s1 + $0x30] sm:$0xff]   ;;  %v180_v8 = vld [vmem:[%s236_s1 + $0x38] sm:$0xff]   ;;  %v15_v9 = vld [vmem:[%s237_s0] sm:$0xf] }
   0x4   :  { %v16_v10 = vpack.c.bf16 %v15_v9, %v15_v9  ;;  %v133_v11 = vld [vmem:[%s238_s2] ss:$0 sm:$0xff] }
   0x6   :  { %154 = vmatpush3.bf16.msra.mxu0 %v174_v2 }
   0x7   :  { %155 = vmatprep.subr.bf16.mxu0 %v181_v0 }
   0xa   :  { %156 = vmatpush3.bf16.msra.mxu0 %v175_v3 }
   0xb   :  { %157 = vmatprep.subr.bf16.mxu0 %v181_v0 }
   0xe   :  { %158 = vmatpush3.bf16.msra.mxu0 %v176_v4 }
   0xf   :  { %159 = vmatprep.subr.bf16.mxu0 %v181_v0 }
  0x12   :  { %160 = vmatpush3.bf16.msra.mxu0 %v177_v5 }
  0x13   :  { %161 = vmatprep.subr.bf16.mxu0 %v181_v0 }
  0x16   :  { %162 = vmatpush3.bf16.msra.mxu0 %v178_v6 }
  0x17   :  { %163 = vmatprep.subr.bf16.mxu0 %v181_v0 }
  0x1a   :  { %164 = vmatpush3.bf16.msra.mxu0 %v179_v7 }
  0x1b   :  { %165 = vmatprep.subr.bf16.mxu0 %v181_v0 }
  0x1e   :  { %166 = vmatpush3.bf16.msra.mxu0 %v180_v8 }
  0x21   :  { %168 = vmatmul.mubr.bf16.vlgmr.msra.gmra.mrb[0].mxu0 %v16_v10 }
  0xf4   :  { %v122_v12 = vpop.f32.mrb[0].mxu0 }
  0xf5   :  { %v123_v13 = vadd.f32 %v133_v11, %v122_v12  ;;  %v169_v14 = vpop.f32.mrb[1].mxu0 }
  0xf6   :  { %v125_v15 = vpop.f32.mrb[2].mxu0 }
  0xf7   :  { %128 = vst [vmem:[%s239_s3] sm:$0xf] %v123_v13  ;;  %v170_v16 = vpop.f32.mrb[3].mxu0 }

// kernel: _lambda_.19
= control target key start
LH: loop header
LB: loop body
LE: loop exit
PB: predicated region body
PF: predicated region fallthrough
CT: control target
= control target key end

     0   :  { %s931_s12 = smov 0   ;;  %s933_s13 = smov 0   ;;  %s1104_s0 = inlined_call_operand.vmem [shape: f32[4,128], index: 0, kind: input, shape index: {}]   ;;  %s1105_s1 = inlined_call_operand.vmem [shape: bf16[128,2048], index: 1, kind: input, shape index: {}]   ;;  %s1106_s2 = inlined_call_operand.vmem [shape: f32[1,2048], index: 2, kind: input, shape index: {}]   ;;  %s1107_s3 = inlined_call_operand.vmem [shape: f32[4,2048], index: 3, kind: output, shape index: {}]  }
   0x1   :  { %s935_s14 = smov 0   ;;  %s937_s15 = smov 0  }
   0x2   :  { %s939_s16 = smov 0  }
   0x3 LB: > { %s22_s17 = sadd.s32 1, %s904_s15  ;;  %p65_p1 = scmp.ne.s32.totalorder %s896_s13, %s892_s12  ;;  %s908_s16 = sphi %s939_s16, %s13_s16   ;;  %s904_s15 = sphi %s937_s15, %s1111_s15   ;;  %s900_s14 = sphi %s935_s14, %s1110_s14   ;;  %s896_s13 = sphi %s933_s13, %s1109_s13   ;;  %s892_s12 = sphi %s931_s12, %s1108_s12  }
   0x4   : > { %p23_p0 = scmp.ge.s32.totalorder %s22_s17, 4  ;;  %p66_p2 = scmp.eq.s32.totalorder %s908_s16, 0 }
   0x5   : > { %s58_s19 = sadd.s32 1, %s896_s13  ;;  %p737_p5 = scmp.ge.s32.totalorder %s908_s16, 4 }
   0x6   : > { %s1113_s17 = smov (%p23_p0, %s22_s17), 0  ;;  %p67_p3 = por %p66_p2, %p65_p1 }
   0x7   : > { %s55_s18 = ssub.s32 %s904_s15, %s1113_s17  ;;  %152 = sbr.rel (%p737_p5) target bundleno = 34 (0x22), region = 20 }
   0x8   : > { %p56_p4 = scmp.eq.s32.totalorder %s55_s18, 0 }
   0xa   : > { %s966_s20 = scalar_select %p56_p4, %s896_s13, %s58_s19  }
   0xe   : > { %155 = sbr.rel (!%p67_p3) target bundleno = 34 (0x22), region = 24  ;;  %s157_s21 = sand.u32 (%p67_p3), 1, %s896_s13  }
   0xf   : > { %s780_s22 = sshll.u32 (%p67_p3), %s904_s15, 4  ;;  %s738_s23 = sshll.u32 (%p67_p3), %s157_s21, 8 }
  0x10   : > { %s974_s26 = scalar_lea.vmem (%p67_p3), %s1105_s1, %s780_s22  ;;  %s979_s27 = scalar_lea.vmem (%p67_p3), [#allocation2], %s738_s23 }
  0x11   : > { %v175_v0 = vld [vmem:[%s974_s26] sm:$0xff] (%p67_p3)  ;;  %v177_v1 = vld [vmem:[%s974_s26 + $0x8] sm:$0xff] (%p67_p3) }
  0x12   : > { %v179_v2 = vld [vmem:[%s974_s26 + $0x40] sm:$0xff] (%p67_p3)  ;;  %176 = vst [vmem:[%s979_s27] sm:$0xff] (%p67_p3), %v175_v0  ;;  %178 = vst [vmem:[%s979_s27 + $0x8] sm:$0xff] (%p67_p3), %v177_v1  ;;  %v181_v3 = vld [vmem:[%s974_s26 + $0x48] sm:$0xff] (%p67_p3) }
  0x13   : > { %180 = vst [vmem:[%s979_s27 + $0x10] sm:$0xff] (%p67_p3), %v179_v2  ;;  %v183_v4 = vld [vmem:[%s974_s26 + $0x80] sm:$0xff] (%p67_p3)  ;;  %v185_v5 = vld [vmem:[%s974_s26 + $0x88] sm:$0xff] (%p67_p3)  ;;  %182 = vst [vmem:[%s979_s27 + $0x18] sm:$0xff] (%p67_p3), %v181_v3 }
  0x14   : > { %184 = vst [vmem:[%s979_s27 + $0x20] sm:$0xff] (%p67_p3), %v183_v4  ;;  %186 = vst [vmem:[%s979_s27 + $0x28] sm:$0xff] (%p67_p3), %v185_v5  ;;  %v187_v6 = vld [vmem:[%s974_s26 + $0xc0] sm:$0xff] (%p67_p3)  ;;  %v189_v7 = vld [vmem:[%s974_s26 + $0xc8] sm:$0xff] (%p67_p3) }
  0x15   : > { %v191_v8 = vld [vmem:[%s974_s26 + $0x100] sm:$0xff]  ;;  %188 = vst [vmem:[%s979_s27 + $0x30] sm:$0xff] %v187_v6  ;;  %190 = vst [vmem:[%s979_s27 + $0x38] sm:$0xff] %v189_v7  ;;  %v193_v9 = vld [vmem:[%s974_s26 + $0x108] sm:$0xff] }
  0x16   : > { %192 = vst [vmem:[%s979_s27 + $0x40] sm:$0xff] %v191_v8  ;;  %v195_v10 = vld [vmem:[%s974_s26 + $0x140] sm:$0xff]  ;;  %v197_v11 = vld [vmem:[%s974_s26 + $0x148] sm:$0xff]  ;;  %194 = vst [vmem:[%s979_s27 + $0x48] sm:$0xff] %v193_v9 }
  0x17   : > { %196 = vst [vmem:[%s979_s27 + $0x50] sm:$0xff] %v195_v10  ;;  %198 = vst [vmem:[%s979_s27 + $0x58] sm:$0xff] %v197_v11  ;;  %v199_v12 = vld [vmem:[%s974_s26 + $0x180] sm:$0xff]  ;;  %v201_v13 = vld [vmem:[%s974_s26 + $0x188] sm:$0xff] }
  0x18   : > { %v203_v14 = vld [vmem:[%s974_s26 + $0x1c0] sm:$0xff]  ;;  %200 = vst [vmem:[%s979_s27 + $0x60] sm:$0xff] %v199_v12  ;;  %202 = vst [vmem:[%s979_s27 + $0x68] sm:$0xff] %v201_v13  ;;  %v205_v15 = vld [vmem:[%s974_s26 + $0x1c8] sm:$0xff] }
  0x19   : > { %204 = vst [vmem:[%s979_s27 + $0x70] sm:$0xff] %v203_v14  ;;  %v207_v16 = vld [vmem:[%s974_s26 + $0x200] sm:$0xff]  ;;  %v209_v17 = vld [vmem:[%s974_s26 + $0x208] sm:$0xff]  ;;  %206 = vst [vmem:[%s979_s27 + $0x78] sm:$0xff] %v205_v15 }
  0x1a   : > { %208 = vst [vmem:[%s979_s27 + $0x80] sm:$0xff] %v207_v16  ;;  %210 = vst [vmem:[%s979_s27 + $0x88] sm:$0xff] %v209_v17  ;;  %v211_v18 = vld [vmem:[%s974_s26 + $0x240] sm:$0xff]  ;;  %v213_v19 = vld [vmem:[%s974_s26 + $0x248] sm:$0xff] }
  0x1b   : > { %v215_v20 = vld [vmem:[%s974_s26 + $0x280] sm:$0xff]  ;;  %212 = vst [vmem:[%s979_s27 + $0x90] sm:$0xff] %v211_v18  ;;  %214 = vst [vmem:[%s979_s27 + $0x98] sm:$0xff] %v213_v19  ;;  %v217_v21 = vld [vmem:[%s974_s26 + $0x288] sm:$0xff] }
  0x1c   : > { %216 = vst [vmem:[%s979_s27 + $0xa0] sm:$0xff] %v215_v20  ;;  %v219_v22 = vld [vmem:[%s974_s26 + $0x2c0] sm:$0xff]  ;;  %v221_v23 = vld [vmem:[%s974_s26 + $0x2c8] sm:$0xff]  ;;  %218 = vst [vmem:[%s979_s27 + $0xa8] sm:$0xff] %v217_v21 }
  0x1d   : > { %220 = vst [vmem:[%s979_s27 + $0xb0] sm:$0xff] %v219_v22  ;;  %222 = vst [vmem:[%s979_s27 + $0xb8] sm:$0xff] %v221_v23  ;;  %v223_v24 = vld [vmem:[%s974_s26 + $0x300] sm:$0xff]  ;;  %v225_v25 = vld [vmem:[%s974_s26 + $0x308] sm:$0xff] }
  0x1e   : > { %v227_v26 = vld [vmem:[%s974_s26 + $0x340] sm:$0xff]  ;;  %224 = vst [vmem:[%s979_s27 + $0xc0] sm:$0xff] %v223_v24  ;;  %226 = vst [vmem:[%s979_s27 + $0xc8] sm:$0xff] %v225_v25  ;;  %v229_v27 = vld [vmem:[%s974_s26 + $0x348] sm:$0xff] }
  0x1f   : > { %228 = vst [vmem:[%s979_s27 + $0xd0] sm:$0xff] %v227_v26  ;;  %v231_v28 = vld [vmem:[%s974_s26 + $0x380] sm:$0xff]  ;;  %v233_v29 = vld [vmem:[%s974_s26 + $0x388] sm:$0xff]  ;;  %230 = vst [vmem:[%s979_s27 + $0xd8] sm:$0xff] %v229_v27 }
  0x20   : > { %232 = vst [vmem:[%s979_s27 + $0xe0] sm:$0xff] %v231_v28  ;;  %234 = vst [vmem:[%s979_s27 + $0xe8] sm:$0xff] %v233_v29  ;;  %v235_v30 = vld [vmem:[%s974_s26 + $0x3c0] sm:$0xff]  ;;  %v237_v31 = vld [vmem:[%s974_s26 + $0x3c8] sm:$0xff] }
  0x21   : > { %236 = vst [vmem:[%s979_s27 + $0xf0] sm:$0xff] %v235_v30  ;;  %238 = vst [vmem:[%s979_s27 + $0xf8] sm:$0xff] %v237_v31 }
  0x22 PF: > { %p741_p6 = scmp.ge.s32.totalorder %s908_s16, 1  ;;  %p251_p7 = scmp.lt.s32.totalorder %s908_s16, 5 }
  0x24   : > { %p252_p8 = pnand %p741_p6, %p251_p7 }
  0x25   : > { %s258_s28 = sand.u32 (!%p252_p8), 1, %s892_s12   ;;  %v910_v32 = vmov (!%p252_p8), 0   ;;  %v314_v1 = vld [vmem:[%s1104_s0] sm:$0xf] (!%p252_p8)  ;;  %s743_s6 = sshll.u32 (!%p252_p8), %s900_s14, 2  ;;  %v350_v3 = vlaneseq (!%p252_p8) }
  0x26   : > { %255 = sbr.rel (%p252_p8) target bundleno = 291 (0x123), region = 51  ;;  %s742_s29 = sshll.u32 (!%p252_p8), %s258_s28, 8  ;;  %562 = vmatprep.mubr.bf16.mxu0 (!%p252_p8), %v910_v32  ;;  %603 = vmatprep.mubr.bf16.mxu1 (!%p252_p8), %v910_v32  ;;  %v315_v2 = vpack.c.bf16 (!%p252_p8), %v314_v1, %v314_v1 }
  0x27   : > { %s1045_s30 = scalar_lea.vmem (!%p252_p8), [#allocation2], %s742_s29  ;;  %p299_p9 = scmp.lt.s32.totalorder (!%p252_p8), %s743_s6, 15  ;;  %v351_v4 = vshrl.u32 (!%p252_p8), %v350_v3, 7 }
  0x28   : > { %v822_v33 = vld [vmem:[%s1045_s30 + $0x4] ss:$16 sps:$4 sm:$0xff] (!%p252_p8)   ;;  %v824_v34 = vld [vmem:[%s1045_s30 + $0xc] ss:$16 sps:$4 sm:$0xff] (!%p252_p8)   ;;  %v826_v35 = vld [vmem:[%s1045_s30] ss:$16 sps:$4 sm:$0xff] (!%p252_p8)  }
  0x29   : > { %530 = vmatprep.subr.bf16.mxu0 (!%p252_p8), %v822_v33  ;;  %v827_v36 = vld [vmem:[%s1045_s30 + $0x8] ss:$16 sps:$4 sm:$0xff] (!%p252_p8)   ;;  %571 = vmatprep.subr.bf16.mxu1 (!%p252_p8), %v824_v34  ;;  %v828_v37 = vld [vmem:[%s1045_s30 + $0x24] ss:$16 sps:$4 sm:$0xff] (!%p252_p8)   ;;  %v830_v38 = vld [vmem:[%s1045_s30 + $0x2c] ss:$16 sps:$4 sm:$0xff] (!%p252_p8)  }
  0x2a   : > { %531 = vmatpush1.bf16.msra.mxu0 (!%p252_p8), %v826_v35  ;;  %572 = vmatpush1.bf16.msra.mxu1 (!%p252_p8), %v827_v36  ;;  %v832_v39 = vld [vmem:[%s1045_s30 + $0x20] ss:$16 sps:$4 sm:$0xff] (!%p252_p8)   ;;  %v833_v40 = vld [vmem:[%s1045_s30 + $0x28] ss:$16 sps:$4 sm:$0xff] (!%p252_p8)   ;;  %v834_v41 = vld [vmem:[%s1045_s30 + $0x44] ss:$16 sps:$4 sm:$0xff] (!%p252_p8)  }
  0x2b   : > { %532 = vmatprep.subr.bf16.mxu0 (!%p252_p8), %v828_v37  ;;  %573 = vmatprep.subr.bf16.mxu1 (!%p252_p8), %v830_v38  ;;  %v836_v42 = vld [vmem:[%s1045_s30 + $0x4c] ss:$16 sps:$4 sm:$0xff] (!%p252_p8)   ;;  %v838_v43 = vld [vmem:[%s1045_s30 + $0x40] ss:$16 sps:$4 sm:$0xff] (!%p252_p8)   ;;  %v839_v44 = vld [vmem:[%s1045_s30 + $0x48] ss:$16 sps:$4 sm:$0xff] (!%p252_p8)  }
  0x2c   : > { %v840_v45 = vld [vmem:[%s1045_s30 + $0x64] ss:$16 sps:$4 sm:$0xff] (!%p252_p8)   ;;  %v842_v46 = vld [vmem:[%s1045_s30 + $0x6c] ss:$16 sps:$4 sm:$0xff] (!%p252_p8)   ;;  %v844_v47 = vld [vmem:[%s1045_s30 + $0x60] ss:$16 sps:$4 sm:$0xff] (!%p252_p8)  }
  0x2d   : > { %v845_v48 = vld [vmem:[%s1045_s30 + $0x68] ss:$16 sps:$4 sm:$0xff]   ;;  %v846_v49 = vld [vmem:[%s1045_s30 + $0x84] ss:$16 sps:$4 sm:$0xff]   ;;  %v848_v50 = vld [vmem:[%s1045_s30 + $0x8c] ss:$16 sps:$4 sm:$0xff]  }
  0x2e   : > { %533 = vmatpush1.bf16.msra.mxu0 %v832_v39  ;;  %574 = vmatpush1.bf16.msra.mxu1 %v833_v40  ;;  %v850_v51 = vld [vmem:[%s1045_s30 + $0x80] ss:$16 sps:$4 sm:$0xff]   ;;  %v851_v52 = vld [vmem:[%s1045_s30 + $0x88] ss:$16 sps:$4 sm:$0xff]   ;;  %v852_v53 = vld [vmem:[%s1045_s30 + $0xa4] ss:$16 sps:$4 sm:$0xff]  }
  0x2f   : > { %534 = vmatprep.subr.bf16.mxu0 %v834_v41  ;;  %575 = vmatprep.subr.bf16.mxu1 %v836_v42  ;;  %v854_v54 = vld [vmem:[%s1045_s30 + $0xac] ss:$16 sps:$4 sm:$0xff]   ;;  %v856_v55 = vld [vmem:[%s1045_s30 + $0xa0] ss:$16 sps:$4 sm:$0xff]   ;;  %v857_v56 = vld [vmem:[%s1045_s30 + $0xa8] ss:$16 sps:$4 sm:$0xff]  }
  0x30   : > { %v858_v57 = vld [vmem:[%s1045_s30 + $0xc4] ss:$16 sps:$4 sm:$0xff]   ;;  %v860_v58 = vld [vmem:[%s1045_s30 + $0xcc] ss:$16 sps:$4 sm:$0xff]   ;;  %v862_v59 = vld [vmem:[%s1045_s30 + $0xc0] ss:$16 sps:$4 sm:$0xff]  }
  0x31   : > { %v863_v60 = vld [vmem:[%s1045_s30 + $0xc8] ss:$16 sps:$4 sm:$0xff]   ;;  %v864_v61 = vld [vmem:[%s1045_s30 + $0xe4] ss:$16 sps:$4 sm:$0xff]   ;;  %v866_v62 = vld [vmem:[%s1045_s30 + $0xec] ss:$16 sps:$4 sm:$0xff]  }
  0x32   : > { %535 = vmatpush1.bf16.msra.mxu0 %v838_v43  ;;  %576 = vmatpush1.bf16.msra.mxu1 %v839_v44  ;;  %v868_v63 = vld [vmem:[%s1045_s30 + $0xe0] ss:$16 sps:$4 sm:$0xff]   ;;  %v869_v0 = vld [vmem:[%s1045_s30 + $0xe8] ss:$16 sps:$4 sm:$0xff]   ;;  %s1115_s6 = smov (!%p299_p9, %s743_s6), 15  ;;  %v352_v5 = vsub.s32 0, %v351_v4 }
  0x33   : > { %536 = vmatprep.subr.bf16.mxu0 %v840_v45  ;;  %577 = vmatprep.subr.bf16.mxu1 %v842_v46  ;;  %s301_s9 = scalar_lea.vmem %s1106_s2, %s1115_s6  ;;  %v360_v6 = vsub.s32 2, %v351_v4  ;;  %v356_v8 = vsub.s32 1, %v351_v4  ;;  %v364_v9 = vsub.s32 3, %v351_v4  ;;  %s745_s10 = sshll.u32 %s1115_s6, 2 }
  0x34   : > { %v348_v7 = vld [vmem:[%s301_s9] sm:$0xf]  ;;  %s311_s14 = scalar_lea.vmem %s1107_s3, %s745_s10 }
  0x35   : > { %v353_v10 = vrot.slane %v348_v7, %v352_v5  ;;  %v361_v11 = vrot.slane %v348_v7, %v360_v6  ;;  %v357_v12 = vrot.slane %v348_v7, %v356_v8  ;;  %v365_v13 = vrot.slane %v348_v7, %v364_v9 }
  0x36   : > { %537 = vmatpush1.bf16.msra.mxu0 %v844_v47  ;;  %578 = vmatpush1.bf16.msra.mxu1 %v845_v48 }
  0x37   : > { %538 = vmatprep.subr.bf16.mxu0 %v846_v49  ;;  %579 = vmatprep.subr.bf16.mxu1 %v848_v50 }
  0x3a   : > { %539 = vmatpush1.bf16.msra.mxu0 %v850_v51  ;;  %580 = vmatpush1.bf16.msra.mxu1 %v851_v52 }
  0x3b   : > { %540 = vmatprep.subr.bf16.mxu0 %v852_v53  ;;  %581 = vmatprep.subr.bf16.mxu1 %v854_v54 }
  0x3e   : > { %541 = vmatpush1.bf16.msra.mxu0 %v856_v55  ;;  %582 = vmatpush1.bf16.msra.mxu1 %v857_v56 }
  0x3f   : > { %542 = vmatprep.subr.bf16.mxu0 %v858_v57  ;;  %583 = vmatprep.subr.bf16.mxu1 %v860_v58 }
  0x42   : > { %543 = vmatpush1.bf16.msra.mxu0 %v862_v59  ;;  %584 = vmatpush1.bf16.msra.mxu1 %v863_v60 }
  0x43   : > { %544 = vmatprep.subr.bf16.mxu0 %v864_v61  ;;  %585 = vmatprep.subr.bf16.mxu1 %v866_v62 }
  0x46   : > { %545 = vmatpush1.bf16.msra.mxu0 %v868_v63  ;;  %586 = vmatpush1.bf16.msra.mxu1 %v869_v0 }
  0x49   : > { %563 = vmatmul.mubr.bf16.vlgmr.msra.gmra.mrb[0].mxu0 %v315_v2  ;;  %604 = vmatmul.mubr.bf16.vlgmr.msra.gmra.mrb[0].mxu1 %v315_v2 }
 0x11c   : > { %v564_v14 = vpop.f32.mrb[0].mxu0  ;;  %v605_v15 = vpop.f32.mrb[0].mxu1 }
 0x11d   : > { %v565_v16 = vadd.f32 %v564_v14, %v353_v10  ;;  %v606_v17 = vadd.f32 %v605_v15, %v361_v11  ;;  %v566_v18 = vpop.f32.mrb[1].mxu0  ;;  %v607_v19 = vpop.f32.mrb[1].mxu1 }
 0x11e   : > { %v567_v20 = vadd.f32 %v566_v18, %v357_v12  ;;  %v608_v21 = vadd.f32 %v607_v19, %v365_v13  ;;  %v568_v22 = vpop.f32.mrb[2].mxu0  ;;  %v609_v23 = vpop.f32.mrb[2].mxu1 }
 0x11f   : > { %v569_v24 = vpop.f32.mrb[3].mxu0  ;;  %v610_v25 = vpop.f32.mrb[3].mxu1 }
 0x120   : > { %v616_v26 = vcombine.low %v565_v16, %v567_v20  ;;  %v617_v27 = vcombine.low %v606_v17, %v608_v21 }
 0x122   : > { %620 = vst [vmem:[%s311_s14] sm:$0xff] %v616_v26  ;;  %621 = vst [vmem:[%s311_s14 + $0x8] sm:$0xff] %v617_v27 }
 0x123 PF: > { %s13_s16 = sadd.s32 1, %s908_s16   ;;  %s1108_s12 = smov %s896_s13 }
 0x124   : > { %p10_p10 = scmp.ge.s32.totalorder %s13_s16, 6   ;;  %s1109_s13 = smov %s966_s20 }
 0x125   : > { %s1110_s14 = smov %s904_s15  ;;  %s1111_s15 = smov %s1113_s17 }
 0x126   :  { %12 = sbr.rel (!%p10_p10) target bundleno = 3 (0x3), region = 96 }

// kernel: _lambda_.20
= control target key start
LH: loop header
LB: loop body
LE: loop exit
PB: predicated region body
PF: predicated region fallthrough
CT: control target
= control target key end

     0   :  { %v175_v0 = vmov 0.0   ;;  %vm176_vm0 = vmmov 0   ;;  %vm122_vm1 = vcmask 253952   ;;  %s230_s1 = inlined_call_operand.vmem [shape: bf16[128,32], index: 1, kind: input, shape index: {}]   ;;  %s231_s0 = inlined_call_operand.vmem [shape: f32[1,128], index: 0, kind: input, shape index: {}]   ;;  %s232_s2 = inlined_call_operand.vmem [shape: f32[1,32], index: 2, kind: input, shape index: {}]   ;;  %s233_s3 = inlined_call_operand.vmem [shape: f32[1,32], index: 3, kind: output, shape index: {}]  }
   0x1   :  { %145 = vmatprep.subr.bf16.mxu0 %v175_v0  ;;  %v167_v1 = vld [vmem:[%s230_s1] sm:$0xff]   ;;  %161 = vmatprep.mubr.msk.bf16.mxu0 %vm176_vm0, %v175_v0  ;;  %v168_v2 = vld [vmem:[%s230_s1 + $0x8] sm:$0xff]   ;;  %v169_v3 = vld [vmem:[%s230_s1 + $0x10] sm:$0xff]  }
   0x2   :  { %146 = vmatpush3.bf16.msra.mxu0 %v167_v1  ;;  %v170_v4 = vld [vmem:[%s230_s1 + $0x18] sm:$0xff]   ;;  %v171_v5 = vld [vmem:[%s230_s1 + $0x20] sm:$0xff]   ;;  %v172_v6 = vld [vmem:[%s230_s1 + $0x28] sm:$0xff]  }
   0x3   :  { %147 = vmatprep.subr.bf16.mxu0 %v175_v0  ;;  %v173_v7 = vld [vmem:[%s230_s1 + $0x30] sm:$0xff]   ;;  %v174_v8 = vld [vmem:[%s230_s1 + $0x38] sm:$0xff]   ;;  %v15_v9 = vld [vmem:[%s231_s0] sm:$0x1] }
   0x4   :  { %v16_v10 = vpack.c.bf16 %v15_v9, %v15_v9  ;;  %v33_v11 = vld [vmem:[%s232_s2] sm:$0x1] }
   0x6   :  { %148 = vmatpush3.bf16.msra.mxu0 %v168_v2 }
   0x7   :  { %149 = vmatprep.subr.bf16.mxu0 %v175_v0 }
   0xa   :  { %150 = vmatpush3.bf16.msra.mxu0 %v169_v3 }
   0xb   :  { %151 = vmatprep.subr.bf16.mxu0 %v175_v0 }
   0xe   :  { %152 = vmatpush3.bf16.msra.mxu0 %v170_v4 }
   0xf   :  { %153 = vmatprep.subr.bf16.mxu0 %v175_v0 }
  0x12   :  { %154 = vmatpush3.bf16.msra.mxu0 %v171_v5 }
  0x13   :  { %155 = vmatprep.subr.bf16.mxu0 %v175_v0 }
  0x16   :  { %156 = vmatpush3.bf16.msra.mxu0 %v172_v6 }
  0x17   :  { %157 = vmatprep.subr.bf16.mxu0 %v175_v0 }
  0x1a   :  { %158 = vmatpush3.bf16.msra.mxu0 %v173_v7 }
  0x1b   :  { %159 = vmatprep.subr.bf16.mxu0 %v175_v0 }
  0x1e   :  { %160 = vmatpush3.bf16.msra.mxu0 %v174_v8 }
  0x21   :  { %162 = vmatmul.mubr.bf16.vlgmr.msra.gmra.mrb[0].mxu0 %v16_v10 }
  0xf4   :  { %v116_v12 = vpop.f32.mrb[0].mxu0 }
  0xf5   :  { %v117_v13 = vadd.f32 %v116_v12, %v33_v11  ;;  %v163_v14 = vpop.f32.mrb[1].mxu0 }
  0xf6   :  { %v119_v15 = vpop.f32.mrb[2].mxu0 }
  0xf7   :  { %123 = vst.msk [vmem:[%s233_s3] sm:$0x1] %vm122_vm1, %v117_v13  ;;  %v164_v16 = vpop.f32.mrb[3].mxu0 }

// kernel: _lambda_.21
= control target key start
LH: loop header
LB: loop body
LE: loop exit
PB: predicated region body
PF: predicated region fallthrough
CT: control target
= control target key end

     0   :  { %vm194_vm0 = vcmask 261120   ;;  %s335_s1 = inlined_call_operand.vmem [shape: bf16[256,32], index: 1, kind: input, shape index: {}]   ;;  %s336_s0 = inlined_call_operand.vmem [shape: f32[8,256], index: 0, kind: input, shape index: {}]   ;;  %s337_s2 = inlined_call_operand.vmem [shape: f32[1,32], index: 2, kind: input, shape index: {}]   ;;  %s338_s3 = inlined_call_operand.vmem [shape: f32[8,32], index: 3, kind: output, shape index: {}]  }
   0x1   :  { %v239_v0 = vld [vmem:[%s335_s1 + $0x40] sm:$0xff]   ;;  %v241_v2 = vld [vmem:[%s335_s1 + $0x48] sm:$0xff]   ;;  %v243_v4 = vld [vmem:[%s335_s1 + $0x50] sm:$0xff]  }
   0x2   :  { %v240_v1 = vld [vmem:[%s335_s1] sm:$0xff]   ;;  %217 = vmatprep.subr.bf16.mxu0 %v239_v0  ;;  %v242_v3 = vld [vmem:[%s335_s1 + $0x8] sm:$0xff]   ;;  %v244_v5 = vld [vmem:[%s335_s1 + $0x10] sm:$0xff]  }
   0x3   :  { %218 = vmatpush3.bf16.msra.mxu0 %v240_v1  ;;  %v245_v6 = vld [vmem:[%s335_s1 + $0x58] sm:$0xff]   ;;  %v247_v8 = vld [vmem:[%s335_s1 + $0x60] sm:$0xff]   ;;  %v249_v10 = vld [vmem:[%s335_s1 + $0x68] sm:$0xff]  }
   0x4   :  { %219 = vmatprep.subr.bf16.mxu0 %v241_v2  ;;  %v246_v7 = vld [vmem:[%s335_s1 + $0x18] sm:$0xff]   ;;  %v248_v9 = vld [vmem:[%s335_s1 + $0x20] sm:$0xff]   ;;  %v16_v11 = vld [vmem:[%s336_s0 + $0x8] sm:$0xff] }
   0x5   :  { %v18_v12 = vpack.c.bf16 %v16_v11, %v16_v11  ;;  %v250_v13 = vld [vmem:[%s335_s1 + $0x28] sm:$0xff]   ;;  %v251_v14 = vld [vmem:[%s335_s1 + $0x70] sm:$0xff]   ;;  %v253_v16 = vld [vmem:[%s335_s1 + $0x78] sm:$0xff]  }
   0x6   :  { %v252_v15 = vld [vmem:[%s335_s1 + $0x30] sm:$0xff]   ;;  %v254_v17 = vld [vmem:[%s335_s1 + $0x38] sm:$0xff]   ;;  %v15_v18 = vld [vmem:[%s336_s0] sm:$0xff] }
   0x7   :  { %220 = vmatpush3.bf16.msra.mxu0 %v242_v3  ;;  %186 = vmatprep.mubr.bf16.mxu0 %v18_v12  ;;  %v17_v19 = vpack.c.bf16 %v15_v18, %v15_v18  ;;  %v200_v21 = vld [vmem:[%s337_s2] ss:$0 sm:$0xff] }
   0x8   :  { %221 = vmatprep.subr.bf16.mxu0 %v243_v4 }
   0xb   :  { %222 = vmatpush3.bf16.msra.mxu0 %v244_v5 }
   0xc   :  { %223 = vmatprep.subr.bf16.mxu0 %v245_v6 }
   0xf   :  { %224 = vmatpush3.bf16.msra.mxu0 %v246_v7 }
  0x10   :  { %225 = vmatprep.subr.bf16.mxu0 %v247_v8 }
  0x13   :  { %226 = vmatpush3.bf16.msra.mxu0 %v248_v9 }
  0x14   :  { %227 = vmatprep.subr.bf16.mxu0 %v249_v10 }
  0x17   :  { %228 = vmatpush3.bf16.msra.mxu0 %v250_v13 }
  0x18   :  { %229 = vmatprep.subr.bf16.mxu0 %v251_v14 }
  0x1b   :  { %230 = vmatpush3.bf16.msra.mxu0 %v252_v15 }
  0x1c   :  { %231 = vmatprep.subr.bf16.mxu0 %v253_v16 }
  0x1f   :  { %232 = vmatpush3.bf16.msra.mxu0 %v254_v17 }
  0x22   :  { %187 = vmatmul.mubr.bf16.vlgmr.msra.gmra.mrb[0].mxu0 %v17_v19 }
  0xf5   :  { %v233_v20 = vpop.f32.mrb[0].mxu0 }
  0xf6   :  { %v234_v22 = vpop.f32.mrb[1].mxu0 }
  0xf7   :  { %v235_v23 = vadd.f32 %v234_v22, %v233_v20  ;;  %v236_v24 = vpop.f32.mrb[2].mxu0 }
  0xf8   :  { %v237_v25 = vpop.f32.mrb[3].mxu0 }
  0xf9   :  { %v189_v26 = vadd.f32 %v235_v23, %v200_v21 }
  0xfb   :  { %195 = vst.msk [vmem:[%s338_s3] sm:$0xff] %vm194_vm0, %v189_v26 }

// kernel: _lambda_.24
= control target key start
LH: loop header
LB: loop body
LE: loop exit
PB: predicated region body
PF: predicated region fallthrough
CT: control target
= control target key end

     0   :  { %v109_v0 = vmov 0.0   ;;  %vm110_vm0 = vmmov 0   ;;  %vm40_vm1 = vcmask 261120   ;;  %vm84_vm2 = vcmask 254976   ;;  %s146_s1 = inlined_call_operand.vmem [shape: bf16[32,32], index: 1, kind: input, shape index: {}]   ;;  %s147_s0 = inlined_call_operand.vmem [shape: f32[2,32], index: 0, kind: input, shape index: {}]   ;;  %s148_s2 = inlined_call_operand.vmem [shape: f32[1,32], index: 2, kind: input, shape index: {}]   ;;  %s149_s3 = inlined_call_operand.vmem [shape: f32[2,32], index: 3, kind: output, shape index: {}]  }
   0x1   :  { %97 = vmatprep.subr.bf16.mxu0 %v109_v0  ;;  %v107_v1 = vld [vmem:[%s146_s1] sm:$0xff]   ;;  %101 = vmatprep.mubr.msk.bf16.mxu0 %vm110_vm0, %v109_v0  ;;  %v108_v2 = vld [vmem:[%s146_s1 + $0x8] sm:$0xff]  }
   0x2   :  { %98 = vmatpush3.bf16.msra.mxu0 %v107_v1  ;;  %v15_v3 = vld [vmem:[%s147_s0] sm:$0x3] }
   0x3   :  { %99 = vmatprep.subr.bf16.mxu0 %v109_v0  ;;  %v16_v4 = vpack.c.bf16 %v15_v3, %v15_v3  ;;  %v90_v5 = vld [vmem:[%s148_s2] ss:$0 sm:$0xff] }
   0x6   :  { %100 = vmatpush3.bf16.msra.mxu0 %v108_v2 }
   0x9   :  { %102 = vmatmul.mubr.msk.bf16.vlgmr.msra.gmra.mrb[0].mxu0 %vm40_vm1, %v16_v4 }
  0xdc   :  { %v78_v6 = vpop.f32.mrb[0].mxu0 }
  0xdd   :  { %v79_v7 = vadd.f32 %v90_v5, %v78_v6  ;;  %v103_v8 = vpop.f32.mrb[1].mxu0 }
  0xde   :  { %v81_v9 = vpop.f32.mrb[2].mxu0 }
  0xdf   :  { %85 = vst.msk [vmem:[%s149_s3] sm:$0x3] %vm84_vm2, %v79_v7  ;;  %v104_v10 = vpop.f32.mrb[3].mxu0 }

// kernel: _lambda_.27
= control target key start
LH: loop header
LB: loop body
LE: loop exit
PB: predicated region body
PF: predicated region fallthrough
CT: control target
= control target key end

     0   :  { %s1109_s0 = inlined_call_operand.hbm [shape: bf16[16,32], index: 0, kind: input, shape index: {}]   ;;  %s1110_s1 = inlined_call_operand.hbm [shape: bf16[32,32], index: 1, kind: input, shape index: {}]   ;;  %s1111_s2 = inlined_call_operand.vmem [shape: f32[1,32], index: 2, kind: input, shape index: {}]   ;;  %s1112_s3 = inlined_call_operand.hbm [shape: bf16[16,32], index: 3, kind: input, shape index: {}]   ;;  %s1113_s4 = inlined_call_operand.hbm [shape: bf16[16,32], index: 4, kind: output, shape index: {}]  }
   0x1   :  { %1119 = sst [smem:[#allocation13_spill]] %s1109_s0 }
   0x2   :  { %1120 = sst [smem:[#allocation14_spill]] %s1112_s3 }
   0x3   :  { %9 = vsyncpa [#allocation3], 0 }
   0x4   :  { %11 = vsyncpa [#allocation3 + $0x1], 0 }
   0x5   :  { %12 = vsyncpa [#allocation6], 0 }
   0x6   :  { %13 = vsyncpa [#allocation4], 0 }
   0x7   :  { %15 = vsyncpa [#allocation4 + $0x1], 0  ;;  %s845_s15 = smov 0   ;;  %s847_s16 = smov 0  }
   0x8   :  { %s849_s17 = smov 0   ;;  %s851_s18 = smov 0  }
   0x9   :  { %s853_s19 = smov 0   ;;  %s855_s20 = smov 0  }
   0xa LB: > { %s33_s21 = sadd.s32 1, %s806_s19  ;;  %s40_s22 = sadd.s32 1, %s798_s17  ;;  %s810_s20 = sphi %s855_s20, %s21_s20   ;;  %s806_s19 = sphi %s853_s19, %s1141_s19   ;;  %s802_s18 = sphi %s851_s18, %s1140_s18   ;;  %s798_s17 = sphi %s849_s17, %s1139_s17   ;;  %s794_s16 = sphi %s847_s16, %s1138_s16   ;;  %s790_s15 = sphi %s845_s15, %s1137_s15  }
   0xb   : > { %p35_p0 = scmp.ge.s32.totalorder %s33_s21, 2  ;;  %p47_p1 = scmp.ne.s32.totalorder %s798_s17, %s794_s16 }
   0xc   : > { %p48_p2 = scmp.eq.s32.totalorder %s810_s20, 0  ;;  %p574_p5 = scmp.lt.s32.totalorder %s810_s20, 2 }
   0xd   : > { %s1143_s21 = smov (%p35_p0, %s33_s21), 0  ;;  %s206_s24 = sand.u32 1, %s810_s20  }
   0xe   : > { %p49_p4 = por %p48_p2, %p47_p1  ;;  %s37_s23 = ssub.s32 %s806_s19, %s1143_s21 }
   0xf   : > { %p38_p6 = scmp.eq.s32.totalorder %s37_s23, 0  ;;  %s208_s25 = sand.u32 1, %s798_s17  }
  0x10   : > { %s521_s26 = sshll.u32 %s806_s19, 6  ;;  %s895_s28 = sshll.u32 %s208_s25, 2 }
  0x11   : > { %s893_s27 = scalar_select %p38_p6, %s798_s17, %s40_s22  }
  0x12   : > { %s1121_s0 = sld [smem:[#allocation13_spill]]  ;;  %p904_p7 = pnand %p574_p5, %p49_p4 }
  0x13   : > { %s210_s7 = scalar_lea.vmem [#allocation2], %s895_s28  ;;  %s911_s9 = scalar_lea.sflag [#allocation3], %s206_s24 }
  0x14   : > { %s217_s8 = sshll.u32 %s210_s7, 4  ;;  %p634_p9 = pneg %p904_p7  ;;  %s909_s8 = int_to_ptr.vmem [resolvable:$true] %s217_s8 }
  0x18   : > { %s902_s5 = scalar_lea.hbm %s1121_s0, %s521_s26  ;;  %s637_s13 = scalar_lea.hbm %s1121_s0, 128 }
  0x19   : > { %s632_s10 = scalar_lea.hbm %s902_s5, 64  ;;  %p638_p12 = scmp.lt.u32.totalorder %s902_s5, %s1121_s0 }
  0x1a   : > { %p633_p8 = scmp.ne.s32.totalorder %s902_s5, %s632_s10  ;;  %p639_p13 = scmp.lt.u32.totalorder %s637_s13, %s632_s10 }
  0x1b   : > { %p641_p2 = scmp.lt.u32.totalorder %s632_s10, %s902_s5 }
  0x1c   : > { %p635_p10 = pnand %p634_p9, %p633_p8  ;;  %p640_p0 = por %p639_p13, %p638_p12 }
  0x1e   : > { %p636_p11 = pneg %p635_p10  ;;  %p642_p4 = por %p641_p2, %p640_p0 }
  0x20   : > { %p643_p5 = pnand %p642_p4, %p636_p11 }
  0x22   : > { %646 = shalt.err (!%p643_p5)
}
  0x23   : > { %s647_s23 = scalar_lea.vmem %s909_s8, 64  ;;  %s812_s24 = smov [#allocation2]  }
  0x24   : > { %p648_p6 = scmp.ne.s32.totalorder %s909_s8, %s647_s23  ;;  %s652_s25 = sshll.u32 %s812_s24, 4  ;;  %s653_s25 = int_to_ptr.vmem [resolvable:$false] %s652_s25 }
  0x25   : > { %s654_s29 = scalar_lea.vmem %s653_s25, 128  ;;  %p655_p3 = scmp.lt.s32.totalorder %s909_s8, %s653_s25 }
  0x26   : > { %p650_p8 = pnand %p648_p6, %p634_p9  ;;  %p656_p12 = scmp.lt.s32.totalorder %s654_s29, %s647_s23 }
  0x28   : > { %p651_p10 = pneg %p650_p8  ;;  %p657_p13 = por %p656_p12, %p655_p3 }
  0x2a   : > { %p658_p0 = pnand %p657_p13, %p651_p10 }
  0x2c   : > { %661 = shalt.err (!%p658_p0)
}
  0x2d   : > { %565 = dma.hbm_to_vmem [thread:$0]  (!%p904_p7), %s902_s5, 64, %s909_s8, %s911_s9  }
  0x2e   : > { %s940_s30 = sadd.s32 4294967295, %s810_s20   ;;  %s515_s7 = sadd.s32 4294967294, %s810_s20  }
  0x2f   : > { %p53_p3 = scmp.ne.s32.totalorder %s794_s16, %s790_s15  ;;  %p1114_p11 = scmp.eq.s32.totalorder %s940_s30, 0 }
  0x30   : > { %p159_p2 = scmp.eq.s32.totalorder %s940_s30, 1  ;;  %p165_p4 = scmp.eq.s32.totalorder %s515_s7, 1 }
  0x31   : > { %p516_p5 = scmp.ge.s32.totalorder %s810_s20, 1  ;;  %p950_p6 = por %p1114_p11, %p53_p3 }
  0x32   : > { %p957_p8 = por %p159_p2, %p47_p1  ;;  %p961_p10 = por %p165_p4, %p53_p3 }
  0x33   : > { %s1123_s10 = scalar_select %p950_p6, 1, 0 }
  0x34   : > { %s1124_s5 = scalar_select %p957_p8, 1, 0 }
  0x35   : > { %s1125_s8 = scalar_select %p961_p10, 1, 0 }
  0x36   : > { %p172_p12 = scmp.lt.s32.totalorder %s810_s20, 3  ;;  %s813_s12 = smov [#allocation5]  }
  0x37   : > { %s186_s13 = sshll.u32 %s813_s12, 4  ;;  %s1127_s3 = sld [smem:[#allocation14_spill]]  ;;  %s977_s13 = int_to_ptr.vmem [resolvable:$true] %s186_s13 }
  0x38   : > { %p966_p13 = pnand %p516_p5, %p172_p12  ;;  %s228_s24 = scalar_lea.vmem [#allocation7], %s895_s28 }
  0x39   : > { %s236_s25 = sshll.u32 %s228_s24, 4  ;;  %s237_s25 = int_to_ptr.vmem [resolvable:$true] %s236_s25 }
  0x3a   : > { %s1126_s11 = scalar_select %p966_p13, 1, 0 }
  0x3b   : > { %p558_p1 = pneg %p966_p13 }
  0x3d   : > { %s975_s23 = scalar_lea.hbm %s1127_s3, %s521_s26  ;;  %p984_p0 = pnand %p558_p1, %p1114_p11 }
  0x3e   : > { %s662_s7 = scalar_lea.hbm %s975_s23, 64  ;;  %s667_s14 = scalar_lea.hbm %s1127_s3, 128 }
  0x3f   : > { %s1128_s29 = scalar_select %p984_p0, 1, 0 }
  0x40   : > { %p663_p3 = scmp.ne.s32.totalorder %s975_s23, %s662_s7  ;;  %p668_p5 = scmp.lt.u32.totalorder %s975_s23, %s1127_s3 }
  0x41   : > { %p669_p12 = scmp.lt.u32.totalorder %s667_s14, %s662_s7  ;;  %p671_p11 = scmp.lt.u32.totalorder %s662_s7, %s975_s23 }
  0x42   : > { %p665_p2 = pnand %p663_p3, %p634_p9 }
  0x43   : > { %p670_p1 = por %p669_p12, %p668_p5 }
  0x44   : > { %p666_p4 = pneg %p665_p2 }
  0x45   : > { %p672_p10 = por %p671_p11, %p670_p1 }
  0x47   : > { %p673_p8 = pnand %p672_p10, %p666_p4 }
  0x49   : > { %676 = shalt.err (!%p673_p8)
}
  0x4a   : > { %s677_s28 = scalar_lea.vmem %s237_s25, 64  ;;  %s814_s24 = smov [#allocation7]  }
  0x4b   : > { %p678_p6 = scmp.ne.s32.totalorder %s237_s25, %s677_s28  ;;  %s682_s26 = sshll.u32 %s814_s24, 4  ;;  %s683_s26 = int_to_ptr.vmem [resolvable:$false] %s682_s26 }
  0x4c   : > { %s684_s12 = scalar_lea.vmem %s683_s26, 128  ;;  %p685_p13 = scmp.lt.s32.totalorder %s237_s25, %s683_s26 }
  0x4d   : > { %p680_p3 = pnand %p678_p6, %p634_p9  ;;  %p686_p0 = scmp.lt.s32.totalorder %s684_s12, %s677_s28 }
  0x4f   : > { %p681_p2 = pneg %p680_p3  ;;  %p687_p5 = por %p686_p0, %p685_p13 }
  0x51   : > { %p688_p12 = pnand %p687_p5, %p681_p2 }
  0x53   : > { %691 = shalt.err (!%p688_p12)
}
  0x54   : > { %568 = dma.hbm_to_vmem [thread:$0]  (!%p904_p7), %s975_s23, 64, %s237_s25, %s911_s9  }
  0x55   : > { %s692_s14 = scalar_lea.hbm %s1110_s1, 256  ;;  %p1129_p11 = scmp.ne.s32.totalorder %s1128_s29, 0 }
  0x56   : > { %p693_p9 = scmp.ne.s32.totalorder %s1110_s1, %s692_s14  ;;  %p699_p13 = scmp.lt.u32.totalorder %s692_s14, %s1110_s1 }
  0x57   : > { %p694_p6 = pneg %p1129_p11 }
  0x59   : > { %p695_p8 = pnand %p694_p6, %p693_p9 }
  0x5b   : > { %p696_p10 = pneg %p695_p8 }
  0x5d   : > { %p701_p0 = pnand %p699_p13, %p696_p10 }
  0x5f   : > { %704 = shalt.err (!%p701_p0)
}
  0x60   : > { %s705_s6 = scalar_lea.vmem %s977_s13, 256  ;;  %p713_p3 = scmp.lt.s32.totalorder %s977_s13, %s977_s13 }
  0x61   : > { %p706_p7 = scmp.ne.s32.totalorder %s977_s13, %s705_s6  ;;  %p714_p2 = scmp.lt.s32.totalorder %s705_s6, %s705_s6 }
  0x63   : > { %p708_p4 = pnand %p706_p7, %p694_p6  ;;  %p715_p5 = por %p714_p2, %p713_p3 }
  0x65   : > { %p709_p1 = pneg %p708_p4 }
  0x67   : > { %p716_p12 = pnand %p715_p5, %p709_p1 }
  0x69   : > { %719 = shalt.err (!%p716_p12)
}
  0x6a   : > { %s815_s3 = smov 64   ;;  %s816_s9 = smov 4  }
  0x6b   : > { %561 = dma.hbm_to_vmem [thread:$0]  (!%p1129_p11), %s1110_s1, 256, %s977_s13, [#allocation6], %s815_s3, %s815_s3, %s816_s9  }
  0x6c   : > { %p1130_p9 = scmp.ne.s32.totalorder %s1126_s11, 0 }
  0x6d   : > { %s247_s26 = sand.u32 (!%p1130_p9), 1, %s940_s30   ;;  %s249_s12 = sand.u32 (!%p1130_p9), 1, %s794_s16  }
  0x6e   : > { %245 = sbr.rel (%p1130_p9) target bundleno = 365 (0x16d), region = 36  ;;  %s1035_s0 = sshll.u32 (!%p1130_p9), %s249_s12, 2 }
  0x6f   : > { %s248_s7 = scalar_lea.sflag (!%p1130_p9), [#allocation3], %s247_s26  ;;  %s251_s14 = scalar_lea.vmem (!%p1130_p9), [#allocation2], %s1035_s0 }
  0x70   : > { %p1131_p6 = scmp.ne.s32.totalorder (!%p1130_p9), %s1123_s10, 0 }
  0x75   : > { %773 = dma.done.wait (%p1131_p6), %s248_s7, 64  }
  0x76   : > { %775 = vsyncadd (%p1131_p6), %s248_s7, 4294967232  ;;  %p1132_p11 = scmp.eq.s32.totalorder %s940_s30, 0 }
  0x78   : > { %777 = dma.done.wait (%p1132_p11), [#allocation6], 256   ;;  %p1133_p8 = pmov %p1132_p11 }
  0x79   : > { %s264_s11 = scalar_lea.vmem [#allocation7], %s1035_s0 }
  0x7a   : > { %779 = vsyncadd (%p1133_p8), [#allocation6], 4294967040 }
  0x7b   : > { %781 = dma.done.wait (%p1131_p6), %s248_s7, 64  }
  0x7c   : > { %783 = vsyncadd (%p1131_p6), %s248_s7, 4294967232  ;;  %v817_v0 = vmov 0.0   ;;  %vm818_vm0 = vmmov 0   ;;  %v630_v1 = vld [vmem:[#allocation5] sm:$0xff]   ;;  %v631_v2 = vld [vmem:[#allocation5 + $0x8] sm:$0xff]   ;;  %vm325_vm1 = vcmask 261120  }
  0x7d   : > { %540 = vmatprep.subr.bf16.mxu0 %v817_v0  ;;  %544 = vmatprep.mubr.msk.bf16.mxu0 %vm818_vm0, %v817_v0  ;;  %v301_v3 = vld [vmem:[%s251_s14] sm:$0xf]  ;;  %v369_v4 = vld [vmem:[%s264_s11] sm:$0xf]  ;;  %s534_s10 = sshll.u32 %s802_s18, 6  ;;  %s296_s29 = scalar_lea.vmem [#allocation8], %s1035_s0 }
  0x7e   : > { %541 = vmatpush3.bf16.msra.mxu0 %v630_v1  ;;  %v529_v5 = vld [vmem:[%s1111_s2] ss:$0 sm:$0xff]  ;;  %v370_v6 = vunpack.c.l.bf16 %v369_v4  ;;  %s390_s22 = sshll.u32 %s296_s29, 4  ;;  %vm373_vm2 = vcmask 257024   ;;  %s1059_s6 = scalar_lea.hbm %s1113_s4, %s534_s10  ;;  %s1061_s22 = int_to_ptr.vmem [resolvable:$true] %s390_s22 }
  0x7f   : > { %542 = vmatprep.subr.bf16.mxu0 %v817_v0  ;;  %s376_s3 = scalar_lea.sflag [#allocation4], %s249_s12  ;;  %s720_s18 = scalar_lea.vmem %s1061_s22, 64 }
  0x80   : > { %p721_p10 = scmp.ne.s32.totalorder %s1061_s22, %s720_s18  ;;  %p1134_p13 = scmp.ne.s32.totalorder %s1124_s5, 0 }
  0x81   : > { %s819_s9 = smov [#allocation8]  }
  0x82   : > { %543 = vmatpush3.bf16.msra.mxu0 %v631_v2  ;;  %p722_p0 = pnand %p721_p10, %p1134_p13  ;;  %s724_s23 = sshll.u32 %s819_s9, 4  ;;  %s725_s23 = int_to_ptr.vmem [resolvable:$false] %s724_s23 }
  0x83   : > { %s726_s25 = scalar_lea.vmem %s725_s23, 128  ;;  %p727_p4 = scmp.lt.s32.totalorder %s1061_s22, %s725_s23 }
  0x84   : > { %p723_p7 = pneg %p722_p0  ;;  %p728_p1 = scmp.lt.s32.totalorder %s726_s25, %s720_s18 }
  0x85   : > { %545 = vmatmul.mubr.msk.bf16.vlgmr.msra.gmra.mrb[0].mxu0 %vm325_vm1, %v301_v3 }
  0x86   : > { %p729_p3 = por %p728_p1, %p727_p4 }
  0x88   : > { %p730_p2 = pnand %p729_p3, %p723_p7 }
 0x158   : > { %v363_v7 = vpop.f32.mrb[0].mxu0 }
 0x159   : > { %v364_v8 = vadd.f32 %v529_v5, %v363_v7  ;;  %v546_v9 = vpop.f32.mrb[1].mxu0 }
 0x15a   : > { %v366_v10 = vpop.f32.mrb[2].mxu0 }
 0x15b   : > { %v371_v11 = vadd.f32 %v370_v6, %v364_v8  ;;  %v547_v12 = vpop.f32.mrb[3].mxu0 }
 0x15d   : > { %v372_v13 = vpack.c.bf16 %v371_v11, %v371_v11 }
 0x15f   : > { %374 = vst.msk [vmem:[%s296_s29] sm:$0xf] %vm373_vm2, %v372_v13 }
 0x160   : > { %733 = shalt.err (!%p730_p2)
}
 0x161   : > { %s734_s26 = scalar_lea.hbm %s1059_s6, 64  ;;  %s738_s7 = scalar_lea.hbm %s1113_s4, 128 }
 0x162   : > { %p735_p5 = scmp.ne.s32.totalorder %s1059_s6, %s734_s26  ;;  %p739_p6 = scmp.lt.u32.totalorder %s1059_s6, %s1113_s4 }
 0x163   : > { %p740_p11 = scmp.lt.u32.totalorder %s738_s7, %s734_s26  ;;  %p742_p10 = scmp.lt.u32.totalorder %s734_s26, %s1059_s6 }
 0x164   : > { %p736_p12 = pnand %p735_p5, %p1134_p13 }
 0x165   : > { %p741_p8 = por %p740_p11, %p739_p6 }
 0x166   : > { %p737_p9 = pneg %p736_p12 }
 0x167   : > { %p743_p0 = por %p742_p10, %p741_p8 }
 0x169   : > { %p744_p7 = pnand %p743_p0, %p737_p9 }
 0x16b   : > { %747 = shalt.err (!%p744_p7)
}
 0x16c   : > { %556 = dma.vmem_to_hbm [thread:$0]  (%p1134_p13), %s1061_s22, 64, %s1059_s6, %s376_s3  }
 0x16d PF: > { %s402_s30 = sand.u32 1, %s790_s15   ;;  %p1135_p4 = scmp.ne.s32.totalorder %s1125_s8, 0 }
 0x16e   : > { %p1136_p1 = scmp.ge.s32.totalorder %s810_s20, 2  ;;  %s403_s13 = scalar_lea.sflag [#allocation4], %s402_s30 }
 0x170   : > { %p570_p3 = pnand %p1136_p1, %p1135_p4 }
 0x172   : > { %785 = dma.done.wait (!%p570_p3), %s403_s13, 64  }
 0x173   : > { %787 = vsyncadd (!%p570_p3), %s403_s13, 4294967232  ;;  %s21_s20 = sadd.s32 1, %s810_s20   ;;  %s1137_s15 = smov %s794_s16 }
 0x174   : > { %p18_p2 = scmp.ge.s32.totalorder %s21_s20, 4   ;;  %s1138_s16 = smov %s798_s17 }
 0x175   : > { %s1139_s17 = smov %s893_s27  ;;  %s1140_s18 = smov %s806_s19 }
 0x176   : > { %s1141_s19 = smov %s1143_s21  ;;  %20 = sbr.rel (!%p18_p2) target bundleno = 10 (0xa), region = 100 }
 0x17d   :  { %408 = vsyncpa [#allocation3], 1 }
 0x17e   :  { %410 = vsyncpa [#allocation3 + $0x1], 1 }
 0x17f   :  { %411 = vsyncpa [#allocation6], 1 }
 0x180   :  { %412 = vsyncpa [#allocation4], 1 }
 0x181   :  { %414 = vsyncpa [#allocation4 + $0x1], 1 }

// kernel: _lambda_.25
= control target key start
LH: loop header
LB: loop body
LE: loop exit
PB: predicated region body
PF: predicated region fallthrough
CT: control target
= control target key end

     0   :  { %10 = vsyncpa [#allocation3], 0  ;;  %s1197_s0 = inlined_call_operand.hbm [shape: bf16[16,32], index: 0, kind: input, shape index: {}]   ;;  %s1198_s1 = inlined_call_operand.hbm [shape: f32[1,32], index: 1, kind: input, shape index: {}]   ;;  %s1199_s2 = inlined_call_operand.hbm [shape: f32[1,32], index: 2, kind: input, shape index: {}]   ;;  %s1200_s3 = inlined_call_operand.hbm [shape: bf16[32,96], index: 3, kind: input, shape index: {}]   ;;  %s1201_s4 = inlined_call_operand.hbm [shape: f32[1,96], index: 4, kind: input, shape index: {}]   ;;  %s1202_s5 = inlined_call_operand.hbm [shape: bf16[16,96], index: 5, kind: output, shape index: {}]  }
   0x1   :  { %12 = vsyncpa [#allocation3 + $0x1], 0 }
   0x2   :  { %13 = vsyncpa [#allocation6], 0 }
   0x3   :  { %14 = vsyncpa [#allocation9], 0 }
   0x4   :  { %15 = vsyncpa [#allocation4], 0 }
   0x5   :  { %17 = vsyncpa [#allocation4 + $0x1], 0  ;;  %s908_s18 = smov 0   ;;  %s910_s19 = smov 0  }
   0x6   :  { %s912_s20 = smov 0   ;;  %s914_s21 = smov 0  }
   0x7 LB: > { %s868_s22 = smov [#allocation5]   ;;  %s929_s24 = sadd.s32 4294967295, %s866_s21   ;;  %s866_s21 = sphi %s914_s21, %s1226_s21   ;;  %s862_s20 = sphi %s912_s20, %s1225_s20   ;;  %s858_s19 = sphi %s910_s19, %s1224_s19   ;;  %s854_s18 = sphi %s908_s18, %s1223_s18  }
   0x8   : > { %s177_s23 = sshll.u32 %s868_s22, 4  ;;  %p519_p0 = scmp.ge.s32.totalorder %s866_s21, 1  ;;  %s934_s23 = int_to_ptr.vmem [resolvable:$true] %s177_s23 }
   0x9   : > { %p1203_p1 = scmp.eq.s32.totalorder %s929_s24, 0  ;;  %p164_p2 = scmp.lt.s32.totalorder %s866_s21, 3 }
   0xa   : > { %s869_s26 = smov [#allocation8]   ;;  %s870_s29 = smov [#allocation7]  }
   0xb   : > { %p936_p3 = pnand %p519_p0, %p164_p2  ;;  %s198_s27 = sshll.u32 %s869_s26, 4  ;;  %s943_s27 = int_to_ptr.vmem [resolvable:$true] %s198_s27 }
   0xc   : > { %s188_s30 = sshll.u32 %s870_s29, 4  ;;  %s650_s8 = scalar_lea.hbm %s1198_s1, 16  ;;  %s951_s30 = int_to_ptr.vmem [resolvable:$true] %s188_s30 }
   0xd   : > { %s1206_s25 = scalar_select %p936_p3, 1, 0 }
   0xe   : > { %p575_p5 = pneg %p936_p3  ;;  %p651_p7 = scmp.ne.s32.totalorder %s1198_s1, %s650_s8 }
   0xf   : > { %p657_p11 = scmp.lt.u32.totalorder %s650_s8, %s1198_s1 }
  0x10   : > { %p947_p6 = pnand %p575_p5, %p1203_p1 }
  0x12   : > { %p961_p8 = pneg %p947_p6 }
  0x14   : > { %p653_p9 = pnand %p961_p8, %p651_p7 }
  0x16   : > { %p654_p10 = pneg %p653_p9 }
  0x18   : > { %p659_p12 = pnand %p657_p11, %p654_p10 }
  0x1a   : > { %662 = shalt.err (!%p659_p12)
}
  0x1b   : > { %s663_s14 = scalar_lea.vmem %s934_s23, 16  ;;  %s670_s15 = scalar_lea.vmem %s934_s23, 32 }
  0x1c   : > { %p664_p13 = scmp.ne.s32.totalorder %s934_s23, %s663_s14  ;;  %p671_p5 = scmp.lt.s32.totalorder %s934_s23, %s934_s23 }
  0x1d   : > { %p672_p7 = scmp.lt.s32.totalorder %s670_s15, %s663_s14 }
  0x1e   : > { %p666_p0 = pnand %p664_p13, %p961_p8 }
  0x1f   : > { %p673_p9 = por %p672_p7, %p671_p5 }
  0x20   : > { %p667_p2 = pneg %p666_p0 }
  0x22   : > { %p674_p4 = pnand %p673_p9, %p667_p2 }
  0x24   : > { %677 = shalt.err (!%p674_p4)
}
  0x25   : > { %578 = dma.hbm_to_vmem [thread:$0]  (!%p947_p6), %s1198_s1, 16, %s934_s23, [#allocation6]  }
  0x26   : > { %s678_s29 = scalar_lea.hbm %s1200_s3, 256 }
  0x27   : > { %p679_p10 = scmp.ne.s32.totalorder %s1200_s3, %s678_s29  ;;  %p685_p4 = scmp.lt.u32.totalorder %s678_s29, %s1200_s3 }
  0x29   : > { %p681_p11 = pnand %p679_p10, %p961_p8 }
  0x2b   : > { %p682_p12 = pneg %p681_p11 }
  0x2d   : > { %p687_p13 = pnand %p685_p4, %p682_p12 }
  0x2f   : > { %690 = shalt.err (!%p687_p13)
}
  0x30   : > { %s691_s23 = scalar_lea.vmem %s943_s27, 256  ;;  %p699_p7 = scmp.lt.s32.totalorder %s943_s27, %s943_s27 }
  0x31   : > { %p692_p0 = scmp.ne.s32.totalorder %s943_s27, %s691_s23  ;;  %p700_p9 = scmp.lt.s32.totalorder %s691_s23, %s691_s23 }
  0x33   : > { %p694_p2 = pnand %p692_p0, %p961_p8  ;;  %p701_p10 = por %p700_p9, %p699_p7 }
  0x35   : > { %p695_p5 = pneg %p694_p2 }
  0x37   : > { %p702_p11 = pnand %p701_p10, %p695_p5 }
  0x39   : > { %705 = shalt.err (!%p702_p11)
}
  0x3a   : > { %s871_s10 = smov 64   ;;  %s872_s12 = smov 4  }
  0x3b   : > { %584 = dma.hbm_to_vmem [thread:$0]  (!%p947_p6), %s1200_s3, 256, %s943_s27, [#allocation9], %s871_s10, %s871_s10, %s872_s12  }
  0x3c   : > { %s706_s17 = scalar_lea.hbm %s1199_s2, 16 }
  0x3d   : > { %p707_p12 = scmp.ne.s32.totalorder %s1199_s2, %s706_s17  ;;  %p713_p0 = scmp.lt.u32.totalorder %s706_s17, %s1199_s2 }
  0x3f   : > { %p709_p4 = pnand %p707_p12, %p961_p8 }
  0x41   : > { %p710_p13 = pneg %p709_p4 }
  0x43   : > { %p715_p2 = pnand %p713_p0, %p710_p13 }
  0x45   : > { %718 = shalt.err (!%p715_p2)
}
  0x46   : > { %s719_s27 = scalar_lea.vmem %s951_s30, 16  ;;  %s726_s7 = scalar_lea.vmem %s951_s30, 32 }
  0x47   : > { %p720_p5 = scmp.ne.s32.totalorder %s951_s30, %s719_s27  ;;  %p727_p10 = scmp.lt.s32.totalorder %s951_s30, %s951_s30 }
  0x48   : > { %p728_p11 = scmp.lt.s32.totalorder %s726_s7, %s719_s27 }
  0x49   : > { %p722_p7 = pnand %p720_p5, %p961_p8 }
  0x4a   : > { %p729_p12 = por %p728_p11, %p727_p10 }
  0x4b   : > { %p723_p9 = pneg %p722_p7 }
  0x4d   : > { %p730_p4 = pnand %p729_p12, %p723_p9 }
  0x4f   : > { %733 = shalt.err (!%p730_p4)
}
  0x50   : > { %581 = dma.hbm_to_vmem [thread:$0]  (!%p947_p6), %s1199_s2, 16, %s951_s30, [#allocation6]  }
  0x51   : > { %s873_s23 = smov [#allocation10]   ;;  %s734_s14 = scalar_lea.hbm %s1201_s4, 16 }
  0x52   : > { %s212_s10 = sshll.u32 %s873_s23, 4  ;;  %p735_p13 = scmp.ne.s32.totalorder %s1201_s4, %s734_s14  ;;  %s213_s10 = int_to_ptr.vmem [resolvable:$true] %s212_s10 }
  0x53   : > { %p741_p5 = scmp.lt.u32.totalorder %s734_s14, %s1201_s4 }
  0x54   : > { %p737_p0 = pnand %p735_p13, %p961_p8 }
  0x56   : > { %p738_p2 = pneg %p737_p0 }
  0x58   : > { %p743_p7 = pnand %p741_p5, %p738_p2 }
  0x5a   : > { %746 = shalt.err (!%p743_p7)
}
  0x5b   : > { %s747_s30 = scalar_lea.vmem %s213_s10, 16  ;;  %s754_s26 = scalar_lea.vmem %s213_s10, 32 }
  0x5c   : > { %p748_p9 = scmp.ne.s32.totalorder %s213_s10, %s747_s30  ;;  %p755_p12 = scmp.lt.s32.totalorder %s213_s10, %s213_s10 }
  0x5d   : > { %p756_p4 = scmp.lt.s32.totalorder %s754_s26, %s747_s30 }
  0x5e   : > { %p750_p10 = pnand %p748_p9, %p961_p8 }
  0x5f   : > { %p757_p1 = por %p756_p4, %p755_p12 }
  0x60   : > { %p751_p11 = pneg %p750_p10 }
  0x62   : > { %p758_p3 = pnand %p757_p1, %p751_p11 }
  0x64   : > { %761 = shalt.err (!%p758_p3)
}
  0x65   : > { %587 = dma.hbm_to_vmem [thread:$0]  (!%p947_p6), %s1201_s4, 16, %s213_s10, [#allocation9]  }
  0x66   : > { %s518_s11 = sadd.s32 4294967294, %s866_s21   ;;  %s1050_s28 = sadd.s32 1, %s866_s21  }
  0x67   : > { %s27_s27 = ssub.s32 %s866_s21, %s1050_s28  ;;  %s30_s7 = sadd.s32 1, %s862_s20 }
  0x68   : > { %p28_p1 = scmp.eq.s32.totalorder %s27_s27, 0  ;;  %p37_p3 = scmp.ne.s32.totalorder %s862_s20, %s858_s19 }
  0x69   : > { %p38_p8 = scmp.eq.s32.totalorder %s866_s21, 0  ;;  %p43_p13 = scmp.ne.s32.totalorder %s858_s19, %s854_s18 }
  0x6a   : > { %s1061_s8 = scalar_select %p28_p1, %s862_s20, %s30_s7  }
  0x6b   : > { %p1063_p0 = por %p38_p8, %p37_p3  ;;  %p1210_p2 = scmp.eq.s32.totalorder %s929_s24, 0 }
  0x6c   : > { %p151_p5 = scmp.eq.s32.totalorder %s929_s24, 1  ;;  %p157_p7 = scmp.eq.s32.totalorder %s518_s11, 1 }
  0x6d   : > { %p1069_p6 = por %p1210_p2, %p43_p13  ;;  %p600_p9 = scmp.lt.s32.totalorder %s866_s21, 2 }
  0x6e   : > { %s223_s10 = sand.u32 1, %s862_s20   ;;  %p1076_p10 = por %p151_p5, %p37_p3 }
  0x6f   : > { %p1080_p11 = por %p157_p7, %p43_p13  ;;  %s525_s14 = sshll.u32 %s223_s10, 2 }
  0x70   : > { %s1212_s12 = scalar_select %p1076_p10, 1, 0 }
  0x71   : > { %s1213_s13 = scalar_select %p1080_p11, 1, 0 }
  0x72   : > { %s526_s15 = sshll.u32 %s866_s21, 6  ;;  %s227_s30 = scalar_lea.vmem [#allocation2], %s525_s14 }
  0x73   : > { %s1088_s22 = scalar_lea.hbm %s1197_s0, %s526_s15  ;;  %s234_s26 = sshll.u32 %s227_s30, 4  ;;  %s1090_s26 = int_to_ptr.vmem [resolvable:$true] %s234_s26 }
  0x74   : > { %p1094_p12 = pnand %p600_p9, %p1063_p0  ;;  %s224_s6 = scalar_lea.sflag [#allocation3], %s223_s10 }
  0x75   : > { %s762_s11 = scalar_lea.hbm %s1088_s22, 64  ;;  %s767_s14 = scalar_lea.hbm %s1197_s0, 128 }
  0x76   : > { %p763_p4 = scmp.ne.s32.totalorder %s1088_s22, %s762_s11  ;;  %p764_p1 = pneg %p1094_p12 }
  0x77   : > { %p768_p13 = scmp.lt.u32.totalorder %s1088_s22, %s1197_s0  ;;  %p769_p0 = scmp.lt.u32.totalorder %s767_s14, %s762_s11 }
  0x78   : > { %p765_p3 = pnand %p764_p1, %p763_p4  ;;  %p771_p5 = scmp.lt.u32.totalorder %s762_s11, %s1088_s22 }
  0x79   : > { %p770_p2 = por %p769_p0, %p768_p13 }
  0x7a   : > { %p766_p8 = pneg %p765_p3 }
  0x7b   : > { %p772_p7 = por %p771_p5, %p770_p2 }
  0x7d   : > { %p773_p9 = pnand %p772_p7, %p766_p8 }
  0x7f   : > { %776 = shalt.err (!%p773_p9)
}
  0x80   : > { %s777_s10 = scalar_lea.vmem %s1090_s26, 64  ;;  %s874_s16 = smov [#allocation2]  }
  0x81   : > { %p778_p4 = scmp.ne.s32.totalorder %s1090_s26, %s777_s10  ;;  %s782_s17 = sshll.u32 %s874_s16, 4  ;;  %s783_s17 = int_to_ptr.vmem [resolvable:$false] %s782_s17 }
  0x82   : > { %s784_s30 = scalar_lea.vmem %s783_s17, 128  ;;  %p785_p10 = scmp.lt.s32.totalorder %s1090_s26, %s783_s17 }
  0x83   : > { %p780_p3 = pnand %p778_p4, %p764_p1  ;;  %p786_p13 = scmp.lt.s32.totalorder %s784_s30, %s777_s10 }
  0x85   : > { %p781_p11 = pneg %p780_p3  ;;  %p787_p0 = por %p786_p13, %p785_p10 }
  0x87   : > { %p788_p2 = pnand %p787_p0, %p781_p11 }
  0x89   : > { %791 = shalt.err (!%p788_p2)
}
  0x8a   : > { %591 = dma.hbm_to_vmem [thread:$0]  (!%p1094_p12), %s1088_s22, 64, %s1090_s26, %s224_s6  }
  0x8b   : > { %p1215_p8 = scmp.ne.s32.totalorder %s1206_s25, 0 }
  0x8c   : > { %s1126_s11 = sand.u32 (!%p1215_p8), 1, %s858_s19  }
  0x8d   : > { %243 = sbr.rel (%p1215_p8) target bundleno = 703 (0x2bf), region = 40  ;;  %s528_s27 = sshll.u32 (!%p1215_p8), %s1126_s11, 2 }
  0x8e   : > { %s246_s7 = scalar_lea.sflag (!%p1215_p8), [#allocation3], %s1126_s11  ;;  %s249_s14 = scalar_lea.vmem (!%p1215_p8), [#allocation2], %s528_s27 }
  0x94   : > { %837 = dma.done.wait (%p1069_p6), %s246_s7, 64  }
  0x95   : > { %839 = vsyncadd (%p1069_p6), %s246_s7, 4294967232  ;;  %p1216_p10 = scmp.eq.s32.totalorder %s929_s24, 0 }
  0x97   : > { %841 = dma.done.wait (%p1216_p10), [#allocation6], 32   ;;  %p1217_p11 = pmov %p1216_p10 }
  0x98   : > { %p1218_p12 = pmov %p1216_p10 }
  0x99   : > { %843 = vsyncadd (%p1217_p11), [#allocation6], 4294967264 }
  0x9a   : > { %845 = dma.done.wait (%p1218_p12), [#allocation9], 272   ;;  %p1219_p1 = pmov %p1216_p10 }
  0x9b   : > { %vm297_vm0 = vcmask 261120   ;;  %v293_v0 = vld [vmem:[%s249_s14] sm:$0xf]  ;;  %v646_v8 = vld [vmem:[#allocation8] sm:$0xff]   ;;  %v875_v9 = vmov 0.0   ;;  %v647_v10 = vld [vmem:[#allocation8 + $0x8] sm:$0xff]  }
  0x9c   : > { %847 = vsyncadd (%p1219_p1), [#allocation9], 4294967024  ;;  %v294_v1 = vunpack.c.l.bf16 %v293_v0  ;;  %547 = vmatprep.subr.bf16.mxu0 %v875_v9  ;;  %vm876_vm1 = vmmov 0   ;;  %v534_v15 = vld [vmem:[#allocation5] ss:$0 sm:$0xff]  ;;  %s541_s25 = sshll.u32 %s929_s24, 6 }
  0x9d   : > { %548 = vmatpush3.bf16.msra.mxu0 %v646_v8  ;;  %551 = vmatprep.mubr.msk.bf16.mxu0 %vm876_vm1, %v875_v9  ;;  %v535_v17 = vld [vmem:[#allocation7] ss:$0 sm:$0xff]  ;;  %v536_v21 = vld [vmem:[#allocation10] ss:$0 sm:$0xff]  ;;  %s291_s23 = scalar_lea.vmem [#allocation11], %s528_s27  ;;  %vm394_vm2 = vcmask 781312   ;;  %s1153_s6 = scalar_lea.hbm %s1202_s5, %s541_s25 }
  0x9e   : > { %v298_v2 = vsel %vm297_vm0, %v294_v1, 0.0  ;;  %549 = vmatprep.subr.bf16.mxu0 %v875_v9  ;;  %s410_s22 = sshll.u32 %s291_s23, 4  ;;  %s397_s24 = scalar_lea.sflag [#allocation4], %s1126_s11  ;;  %s1155_s22 = int_to_ptr.vmem [resolvable:$true] %s410_s22 }
  0x9f   : > { %299 = vadd.xlane.f32.xlu0 %v298_v2  ;;  %s792_s9 = scalar_lea.vmem %s1155_s22, 64  ;;  %p1220_p5 = scmp.ne.s32.totalorder %s1212_s12, 0 }
  0xa0   : > { %p793_p6 = scmp.ne.s32.totalorder %s1155_s22, %s792_s9  ;;  %s877_s15 = smov [#allocation11]  }
  0xa1   : > { %550 = vmatpush3.bf16.msra.mxu0 %v647_v10  ;;  %s796_s10 = sshll.u32 %s877_s15, 4  ;;  %s797_s10 = int_to_ptr.vmem [resolvable:$false] %s796_s10 }
  0xa2   : > { %p794_p7 = pnand %p793_p6, %p1220_p5  ;;  %s798_s16 = scalar_lea.vmem %s797_s10, 128 }
  0xa3   : > { %p799_p4 = scmp.lt.s32.totalorder %s1155_s22, %s797_s10  ;;  %p800_p3 = scmp.lt.s32.totalorder %s798_s16, %s792_s9 }
  0xa4   : > { %p795_p9 = pneg %p794_p7 }
  0xa5   : > { %p801_p13 = por %p800_p3, %p799_p4 }
  0xa7   : > { %p802_p0 = pnand %p801_p13, %p795_p9 }
 0x12c   : > { %v300_v3 = vpop.xlane.xlu0 %299 }
 0x12d   : > { %v302_v4 = vmul.f32 0.03125, %v300_v3 }
 0x12f   : > { %v303_v5 = vsub.f32 %v294_v1, %v302_v4 }
 0x131   : > { %v304_v6 = vmul.f32 %v303_v5, %v303_v5 }
 0x133   : > { %v305_v7 = vsel %vm297_vm0, %v304_v6, 0.0 }
 0x134   : > { %306 = vadd.xlane.f32.xlu0 %v305_v7 }
 0x1c1   : > { %v307_v11 = vpop.xlane.xlu0 %306 }
 0x1c2   : > { %v308_v12 = vmul.f32 0.03125, %v307_v11 }
 0x1c4   : > { %v309_v13 = vadd.f32 1e-05, %v308_v12 }
 0x1c6   : > { %648 = vrsqrt.f32 %v309_v13 }
 0x1d0   : > { %v649_v14 = vpop.eup %648 }
 0x1d1   : > { %v311_v16 = vmul.f32 %v649_v14, %v303_v5 }
 0x1d3   : > { %v318_v18 = vmul.f32 %v534_v15, %v311_v16 }
 0x1d5   : > { %v325_v19 = vadd.f32 %v535_v17, %v318_v18 }
 0x1d7   : > { %v326_v20 = vpack.c.bf16 %v325_v19, %v325_v19 }
 0x1d9   : > { %552 = vmatmul.mubr.msk.bf16.vlgmr.msra.gmra.mrb[0].mxu0 %vm297_vm0, %v326_v20 }
 0x2ac   : > { %v387_v22 = vpop.f32.mrb[0].mxu0 }
 0x2ad   : > { %v388_v23 = vadd.f32 %v536_v21, %v387_v22  ;;  %v553_v24 = vpop.f32.mrb[1].mxu0 }
 0x2ae   : > { %v390_v25 = vpop.f32.mrb[2].mxu0 }
 0x2af   : > { %v393_v26 = vpack.c.bf16 %v388_v23, %v388_v23  ;;  %v554_v27 = vpop.f32.mrb[3].mxu0 }
 0x2b1   : > { %395 = vst.msk [vmem:[%s291_s23] sm:$0xf] %vm394_vm2, %v393_v26 }
 0x2b2   : > { %805 = shalt.err (!%p802_p0)
}
 0x2b3   : > { %s806_s17 = scalar_lea.hbm %s1153_s6, 64  ;;  %s810_s27 = scalar_lea.hbm %s1202_s5, 128 }
 0x2b4   : > { %p807_p2 = scmp.ne.s32.totalorder %s1153_s6, %s806_s17  ;;  %p811_p11 = scmp.lt.u32.totalorder %s1153_s6, %s1202_s5 }
 0x2b5   : > { %p812_p12 = scmp.lt.u32.totalorder %s810_s27, %s806_s17  ;;  %p814_p6 = scmp.lt.u32.totalorder %s806_s17, %s1153_s6 }
 0x2b6   : > { %p808_p8 = pnand %p807_p2, %p1220_p5 }
 0x2b7   : > { %p813_p1 = por %p812_p12, %p811_p11 }
 0x2b8   : > { %p809_p10 = pneg %p808_p8 }
 0x2b9   : > { %p815_p7 = por %p814_p6, %p813_p1 }
 0x2bb   : > { %p816_p9 = pnand %p815_p7, %p809_p10 }
 0x2bd   : > { %819 = shalt.err (!%p816_p9)
}
 0x2be   : > { %573 = dma.vmem_to_hbm [thread:$0]  (%p1220_p5), %s1155_s22, 64, %s1153_s6, %s397_s24  }
 0x2bf PF: > { %s422_s25 = sand.u32 1, %s854_s18   ;;  %p1221_p4 = scmp.ne.s32.totalorder %s1213_s13, 0 }
 0x2c0   : > { %p1222_p3 = scmp.ge.s32.totalorder %s866_s21, 2  ;;  %s423_s23 = scalar_lea.sflag [#allocation4], %s422_s25 }
 0x2c2   : > { %p593_p13 = pnand %p1222_p3, %p1221_p4 }
 0x2c4   : > { %849 = dma.done.wait (!%p593_p13), %s423_s23, 64  }
 0x2c5   : > { %851 = vsyncadd (!%p593_p13), %s423_s23, 4294967232  ;;  %p20_p0 = scmp.ge.s32.totalorder %s1050_s28, 4   ;;  %s1223_s18 = smov %s858_s19 }
 0x2c6   : > { %s1224_s19 = smov %s862_s20  ;;  %s1225_s20 = smov %s1061_s8 }
 0x2c7   : > { %s1226_s21 = smov %s1050_s28  ;;  %22 = sbr.rel (!%p20_p0) target bundleno = 7 (0x7), region = 101 }
 0x2ce   :  { %428 = vsyncpa [#allocation3], 1 }
 0x2cf   :  { %430 = vsyncpa [#allocation3 + $0x1], 1 }
 0x2d0   :  { %431 = vsyncpa [#allocation6], 1 }
 0x2d1   :  { %432 = vsyncpa [#allocation9], 1 }
 0x2d2   :  { %433 = vsyncpa [#allocation4], 1 }
 0x2d3   :  { %435 = vsyncpa [#allocation4 + $0x1], 1 }

// kernel: _lambda_.26
= control target key start
LH: loop header
LB: loop body
LE: loop exit
PB: predicated region body
PF: predicated region fallthrough
CT: control target
= control target key end

     0   :  { %6 = vsyncpa [#allocation3], 0  ;;  %s1270_s0 = inlined_call_operand.hbm [shape: bf16[2,8,96], index: 0, kind: input, shape index: {}]   ;;  %s1271_s1 = inlined_call_operand.hbm [shape: bf16[2,8,32], index: 1, kind: output, shape index: {}]  }
   0x1   :  { %8 = vsyncpa [#allocation3 + $0x1], 0 }
   0x2   :  { %9 = vsyncpa [#allocation4], 0 }
   0x3   :  { %11 = vsyncpa [#allocation4 + $0x1], 0  ;;  %s1026_s6 = smov 0   ;;  %s1028_s7 = smov 0  }
   0x4   :  { %s1030_s8 = smov 0   ;;  %s1032_s9 = smov 0  }
   0x5 LB: > { %s1047_s10 = sadd.s32 4294967295, %s995_s9   ;;  %s722_s11 = sadd.s32 4294967294, %s995_s9   ;;  %s995_s9 = sphi %s1032_s9, %s1286_s9   ;;  %s991_s8 = sphi %s1030_s8, %s1285_s8   ;;  %s987_s7 = sphi %s1028_s7, %s1284_s7   ;;  %s983_s6 = sphi %s1026_s6, %s1283_s6  }
   0x6   : > { %s1051_s12 = sadd.s32 1, %s995_s9   ;;  %s24_s13 = sadd.s32 1, %s991_s8 }
   0x7   : > { %s21_s14 = ssub.s32 %s995_s9, %s1051_s12  ;;  %p31_p0 = scmp.ne.s32.totalorder %s991_s8, %s987_s7 }
   0x8   : > { %p22_p1 = scmp.eq.s32.totalorder %s21_s14, 0  ;;  %p32_p2 = scmp.eq.s32.totalorder %s995_s9, 0 }
   0x9   : > { %p37_p3 = scmp.ne.s32.totalorder %s987_s7, %s983_s6  ;;  %p38_p4 = scmp.eq.s32.totalorder %s1047_s10, 0 }
   0xa   : > { %s1063_s15 = scalar_select %p22_p1, %s991_s8, %s24_s13  }
   0xb   : > { %p1065_p5 = por %p32_p2, %p31_p0  ;;  %p1069_p6 = por %p38_p4, %p37_p3 }
   0xc   : > { %p61_p7 = scmp.eq.s32.totalorder %s1047_s10, 1  ;;  %p67_p8 = scmp.eq.s32.totalorder %s722_s11, 1 }
   0xd   : > { %p828_p10 = scmp.lt.s32.totalorder %s995_s9, 2  ;;  %s87_s20 = sand.u32 1, %s991_s8  }
   0xe   : > { %p1076_p11 = por %p61_p7, %p31_p0  ;;  %p1080_p12 = por %p67_p8, %p37_p3 }
   0xf   : > { %s726_s21 = sshll.u32 %s995_s9, 6  ;;  %s725_s22 = sshll.u32 %s87_s20, 2 }
  0x10   : > { %s1275_s18 = scalar_select %p1076_p11, 1, 0 }
  0x11   : > { %s1276_s19 = scalar_select %p1080_p12, 1, 0 }
  0x12   : > { %s1089_s25 = scalar_lea.hbm %s1270_s0, %s726_s21  ;;  %s91_s26 = scalar_lea.vmem [#allocation2], %s725_s22 }
  0x13   : > { %s98_s27 = sshll.u32 %s91_s26, 4  ;;  %p1093_p13 = pnand %p828_p10, %p1065_p5  ;;  %s1097_s27 = int_to_ptr.vmem [resolvable:$true] %s98_s27 }
  0x14   : > { %s88_s29 = scalar_lea.sflag [#allocation3], %s87_s20  ;;  %s899_s30 = scalar_lea.hbm %s1089_s25, 64 }
  0x15   : > { %p900_p2 = scmp.ne.s32.totalorder %s1089_s25, %s899_s30  ;;  %p901_p3 = pneg %p1093_p13 }
  0x16   : > { %s904_s4 = scalar_lea.hbm %s1270_s0, 128  ;;  %p905_p5 = scmp.lt.u32.totalorder %s1089_s25, %s1270_s0 }
  0x17   : > { %p902_p4 = pnand %p901_p3, %p900_p2  ;;  %p906_p8 = scmp.lt.u32.totalorder %s904_s4, %s899_s30 }
  0x18   : > { %p908_p9 = scmp.lt.u32.totalorder %s899_s30, %s1089_s25 }
  0x19   : > { %p903_p7 = pneg %p902_p4  ;;  %p907_p10 = por %p906_p8, %p905_p5 }
  0x1b   : > { %p909_p0 = por %p908_p9, %p907_p10 }
  0x1d   : > { %p910_p1 = pnand %p909_p0, %p903_p7 }
  0x1f   : > { %913 = shalt.err (!%p910_p1)
}
  0x20   : > { %s914_s13 = scalar_lea.vmem %s1097_s27, 64  ;;  %s997_s14 = smov [#allocation2]  }
  0x21   : > { %p915_p2 = scmp.ne.s32.totalorder %s1097_s27, %s914_s13  ;;  %s919_s16 = sshll.u32 %s997_s14, 4  ;;  %s920_s16 = int_to_ptr.vmem [resolvable:$false] %s919_s16 }
  0x22   : > { %s921_s20 = scalar_lea.vmem %s920_s16, 128  ;;  %p922_p11 = scmp.lt.s32.totalorder %s1097_s27, %s920_s16 }
  0x23   : > { %p917_p4 = pnand %p915_p2, %p901_p3  ;;  %p923_p5 = scmp.lt.s32.totalorder %s921_s20, %s914_s13 }
  0x25   : > { %p918_p12 = pneg %p917_p4  ;;  %p924_p8 = por %p923_p5, %p922_p11 }
  0x27   : > { %p925_p9 = pnand %p924_p8, %p918_p12 }
  0x29   : > { %928 = shalt.err (!%p925_p9)
}
  0x2a   : > { %823 = dma.hbm_to_vmem [thread:$0]  (!%p1093_p13), %s1089_s25, 64, %s1097_s27, %s88_s29  }
  0x2b   : > { %p1278_p0 = scmp.lt.s32.totalorder %s995_s9, 3  ;;  %p1279_p1 = scmp.ge.s32.totalorder %s995_s9, 1 }
  0x2d   : > { %p104_p3 = pnand %p1279_p1, %p1278_p0 }
  0x2e   : > { %s1131_s21 = sand.u32 (!%p104_p3), 1, %s987_s7  }
  0x2f   : > { %107 = sbr.rel (%p104_p3) target bundleno = 1653 (0x675), region = 24  ;;  %s728_s22 = sshll.u32 (!%p104_p3), %s1131_s21, 2 }
  0x30   : > { %s110_s23 = scalar_lea.sflag (!%p104_p3), [#allocation3], %s1131_s21  ;;  %s1137_s24 = scalar_lea.vmem (!%p104_p3), [#allocation2], %s728_s22 }
  0x36   : > { %974 = dma.done.wait (%p1069_p6), %s110_s23, 64  }
  0x37   : > { %976 = vsyncadd (%p1069_p6), %s110_s23, 4294967232  ;;  %v998_v0 = vmov 0.0   ;;  %vm999_vm0 = vmmov 0   ;;  %v137_v1 = vld [vmem:[%s1137_s24] sm:$0xf]  ;;  %s1000_s25 = smov 96   ;;  %v133_v10 = vlaneseq }
  0x38   : > { %768 = vmatprep.subr.bf16.mxu0 %v998_v0  ;;  %770 = vmatprep.mubr.msk.bf16.mxu0 %vm999_vm0, %v998_v0  ;;  %v730_v2 = vcombine.low %v137_v1, %v137_v1  ;;  %v138_v3 = vunpack.c.l.bf16 %v137_v1  ;;  %vm146_vm1 = vcmask 64512   ;;  %v257_v8 = vld [vmem:[%s1137_s24] sm:$0xf]  ;;  %s1001_s17 = smov 64   ;;  %s1002_s26 = smov 88   ;;  %vm210_vm3 = vcmask 1043456  }
  0x39   : > { %774 = vmatprep.subr.bf16.mxu1 %v998_v0  ;;  %776 = vmatprep.mubr.msk.bf16.mxu1 %vm999_vm0, %v998_v0  ;;  %v1156_v9 = vcombine.low %v257_v8, %v257_v8  ;;  %v134_v11 = vand.u32 127, %v133_v10  ;;  %v1003_v12 = vmov -1e+30   ;;  %v511_v20 = vld [vmem:[%s1137_s24] sm:$0xf]  ;;  %s1004_s27 = smov 72   ;;  %v258_v29 = vunpack.c.l.bf16 %v257_v8 }
  0x3a   : > { %144 = vrot.lane.b32.xlu0 %v730_v2, %s1000_s25  ;;  %v139_v5 = vmul.f32 0.35355338, %v138_v3  ;;  %205 = vrot.lane.b32.xlu1 %v730_v2, %s1001_s17  ;;  %v1164_v21 = vcombine.low %v511_v20, %v511_v20  ;;  %v384_v31 = vld [vmem:[%s1137_s24] sm:$0xf]  ;;  %s1005_s28 = smov 120   ;;  %v512_v36 = vunpack.c.l.bf16 %v511_v20  ;;  %s1006_s29 = smov 80  }
  0x3b   : > { %vm135_vm2 = vcmp.lt.s32.totalorder %v134_v11, 5  ;;  %v259_v30 = vmul.f32 0.35355338, %v258_v29  ;;  %v385_v33 = vunpack.c.l.bf16 %v384_v31  ;;  %v1171_v34 = vcombine.low %v384_v31, %v384_v31  ;;  %s1007_s30 = smov 112   ;;  %s1008_s2 = smov 104  }
  0x3c   : > { %v140_v7 = vpack.c.bf16 %v139_v5, %v139_v5  ;;  %v1159_v13 = vsel %vm135_vm2, 0.0, %v1003_v12  ;;  %v513_v38 = vmul.f32 0.35355338, %v512_v36  ;;  %vm255_vm4 = vcmask 60416   ;;  %s1191_s3 = scalar_lea.vmem [#allocation5], %s728_s22  ;;  %s1009_s4 = smov 56  }
  0x3d   : > { %v260_v32 = vpack.c.bf16 %v259_v30, %v259_v30  ;;  %v386_v35 = vmul.f32 0.35355338, %v385_v33  ;;  %s1010_s5 = smov 48   ;;  %s1011_s11 = smov 40   ;;  %vm382_vm5 = vcmask 126016   ;;  %vm509_vm6 = vcmask 191616  }
  0x3e   : > { %267 = vrot.lane.b32.xlu1 %v1156_v9, %s1002_s26  ;;  %v514_v39 = vpack.c.bf16 %v513_v38, %v513_v38  ;;  %s1012_s13 = smov 8   ;;  %s1013_s14 = smov 16   ;;  %vm636_vm7 = vcmask 257216  }
  0x3f   : > { %v387_v37 = vpack.c.bf16 %v386_v35, %v386_v35  ;;  %s1014_s16 = smov 24   ;;  %s746_s20 = sshll.u32 %s1047_s10, 6 }
  0x40   : > { %s652_s22 = sshll.u32 %s1191_s3, 4  ;;  %s1225_s25 = scalar_lea.hbm %s1271_s1, %s746_s20  ;;  %s1227_s22 = int_to_ptr.vmem [resolvable:$true] %s652_s22 }
  0x41   : > { %s639_s17 = scalar_lea.sflag [#allocation4], %s1131_s21  ;;  %s929_s26 = scalar_lea.vmem %s1227_s22, 64 }
  0x42   : > { %p930_p6 = scmp.ne.s32.totalorder %s1227_s22, %s929_s26  ;;  %p1280_p11 = scmp.ne.s32.totalorder %s1275_s18, 0 }
  0x43   : > { %s1015_s10 = smov [#allocation5]  }
  0x44   : > { %p931_p12 = pnand %p930_p6, %p1280_p11 }
  0x46   : > { %p932_p13 = pneg %p931_p12 }
  0xac   : > { %v145_v4 = vpop.permute.xlu0 %144  ;;  %v206_v22 = vpop.permute.xlu1 %205 }
  0xad   : > { %v151_v6 = vsel %vm146_vm1, %v145_v4, 0  ;;  %v212_v23 = vsel %vm210_vm3, %v206_v22, 0 }
  0xae   : > { %769 = vmatpush3.bf16.xpose.msra.mxu0 %v151_v6  ;;  %775 = vmatpush3.bf16.msra.mxu1 %v212_v23 }
  0xaf   : > { %786 = vmatprep.subr.bf16.mxu0 %v998_v0  ;;  %780 = vmatprep.subr.bf16.mxu1 %v998_v0 }
  0xb0   : > { %v268_v40 = vpop.permute.xlu1 %267 }
  0xb1   : > { %v273_v46 = vsel %vm146_vm1, %v268_v40, 0 }
  0xb5   : > { %771 = vmatmul.mubr.msk.bf16.vlgmr.msra.gmra.mrb[0].mxu0 %vm146_vm1, %v140_v7 }
  0xb6   : > { %788 = vmatprep.mubr.msk.bf16.mxu0 %vm999_vm0, %v998_v0 }
 0x188   : > { %v187_v14 = vpop.f32.mrb[0].mxu0 }
 0x189   : > { %v188_v15 = vadd.f32 %v187_v14, %v1159_v13  ;;  %v772_v16 = vpop.f32.mrb[1].mxu0 }
 0x18a   : > { %v190_v17 = vpop.f32.mrb[2].mxu0 }
 0x18b   : > { %v773_v18 = vpop.f32.mrb[3].mxu0  ;;  %v193_v19 = vsel %vm146_vm1, %v188_v15, -inf }
 0x18c   : > { %194 = vmax.xlane.f32.xlu0 %v193_v19 }
 0x1a2   : > { %521 = vrot.lane.b32.xlu0 %v1164_v21, %s1004_s27  ;;  %s933_s27 = sshll.u32 %s1015_s10, 4  ;;  %s934_s27 = int_to_ptr.vmem [resolvable:$false] %s933_s27 }
 0x1a3   : > { %p936_p7 = scmp.lt.s32.totalorder %s1227_s22, %s934_s27 }
 0x219   : > { %v195_v24 = vpop.xlane.xlu0 %194 }
 0x21a   : > { %v196_v25 = vsub.f32 %v188_v15, %v195_v24 }
 0x21c   : > { %v197_v26 = vmul.f32 1.442695, %v196_v25 }
 0x21d   : > { %v522_v49 = vpop.permute.xlu0 %521 }
 0x21e   : > { %883 = vpow2.f32 %v197_v26  ;;  %v527_v51 = vsel %vm146_vm1, %v522_v49, 0 }
 0x228   : > { %v884_v27 = vpop.eup %883 }
 0x229   : > { %v199_v28 = vsel %vm146_vm1, %v884_v27, 0.0 }
 0x22a   : > { %200 = vadd.xlane.f32.xlu1 %v199_v28 }
 0x23b   : > { %262 = vrot.lane.b32.xlu1 %v260_v32, %s1005_s28  ;;  %s935_s28 = scalar_lea.vmem %s934_s27, 128 }
 0x23c   : > { %p937_p10 = scmp.lt.s32.totalorder %s935_s28, %s929_s26 }
 0x23e   : > { %p938_p2 = por %p937_p10, %p936_p7 }
 0x23f   : > { %394 = vrot.lane.b32.xlu1 %v1171_v34, %s1006_s29 }
 0x240   : > { %p939_p4 = pnand %p938_p2, %p932_p13 }
 0x243   : > { %389 = vrot.lane.b32.xlu1 %v387_v37, %s1007_s30 }
 0x247   : > { %516 = vrot.lane.b32.xlu1 %v514_v39, %s1008_s2 }
 0x2b7   : > { %v201_v41 = vpop.xlane.xlu1 %200 }
 0x2b8   : > { %885 = vrcp.f32 %v201_v41 }
 0x2bb   : > { %v263_v44 = vpop.permute.xlu1 %262 }
 0x2bf   : > { %v395_v47 = vpop.permute.xlu1 %394 }
 0x2c0   : > { %v400_v48 = vsel %vm146_vm1, %v395_v47, 0 }
 0x2c2   : > { %v886_v42 = vpop.eup %885 }
 0x2c3   : > { %v203_v43 = vmul.f32 %v886_v42, %v884_v27  ;;  %v390_v50 = vpop.permute.xlu1 %389 }
 0x2c5   : > { %v204_v45 = vpack.c.bf16 %v203_v43, %v203_v43 }
 0x2c7   : > { %777 = vmatmul.mubr.msk.bf16.vlgmr.msra.gmra.mrb[0].mxu1 %vm146_vm1, %v204_v45  ;;  %v517_v52 = vpop.permute.xlu1 %516 }
 0x2c8   : > { %781 = vmatpush3.bf16.xpose.msra.mxu1 %v273_v46  ;;  %782 = vmatprep.mubr.msk.bf16.mxu1 %vm999_vm0, %v998_v0 }
 0x2c9   : > { %792 = vmatprep.subr.bf16.mxu1 %v998_v0 }
 0x2cf   : > { %783 = vmatmul.mubr.msk.bf16.vlgmr.msra.gmra.mrb[4].mxu1 %vm146_vm1, %v263_v44 }
 0x2d0   : > { %793 = vmatpush3.bf16.xpose.msra.mxu1 %v400_v48  ;;  %794 = vmatprep.mubr.msk.bf16.mxu1 %vm999_vm0, %v998_v0 }
 0x2d1   : > { %804 = vmatprep.subr.bf16.mxu1 %v998_v0 }
 0x2d7   : > { %795 = vmatmul.mubr.msk.bf16.vlgmr.msra.gmra.mrb[8].mxu1 %vm146_vm1, %v390_v50 }
 0x2d8   : > { %805 = vmatpush3.bf16.xpose.msra.mxu1 %v527_v51  ;;  %806 = vmatprep.mubr.msk.bf16.mxu1 %vm999_vm0, %v998_v0 }
 0x2df   : > { %807 = vmatmul.mubr.msk.bf16.vlgmr.msra.gmra.mrb[12].mxu1 %vm146_vm1, %v517_v52 }
 0x39a   : > { %v248_v53 = vpop.f32.mrb[0].mxu1 }
 0x39b   : > { %v254_v54 = vpack.c.bf16 %v248_v53, %v248_v53  ;;  %v778_v55 = vpop.f32.mrb[1].mxu1 }
 0x39c   : > { %v251_v56 = vpop.f32.mrb[2].mxu1 }
 0x39d   : > { %256 = vst.msk [vmem:[%s1191_s3] sm:$0xf] %vm255_vm4, %v254_v54  ;;  %v779_v57 = vpop.f32.mrb[3].mxu1 }
 0x3a2   : > { %v309_v58 = vpop.f32.mrb[4].mxu1 }
 0x3a3   : > { %v310_v59 = vadd.f32 %v309_v58, %v1159_v13  ;;  %v784_v60 = vpop.f32.mrb[5].mxu1 }
 0x3a4   : > { %v312_v61 = vpop.f32.mrb[6].mxu1 }
 0x3a5   : > { %v785_v62 = vpop.f32.mrb[7].mxu1  ;;  %v315_v63 = vsel %vm146_vm1, %v310_v59, -inf }
 0x3a6   : > { %316 = vmax.xlane.f32.xlu1 %v315_v63 }
 0x3aa   : > { %v436_v1 = vpop.f32.mrb[8].mxu1 }
 0x3ab   : > { %v437_v2 = vadd.f32 %v436_v1, %v1159_v13  ;;  %v796_v3 = vpop.f32.mrb[9].mxu1 }
 0x3ac   : > { %v439_v4 = vpop.f32.mrb[10].mxu1 }
 0x3ad   : > { %v442_v5 = vsel %vm146_vm1, %v437_v2, -inf  ;;  %v797_v6 = vpop.f32.mrb[11].mxu1 }
 0x3ae   : > { %443 = vmax.xlane.f32.xlu0 %v442_v5 }
 0x3b2   : > { %v563_v7 = vpop.f32.mrb[12].mxu1 }
 0x3b3   : > { %v564_v8 = vadd.f32 %v563_v7, %v1159_v13  ;;  %v808_v10 = vpop.f32.mrb[13].mxu1 }
 0x3b4   : > { %v566_v11 = vpop.f32.mrb[14].mxu1 }
 0x3b5   : > { %v569_v12 = vsel %vm146_vm1, %v564_v8, -inf  ;;  %v809_v14 = vpop.f32.mrb[15].mxu1 }
 0x3b6   : > { %570 = vmax.xlane.f32.xlu1 %v569_v12 }
 0x433   : > { %v317_v15 = vpop.xlane.xlu1 %316 }
 0x434   : > { %v318_v16 = vsub.f32 %v310_v59, %v317_v15 }
 0x436   : > { %v319_v17 = vmul.f32 1.442695, %v318_v16 }
 0x438   : > { %887 = vpow2.f32 %v319_v17 }
 0x43b   : > { %v444_v25 = vpop.xlane.xlu0 %443 }
 0x43c   : > { %v445_v26 = vsub.f32 %v437_v2, %v444_v25 }
 0x43e   : > { %v446_v27 = vmul.f32 1.442695, %v445_v26 }
 0x442   : > { %v888_v18 = vpop.eup %887 }
 0x443   : > { %v571_v19 = vpop.xlane.xlu1 %570  ;;  %v321_v20 = vsel %vm146_vm1, %v888_v18, 0.0 }
 0x444   : > { %v572_v22 = vsub.f32 %v564_v8, %v571_v19  ;;  %322 = vadd.xlane.f32.xlu1 %v321_v20 }
 0x446   : > { %v573_v23 = vmul.f32 1.442695, %v572_v22 }
 0x448   : > { %889 = vpow2.f32 %v573_v23 }
 0x449   : > { %891 = vpow2.f32 %v446_v27 }
 0x452   : > { %v890_v24 = vpop.eup %889 }
 0x453   : > { %v575_v13 = vsel %vm146_vm1, %v890_v24, 0.0  ;;  %v892_v28 = vpop.eup %891 }
 0x454   : > { %576 = vadd.xlane.f32.xlu0 %v575_v13  ;;  %v448_v29 = vsel %vm146_vm1, %v892_v28, 0.0 }
 0x455   : > { %327 = vrot.lane.b32.xlu1 %v1156_v9, %s1009_s4 }
 0x46a   : > { %454 = vrot.lane.b32.xlu0 %v1171_v34, %s1010_s5 }
 0x479   : > { %449 = vadd.xlane.f32.xlu1 %v448_v29 }
 0x48a   : > { %581 = vrot.lane.b32.xlu1 %v1164_v21, %s1011_s11 }
 0x4d1   : > { %v323_v30 = vpop.xlane.xlu1 %322 }
 0x4d2   : > { %893 = vrcp.f32 %v323_v30 }
 0x4d5   : > { %v328_v31 = vpop.permute.xlu1 %327 }
 0x4d6   : > { %v333_v32 = vsel %vm210_vm3, %v328_v31, 0 }
 0x4d7   : > { %787 = vmatpush3.bf16.msra.mxu0 %v333_v32 }
 0x4d8   : > { %798 = vmatprep.subr.bf16.mxu0 %v998_v0 }
 0x4dc   : > { %v894_v9 = vpop.eup %893 }
 0x4dd   : > { %v325_v33 = vmul.f32 %v894_v9, %v888_v18 }
 0x4df   : > { %v326_v35 = vpack.c.bf16 %v325_v33, %v325_v33 }
 0x4e1   : > { %789 = vmatmul.mubr.msk.bf16.vlgmr.msra.gmra.mrb[4].mxu0 %vm146_vm1, %v326_v35  ;;  %v577_v34 = vpop.xlane.xlu0 %576 }
 0x4e2   : > { %800 = vmatprep.mubr.msk.bf16.mxu0 %vm999_vm0, %v998_v0 }
 0x4e5   : > { %v455_v36 = vpop.permute.xlu0 %454 }
 0x4e6   : > { %v460_v21 = vsel %vm210_vm3, %v455_v36, 0 }
 0x4e7   : > { %799 = vmatpush3.bf16.msra.mxu0 %v460_v21 }
 0x4e8   : > { %810 = vmatprep.subr.bf16.mxu0 %v998_v0 }
 0x506   : > { %v450_v37 = vpop.xlane.xlu1 %449 }
 0x507   : > { %895 = vrcp.f32 %v450_v37 }
 0x508   : > { %897 = vrcp.f32 %v577_v34 }
 0x50a   : > { %v582_v39 = vpop.permute.xlu1 %581 }
 0x50b   : > { %v587_v41 = vsel %vm210_vm3, %v582_v39, 0 }
 0x511   : > { %v896_v38 = vpop.eup %895 }
 0x512   : > { %v452_v40 = vmul.f32 %v896_v38, %v892_v28  ;;  %v898_v43 = vpop.eup %897 }
 0x513   : > { %v579_v44 = vmul.f32 %v898_v43, %v890_v24 }
 0x514   : > { %v453_v42 = vpack.c.bf16 %v452_v40, %v452_v40 }
 0x515   : > { %v580_v45 = vpack.c.bf16 %v579_v44, %v579_v44 }
 0x516   : > { %801 = vmatmul.mubr.msk.bf16.vlgmr.msra.gmra.mrb[8].mxu0 %vm146_vm1, %v453_v42 }
 0x517   : > { %811 = vmatpush3.bf16.msra.mxu0 %v587_v41  ;;  %812 = vmatprep.mubr.msk.bf16.mxu0 %vm999_vm0, %v998_v0 }
 0x51e   : > { %813 = vmatmul.mubr.msk.bf16.vlgmr.msra.gmra.mrb[12].mxu0 %vm146_vm1, %v580_v45 }
 0x5b4   : > { %v369_v46 = vpop.f32.mrb[4].mxu0 }
 0x5b5   : > { %v749_v47 = vpack.c.bf16 %v369_v46, %v369_v46  ;;  %v790_v48 = vpop.f32.mrb[5].mxu0 }
 0x5b6   : > { %v372_v49 = vpop.f32.mrb[6].mxu0 }
 0x5b7   : > { %379 = vrot.lane.b32.xlu1 %v749_v47, %s1012_s13  ;;  %v791_v50 = vpop.f32.mrb[7].mxu0 }
 0x5e9   : > { %v496_v51 = vpop.f32.mrb[8].mxu0 }
 0x5ea   : > { %v750_v52 = vpack.c.bf16 %v496_v51, %v496_v51  ;;  %v802_v53 = vpop.f32.mrb[9].mxu0 }
 0x5eb   : > { %v499_v54 = vpop.f32.mrb[10].mxu0 }
 0x5ec   : > { %506 = vrot.lane.b32.xlu0 %v750_v52, %s1013_s14  ;;  %v803_v0 = vpop.f32.mrb[11].mxu0 }
 0x5f1   : > { %v623_v55 = vpop.f32.mrb[12].mxu0 }
 0x5f2   : > { %v751_v56 = vpack.c.bf16 %v623_v55, %v623_v55  ;;  %v814_v57 = vpop.f32.mrb[13].mxu0 }
 0x5f3   : > { %v626_v58 = vpop.f32.mrb[14].mxu0 }
 0x5f4   : > { %633 = vrot.lane.b32.xlu1 %v751_v56, %s1014_s16  ;;  %v815_v59 = vpop.f32.mrb[15].mxu0 }
 0x629   : > { %v380_v60 = vpop.permute.xlu1 %379 }
 0x62a   : > { %383 = vst.msk [vmem:[%s1191_s3] sm:$0xf] %vm382_vm5, %v380_v60 }
 0x65e   : > { %v507_v61 = vpop.permute.xlu0 %506 }
 0x65f   : > { %510 = vst.msk [vmem:[%s1191_s3] sm:$0xf] %vm509_vm6, %v507_v61 }
 0x666   : > { %v634_v62 = vpop.permute.xlu1 %633 }
 0x667   : > { %637 = vst.msk [vmem:[%s1191_s3] sm:$0xf] %vm636_vm7, %v634_v62 }
 0x668   : > { %942 = shalt.err (!%p939_p4)
}
 0x669   : > { %s943_s21 = scalar_lea.hbm %s1225_s25, 64  ;;  %s947_s2 = scalar_lea.hbm %s1271_s1, 128 }
 0x66a   : > { %p944_p5 = scmp.ne.s32.totalorder %s1225_s25, %s943_s21  ;;  %p948_p0 = scmp.lt.u32.totalorder %s1225_s25, %s1271_s1 }
 0x66b   : > { %p949_p1 = scmp.lt.u32.totalorder %s947_s2, %s943_s21  ;;  %p951_p6 = scmp.lt.u32.totalorder %s943_s21, %s1225_s25 }
 0x66c   : > { %p945_p8 = pnand %p944_p5, %p1280_p11 }
 0x66d   : > { %p950_p3 = por %p949_p1, %p948_p0 }
 0x66e   : > { %p946_p9 = pneg %p945_p8 }
 0x66f   : > { %p952_p12 = por %p951_p6, %p950_p3 }
 0x671   : > { %p953_p13 = pnand %p952_p12, %p946_p9 }
 0x673   : > { %956 = shalt.err (!%p953_p13)
}
 0x674   : > { %818 = dma.vmem_to_hbm [thread:$0]  (%p1280_p11), %s1227_s22, 64, %s1225_s25, %s639_s17  }
 0x675 PF: > { %s664_s5 = sand.u32 1, %s983_s6   ;;  %p1281_p7 = scmp.ne.s32.totalorder %s1276_s19, 0 }
 0x676   : > { %p1282_p10 = scmp.ge.s32.totalorder %s995_s9, 2  ;;  %s665_s11 = scalar_lea.sflag [#allocation4], %s664_s5 }
 0x678   : > { %p825_p2 = pnand %p1282_p10, %p1281_p7 }
 0x67a   : > { %978 = dma.done.wait (!%p825_p2), %s665_s11, 64  }
 0x67b   : > { %980 = vsyncadd (!%p825_p2), %s665_s11, 4294967232  ;;  %p14_p4 = scmp.ge.s32.totalorder %s1051_s12, 4   ;;  %s1283_s6 = smov %s987_s7 }
 0x67c   : > { %s1284_s7 = smov %s991_s8  ;;  %s1285_s8 = smov %s1063_s15 }
 0x67d   : > { %s1286_s9 = smov %s1051_s12  ;;  %16 = sbr.rel (!%p14_p4) target bundleno = 5 (0x5), region = 69 }
 0x684   :  { %670 = vsyncpa [#allocation3], 1 }
 0x685   :  { %672 = vsyncpa [#allocation3 + $0x1], 1 }
 0x686   :  { %673 = vsyncpa [#allocation4], 1 }
 0x687   :  { %675 = vsyncpa [#allocation4 + $0x1], 1 }

// kernel: _lambda_.28
= control target key start
LH: loop header
LB: loop body
LE: loop exit
PB: predicated region body
PF: predicated region fallthrough
CT: control target
= control target key end

     0   :  { %12 = vsyncpa [#allocation3], 0  ;;  %s1607_s0 = inlined_call_operand.hbm [shape: bf16[16,32], index: 0, kind: input, shape index: {}]   ;;  %s1608_s1 = inlined_call_operand.hbm [shape: f32[1,32], index: 1, kind: input, shape index: {}]   ;;  %s1609_s2 = inlined_call_operand.hbm [shape: f32[1,32], index: 2, kind: input, shape index: {}]   ;;  %s1610_s3 = inlined_call_operand.hbm [shape: bf16[32,128], index: 3, kind: input, shape index: {}]   ;;  %s1611_s4 = inlined_call_operand.hbm [shape: f32[1,128], index: 4, kind: input, shape index: {}]   ;;  %s1612_s5 = inlined_call_operand.hbm [shape: bf16[128,32], index: 5, kind: input, shape index: {}]   ;;  %s1613_s6 = inlined_call_operand.hbm [shape: f32[1,32], index: 6, kind: input, shape index: {}]   ;;  %s1614_s7 = inlined_call_operand.hbm [shape: bf16[16,32], index: 7, kind: output, shape index: {}]  }
   0x1   :  { %14 = vsyncpa [#allocation3 + $0x1], 0 }
   0x2   :  { %15 = vsyncpa [#allocation6], 0 }
   0x3   :  { %16 = vsyncpa [#allocation9], 0 }
   0x4   :  { %17 = vsyncpa [#allocation12], 0 }
   0x5   :  { %18 = vsyncpa [#allocation4], 0 }
   0x6   :  { %20 = vsyncpa [#allocation4 + $0x1], 0  ;;  %s1274_s24 = smov 0   ;;  %s1276_s25 = smov 0  }
   0x7   :  { %s1278_s26 = smov 0   ;;  %s1280_s27 = smov 0  }
   0x8 LB: > { %s1222_s28 = smov [#allocation5]   ;;  %s1295_s30 = sadd.s32 4294967295, %s1220_s27   ;;  %s1220_s27 = sphi %s1280_s27, %s1640_s27   ;;  %s1216_s26 = sphi %s1278_s26, %s1639_s26   ;;  %s1212_s25 = sphi %s1276_s25, %s1638_s25   ;;  %s1208_s24 = sphi %s1274_s24, %s1637_s24  }
   0x9   : > { %s222_s29 = sshll.u32 %s1222_s28, 4  ;;  %p741_p0 = scmp.ge.s32.totalorder %s1220_s27, 1  ;;  %s1300_s29 = int_to_ptr.vmem [resolvable:$true] %s222_s29 }
   0xa   : > { %p1615_p1 = scmp.eq.s32.totalorder %s1295_s30, 0  ;;  %p209_p2 = scmp.lt.s32.totalorder %s1220_s27, 3 }
   0xb   : > { %s1223_s9 = smov [#allocation8]   ;;  %s1224_s12 = smov [#allocation11]  }
   0xc   : > { %p1302_p3 = pnand %p741_p0, %p209_p2  ;;  %s243_s10 = sshll.u32 %s1223_s9, 4  ;;  %s1309_s10 = int_to_ptr.vmem [resolvable:$true] %s243_s10 }
   0xd   : > { %s267_s13 = sshll.u32 %s1224_s12, 4  ;;  %s944_s16 = scalar_lea.hbm %s1608_s1, 16  ;;  %s1317_s13 = int_to_ptr.vmem [resolvable:$true] %s267_s13 }
   0xe   : > { %s1618_s8 = scalar_select %p1302_p3, 1, 0 }
   0xf   : > { %p847_p5 = pneg %p1302_p3  ;;  %p945_p7 = scmp.ne.s32.totalorder %s1608_s1, %s944_s16 }
  0x10   : > { %p951_p11 = scmp.lt.u32.totalorder %s944_s16, %s1608_s1 }
  0x11   : > { %p1313_p6 = pnand %p847_p5, %p1615_p1 }
  0x13   : > { %p1327_p8 = pneg %p1313_p6 }
  0x15   : > { %p947_p9 = pnand %p1327_p8, %p945_p7 }
  0x17   : > { %p948_p10 = pneg %p947_p9 }
  0x19   : > { %p953_p12 = pnand %p951_p11, %p948_p10 }
  0x1b   : > { %956 = shalt.err (!%p953_p12)
}
  0x1c   : > { %s957_s22 = scalar_lea.vmem %s1300_s29, 16  ;;  %s964_s23 = scalar_lea.vmem %s1300_s29, 32 }
  0x1d   : > { %p958_p13 = scmp.ne.s32.totalorder %s1300_s29, %s957_s22  ;;  %p965_p5 = scmp.lt.s32.totalorder %s1300_s29, %s1300_s29 }
  0x1e   : > { %p966_p7 = scmp.lt.s32.totalorder %s964_s23, %s957_s22 }
  0x1f   : > { %p960_p0 = pnand %p958_p13, %p1327_p8 }
  0x20   : > { %p967_p9 = por %p966_p7, %p965_p5 }
  0x21   : > { %p961_p2 = pneg %p960_p0 }
  0x23   : > { %p968_p4 = pnand %p967_p9, %p961_p2 }
  0x25   : > { %971 = shalt.err (!%p968_p4)
}
  0x26   : > { %850 = dma.hbm_to_vmem [thread:$0]  (!%p1313_p6), %s1608_s1, 16, %s1300_s29, [#allocation6]  }
  0x27   : > { %s972_s15 = scalar_lea.hbm %s1610_s3, 256 }
  0x28   : > { %p973_p10 = scmp.ne.s32.totalorder %s1610_s3, %s972_s15  ;;  %p979_p4 = scmp.lt.u32.totalorder %s972_s15, %s1610_s3 }
  0x2a   : > { %p975_p11 = pnand %p973_p10, %p1327_p8 }
  0x2c   : > { %p976_p12 = pneg %p975_p11 }
  0x2e   : > { %p981_p13 = pnand %p979_p4, %p976_p12 }
  0x30   : > { %984 = shalt.err (!%p981_p13)
}
  0x31   : > { %s985_s29 = scalar_lea.vmem %s1309_s10, 256  ;;  %p993_p7 = scmp.lt.s32.totalorder %s1309_s10, %s1309_s10 }
  0x32   : > { %p986_p0 = scmp.ne.s32.totalorder %s1309_s10, %s985_s29  ;;  %p994_p9 = scmp.lt.s32.totalorder %s985_s29, %s985_s29 }
  0x34   : > { %p988_p2 = pnand %p986_p0, %p1327_p8  ;;  %p995_p10 = por %p994_p9, %p993_p7 }
  0x36   : > { %p989_p5 = pneg %p988_p2 }
  0x38   : > { %p996_p11 = pnand %p995_p10, %p989_p5 }
  0x3a   : > { %999 = shalt.err (!%p996_p11)
}
  0x3b   : > { %s1225_s21 = smov 64   ;;  %s1226_s22 = smov 4  }
  0x3c   : > { %856 = dma.hbm_to_vmem [thread:$0]  (!%p1313_p6), %s1610_s3, 256, %s1309_s10, [#allocation9], %s1225_s21, %s1225_s21, %s1226_s22  }
  0x3d   : > { %s1000_s14 = scalar_lea.hbm %s1612_s5, 1024 }
  0x3e   : > { %p1001_p12 = scmp.ne.s32.totalorder %s1612_s5, %s1000_s14  ;;  %p1007_p0 = scmp.lt.u32.totalorder %s1000_s14, %s1612_s5 }
  0x40   : > { %p1003_p4 = pnand %p1001_p12, %p1327_p8 }
  0x42   : > { %p1004_p13 = pneg %p1003_p4 }
  0x44   : > { %p1009_p2 = pnand %p1007_p0, %p1004_p13 }
  0x46   : > { %1012 = shalt.err (!%p1009_p2)
}
  0x47   : > { %s1013_s10 = scalar_lea.vmem %s1317_s13, 1024  ;;  %p1021_p10 = scmp.lt.s32.totalorder %s1317_s13, %s1317_s13 }
  0x48   : > { %p1014_p5 = scmp.ne.s32.totalorder %s1317_s13, %s1013_s10  ;;  %p1022_p11 = scmp.lt.s32.totalorder %s1013_s10, %s1013_s10 }
  0x4a   : > { %p1016_p7 = pnand %p1014_p5, %p1327_p8  ;;  %p1023_p12 = por %p1022_p11, %p1021_p10 }
  0x4c   : > { %p1017_p9 = pneg %p1016_p7 }
  0x4e   : > { %p1024_p4 = pnand %p1023_p12, %p1017_p9 }
  0x50   : > { %1027 = shalt.err (!%p1024_p4)
}
  0x51   : > { %862 = dma.hbm_to_vmem [thread:$0]  (!%p1313_p6), %s1612_s5, 1024, %s1317_s13, [#allocation12], %s1225_s21, %s1225_s21, %s1226_s22  }
  0x52   : > { %s1227_s23 = smov [#allocation7]   ;;  %s1228_s9 = smov [#allocation10]  }
  0x53   : > { %s233_s28 = sshll.u32 %s1227_s23, 4  ;;  %s257_s12 = sshll.u32 %s1228_s9, 4  ;;  %s234_s28 = int_to_ptr.vmem [resolvable:$true] %s233_s28  ;;  %s258_s12 = int_to_ptr.vmem [resolvable:$true] %s257_s12 }
  0x54   : > { %s1028_s16 = scalar_lea.hbm %s1609_s2, 16 }
  0x55   : > { %p1029_p13 = scmp.ne.s32.totalorder %s1609_s2, %s1028_s16  ;;  %p1035_p5 = scmp.lt.u32.totalorder %s1028_s16, %s1609_s2 }
  0x57   : > { %p1031_p0 = pnand %p1029_p13, %p1327_p8 }
  0x59   : > { %p1032_p2 = pneg %p1031_p0 }
  0x5b   : > { %p1037_p7 = pnand %p1035_p5, %p1032_p2 }
  0x5d   : > { %1040 = shalt.err (!%p1037_p7)
}
  0x5e   : > { %s1041_s13 = scalar_lea.vmem %s234_s28, 16  ;;  %s1048_s21 = scalar_lea.vmem %s234_s28, 32 }
  0x5f   : > { %p1042_p9 = scmp.ne.s32.totalorder %s234_s28, %s1041_s13  ;;  %p1049_p12 = scmp.lt.s32.totalorder %s234_s28, %s234_s28 }
  0x60   : > { %p1050_p4 = scmp.lt.s32.totalorder %s1048_s21, %s1041_s13 }
  0x61   : > { %p1044_p10 = pnand %p1042_p9, %p1327_p8 }
  0x62   : > { %p1051_p1 = por %p1050_p4, %p1049_p12 }
  0x63   : > { %p1045_p11 = pneg %p1044_p10 }
  0x65   : > { %p1052_p3 = pnand %p1051_p1, %p1045_p11 }
  0x67   : > { %1055 = shalt.err (!%p1052_p3)
}
  0x68   : > { %853 = dma.hbm_to_vmem [thread:$0]  (!%p1313_p6), %s1609_s2, 16, %s234_s28, [#allocation6]  }
  0x69   : > { %s1056_s14 = scalar_lea.hbm %s1611_s4, 16 }
  0x6a   : > { %p1057_p13 = scmp.ne.s32.totalorder %s1611_s4, %s1056_s14  ;;  %p1063_p3 = scmp.lt.u32.totalorder %s1056_s14, %s1611_s4 }
  0x6c   : > { %p1059_p0 = pnand %p1057_p13, %p1327_p8 }
  0x6e   : > { %p1060_p1 = pneg %p1059_p0 }
  0x70   : > { %p1065_p2 = pnand %p1063_p3, %p1060_p1 }
  0x72   : > { %1068 = shalt.err (!%p1065_p2)
}
  0x73   : > { %s1069_s10 = scalar_lea.vmem %s258_s12, 16  ;;  %s1076_s28 = scalar_lea.vmem %s258_s12, 32 }
  0x74   : > { %p1070_p5 = scmp.ne.s32.totalorder %s258_s12, %s1069_s10  ;;  %p1077_p10 = scmp.lt.s32.totalorder %s258_s12, %s258_s12 }
  0x75   : > { %p1078_p11 = scmp.lt.s32.totalorder %s1076_s28, %s1069_s10 }
  0x76   : > { %p1072_p7 = pnand %p1070_p5, %p1327_p8 }
  0x77   : > { %p1079_p12 = por %p1078_p11, %p1077_p10 }
  0x78   : > { %p1073_p9 = pneg %p1072_p7 }
  0x7a   : > { %p1080_p4 = pnand %p1079_p12, %p1073_p9 }
  0x7c   : > { %1083 = shalt.err (!%p1080_p4)
}
  0x7d   : > { %859 = dma.hbm_to_vmem [thread:$0]  (!%p1313_p6), %s1611_s4, 16, %s258_s12, [#allocation9]  }
  0x7e   : > { %s1229_s21 = smov [#allocation13]   ;;  %s1084_s9 = scalar_lea.hbm %s1613_s6, 16 }
  0x7f   : > { %s281_s22 = sshll.u32 %s1229_s21, 4  ;;  %p1085_p13 = scmp.ne.s32.totalorder %s1613_s6, %s1084_s9  ;;  %s282_s22 = int_to_ptr.vmem [resolvable:$true] %s281_s22 }
  0x80   : > { %p1091_p3 = scmp.lt.u32.totalorder %s1084_s9, %s1613_s6 }
  0x81   : > { %p1087_p0 = pnand %p1085_p13, %p1327_p8 }
  0x83   : > { %p1088_p1 = pneg %p1087_p0 }
  0x85   : > { %p1093_p2 = pnand %p1091_p3, %p1088_p1 }
  0x87   : > { %1096 = shalt.err (!%p1093_p2)
}
  0x88   : > { %s1097_s12 = scalar_lea.vmem %s282_s22, 16  ;;  %s1104_s18 = scalar_lea.vmem %s282_s22, 32 }
  0x89   : > { %p1098_p5 = scmp.ne.s32.totalorder %s282_s22, %s1097_s12  ;;  %p1105_p10 = scmp.lt.s32.totalorder %s282_s22, %s282_s22 }
  0x8a   : > { %p1106_p11 = scmp.lt.s32.totalorder %s1104_s18, %s1097_s12 }
  0x8b   : > { %p1100_p7 = pnand %p1098_p5, %p1327_p8 }
  0x8c   : > { %p1107_p12 = por %p1106_p11, %p1105_p10 }
  0x8d   : > { %p1101_p9 = pneg %p1100_p7 }
  0x8f   : > { %p1108_p4 = pnand %p1107_p12, %p1101_p9 }
  0x91   : > { %1111 = shalt.err (!%p1108_p4)
}
  0x92   : > { %865 = dma.hbm_to_vmem [thread:$0]  (!%p1313_p6), %s1613_s6, 16, %s282_s22, [#allocation12]  }
  0x93   : > { %s740_s19 = sadd.s32 4294967294, %s1220_s27   ;;  %s1451_s11 = sadd.s32 1, %s1220_s27  }
  0x94   : > { %s30_s20 = ssub.s32 %s1220_s27, %s1451_s11  ;;  %s33_s13 = sadd.s32 1, %s1216_s26 }
  0x95   : > { %p31_p8 = scmp.eq.s32.totalorder %s30_s20, 0  ;;  %p40_p13 = scmp.ne.s32.totalorder %s1216_s26, %s1212_s25 }
  0x96   : > { %p41_p0 = scmp.eq.s32.totalorder %s1220_s27, 0  ;;  %p46_p1 = scmp.ne.s32.totalorder %s1212_s25, %s1208_s24 }
  0x97   : > { %s1462_s21 = scalar_select %p31_p8, %s1216_s26, %s33_s13  }
  0x98   : > { %p1464_p3 = por %p41_p0, %p40_p13  ;;  %p1622_p2 = scmp.eq.s32.totalorder %s1295_s30, 0 }
  0x99   : > { %p196_p5 = scmp.eq.s32.totalorder %s1295_s30, 1  ;;  %p202_p7 = scmp.eq.s32.totalorder %s740_s19, 1 }
  0x9a   : > { %p1470_p6 = por %p1622_p2, %p46_p1  ;;  %p880_p9 = scmp.lt.s32.totalorder %s1220_s27, 2 }
  0x9b   : > { %s292_s23 = sand.u32 1, %s1216_s26   ;;  %p1477_p10 = por %p196_p5, %p40_p13 }
  0x9c   : > { %p1481_p11 = por %p202_p7, %p46_p1  ;;  %s749_s15 = sshll.u32 %s292_s23, 2 }
  0x9d   : > { %s1624_s9 = scalar_select %p1477_p10, 1, 0 }
  0x9e   : > { %s1625_s14 = scalar_select %p1481_p11, 1, 0 }
  0x9f   : > { %s750_s16 = sshll.u32 %s1220_s27, 6  ;;  %s296_s10 = scalar_lea.vmem [#allocation2], %s749_s15 }
  0xa0   : > { %s1489_s18 = scalar_lea.hbm %s1607_s0, %s750_s16  ;;  %s303_s28 = sshll.u32 %s296_s10, 4  ;;  %s1491_s28 = int_to_ptr.vmem [resolvable:$true] %s303_s28 }
  0xa1   : > { %p1495_p12 = pnand %p880_p9, %p1464_p3  ;;  %s293_s20 = scalar_lea.sflag [#allocation3], %s292_s23 }
  0xa2   : > { %s1112_s13 = scalar_lea.hbm %s1489_s18, 64  ;;  %s1117_s17 = scalar_lea.hbm %s1607_s0, 128 }
  0xa3   : > { %p1113_p4 = scmp.ne.s32.totalorder %s1489_s18, %s1112_s13  ;;  %p1114_p8 = pneg %p1495_p12 }
  0xa4   : > { %p1118_p1 = scmp.lt.u32.totalorder %s1489_s18, %s1607_s0  ;;  %p1119_p3 = scmp.lt.u32.totalorder %s1117_s17, %s1112_s13 }
  0xa5   : > { %p1115_p13 = pnand %p1114_p8, %p1113_p4  ;;  %p1121_p5 = scmp.lt.u32.totalorder %s1112_s13, %s1489_s18 }
  0xa6   : > { %p1120_p2 = por %p1119_p3, %p1118_p1 }
  0xa7   : > { %p1116_p0 = pneg %p1115_p13 }
  0xa8   : > { %p1122_p7 = por %p1121_p5, %p1120_p2 }
  0xaa   : > { %p1123_p9 = pnand %p1122_p7, %p1116_p0 }
  0xac   : > { %1126 = shalt.err (!%p1123_p9)
}
  0xad   : > { %s1127_s23 = scalar_lea.vmem %s1491_s28, 64  ;;  %s1230_s10 = smov [#allocation2]  }
  0xae   : > { %p1128_p4 = scmp.ne.s32.totalorder %s1491_s28, %s1127_s23  ;;  %s1132_s15 = sshll.u32 %s1230_s10, 4  ;;  %s1133_s15 = int_to_ptr.vmem [resolvable:$false] %s1132_s15 }
  0xaf   : > { %s1134_s16 = scalar_lea.vmem %s1133_s15, 128  ;;  %p1135_p10 = scmp.lt.s32.totalorder %s1491_s28, %s1133_s15 }
  0xb0   : > { %p1130_p13 = pnand %p1128_p4, %p1114_p8  ;;  %p1136_p1 = scmp.lt.s32.totalorder %s1134_s16, %s1127_s23 }
  0xb2   : > { %p1131_p11 = pneg %p1130_p13  ;;  %p1137_p3 = por %p1136_p1, %p1135_p10 }
  0xb4   : > { %p1138_p2 = pnand %p1137_p3, %p1131_p11 }
  0xb6   : > { %1141 = shalt.err (!%p1138_p2)
}
  0xb7   : > { %869 = dma.hbm_to_vmem [thread:$0]  (!%p1495_p12), %s1489_s18, 64, %s1491_s28, %s293_s20  }
  0xb8   : > { %p1627_p0 = scmp.ne.s32.totalorder %s1618_s8, 0 }
  0xb9   : > { %s1527_s13 = sand.u32 (!%p1627_p0), 1, %s1212_s25  }
  0xba   : > { %312 = sbr.rel (%p1627_p0) target bundleno = 995 (0x3e3), region = 48  ;;  %s752_s17 = sshll.u32 (!%p1627_p0), %s1527_s13, 2 }
  0xbb   : > { %s315_s29 = scalar_lea.sflag (!%p1627_p0), [#allocation3], %s1527_s13  ;;  %s318_s12 = scalar_lea.vmem (!%p1627_p0), [#allocation2], %s752_s17 }
  0xc1   : > { %1187 = dma.done.wait (%p1470_p6), %s315_s29, 64  }
  0xc2   : > { %1189 = vsyncadd (%p1470_p6), %s315_s29, 4294967232  ;;  %p1628_p10 = scmp.eq.s32.totalorder %s1295_s30, 0 }
  0xc4   : > { %1191 = dma.done.wait (%p1628_p10), [#allocation6], 32   ;;  %p1629_p11 = pmov %p1628_p10 }
  0xc5   : > { %p1630_p12 = pmov %p1628_p10 }
  0xc6   : > { %1193 = vsyncadd (%p1629_p11), [#allocation6], 4294967264 }
  0xc7   : > { %1195 = dma.done.wait (%p1630_p12), [#allocation9], 272   ;;  %p1631_p8 = pmov %p1628_p10 }
  0xc9   : > { %1197 = vsyncadd (%p1631_p8), [#allocation9], 4294967024  ;;  %p1632_p5 = pmov %p1631_p8 }
  0xcb   : > { %1199 = dma.done.wait (%p1632_p5), [#allocation12], 1040   ;;  %p1633_p7 = pmov %p1632_p5 }
  0xcc   : > { %vm378_vm0 = vcmask 261120   ;;  %v374_v0 = vld [vmem:[%s318_s12] sm:$0xf]  ;;  %v930_v8 = vld [vmem:[#allocation8] sm:$0xff]   ;;  %v1231_v9 = vmov 0.0   ;;  %v931_v10 = vld [vmem:[#allocation8 + $0x8] sm:$0xff]  }
  0xcd   : > { %1201 = vsyncadd (%p1633_p7), [#allocation12], 4294966256  ;;  %v1549_v1 = vunpack.c.l.bf16 %v374_v0  ;;  %791 = vmatprep.subr.bf16.mxu0 %v1231_v9  ;;  %799 = vmatprep.subr.bf16.mxu1 %v1231_v9  ;;  %vm1232_vm1 = vmmov 0   ;;  %v932_v11 = vld [vmem:[#allocation11] sm:$0xff]   ;;  %v760_v16 = vld [vmem:[#allocation5] ss:$0 sm:$0xff] }
  0xce   : > { %792 = vmatpush3.bf16.msra.mxu0 %v930_v8  ;;  %795 = vmatprep.mubr.msk.bf16.mxu0 %vm1232_vm1, %v1231_v9  ;;  %v761_v18 = vld [vmem:[#allocation7] ss:$0 sm:$0xff]  ;;  %v934_v23 = vld [vmem:[#allocation11 + $0x10] sm:$0xff]   ;;  %v935_v24 = vld [vmem:[#allocation11 + $0x18] sm:$0xff]   ;;  %s776_s8 = sshll.u32 %s1295_s30, 6  ;;  %s372_s22 = scalar_lea.vmem [#allocation14], %s752_s17 }
  0xcf   : > { %v379_v2 = vsel %vm378_vm0, %v1549_v1, 0.0  ;;  %793 = vmatprep.subr.bf16.mxu0 %v1231_v9  ;;  %815 = vmatprep.mubr.msk.bf16.mxu1 %vm1232_vm1, %v1231_v9  ;;  %v933_v22 = vld [vmem:[#allocation11 + $0x8] sm:$0xff]   ;;  %v936_v25 = vld [vmem:[#allocation11 + $0x20] sm:$0xff]   ;;  %v938_v27 = vld [vmem:[#allocation11 + $0x30] sm:$0xff]   ;;  %s613_s18 = sshll.u32 %s372_s22, 4  ;;  %vm597_vm2 = vcmask 257024   ;;  %s1563_s20 = scalar_lea.hbm %s1614_s7, %s776_s8  ;;  %s1565_s18 = int_to_ptr.vmem [resolvable:$true] %s613_s18 }
  0xd0   : > { %380 = vadd.xlane.f32.xlu0 %v379_v2  ;;  %800 = vmatpush3.bf16.msra.mxu1 %v932_v11  ;;  %v937_v26 = vld [vmem:[#allocation11 + $0x28] sm:$0xff]   ;;  %v939_v28 = vld [vmem:[#allocation11 + $0x38] sm:$0xff]   ;;  %v766_v45 = vld [vmem:[#allocation13] ss:$0 sm:$0xff]  ;;  %s600_s30 = scalar_lea.sflag [#allocation4], %s1527_s13  ;;  %s1142_s23 = scalar_lea.vmem %s1565_s18, 64 }
  0xd1   : > { %801 = vmatprep.subr.bf16.mxu1 %v1231_v9  ;;  %v762_v29 = vld [vmem:[#allocation10] ss:$0 sm:$0xff]  ;;  %p1143_p6 = scmp.ne.s32.totalorder %s1565_s18, %s1142_s23  ;;  %p1634_p9 = scmp.ne.s32.totalorder %s1624_s9, 0 }
  0xd2   : > { %794 = vmatpush3.bf16.msra.mxu0 %v931_v10  ;;  %s1233_s10 = smov [#allocation14]  }
  0xd3   : > { %p1144_p4 = pnand %p1143_p6, %p1634_p9  ;;  %s1146_s15 = sshll.u32 %s1233_s10, 4  ;;  %s1147_s15 = int_to_ptr.vmem [resolvable:$false] %s1146_s15 }
  0xd4   : > { %802 = vmatpush3.bf16.msra.mxu1 %v933_v22  ;;  %s1148_s16 = scalar_lea.vmem %s1147_s15, 128  ;;  %p1149_p1 = scmp.lt.s32.totalorder %s1565_s18, %s1147_s15 }
  0xd5   : > { %803 = vmatprep.subr.bf16.mxu1 %v1231_v9  ;;  %p1145_p13 = pneg %p1144_p4  ;;  %p1150_p3 = scmp.lt.s32.totalorder %s1148_s16, %s1142_s23 }
  0xd7   : > { %p1151_p2 = por %p1150_p3, %p1149_p1 }
  0xd8   : > { %804 = vmatpush3.bf16.msra.mxu1 %v934_v23 }
  0xd9   : > { %805 = vmatprep.subr.bf16.mxu1 %v1231_v9  ;;  %p1152_p0 = pnand %p1151_p2, %p1145_p13 }
  0xdc   : > { %806 = vmatpush3.bf16.msra.mxu1 %v935_v24 }
  0xdd   : > { %807 = vmatprep.subr.bf16.mxu1 %v1231_v9 }
  0xe0   : > { %808 = vmatpush3.bf16.msra.mxu1 %v936_v25 }
  0xe1   : > { %809 = vmatprep.subr.bf16.mxu1 %v1231_v9 }
  0xe4   : > { %810 = vmatpush3.bf16.msra.mxu1 %v937_v26 }
  0xe5   : > { %811 = vmatprep.subr.bf16.mxu1 %v1231_v9 }
  0xe8   : > { %812 = vmatpush3.bf16.msra.mxu1 %v938_v27 }
  0xe9   : > { %813 = vmatprep.subr.bf16.mxu1 %v1231_v9 }
  0xec   : > { %814 = vmatpush3.bf16.msra.mxu1 %v939_v28 }
 0x15d   : > { %v381_v3 = vpop.xlane.xlu0 %380 }
 0x15e   : > { %v383_v4 = vmul.f32 0.03125, %v381_v3 }
 0x160   : > { %v384_v5 = vsub.f32 %v1549_v1, %v383_v4 }
 0x162   : > { %v385_v6 = vmul.f32 %v384_v5, %v384_v5 }
 0x164   : > { %v386_v7 = vsel %vm378_vm0, %v385_v6, 0.0 }
 0x165   : > { %387 = vadd.xlane.f32.xlu0 %v386_v7 }
 0x1f2   : > { %v388_v12 = vpop.xlane.xlu0 %387 }
 0x1f3   : > { %v389_v13 = vmul.f32 0.03125, %v388_v12 }
 0x1f5   : > { %v390_v14 = vadd.f32 1e-05, %v389_v13 }
 0x1f7   : > { %940 = vrsqrt.f32 %v390_v14 }
 0x201   : > { %v941_v15 = vpop.eup %940 }
 0x202   : > { %v392_v17 = vmul.f32 %v941_v15, %v384_v5 }
 0x204   : > { %v399_v19 = vmul.f32 %v760_v16, %v392_v17 }
 0x206   : > { %v406_v20 = vadd.f32 %v761_v18, %v399_v19 }
 0x208   : > { %v407_v21 = vpack.c.bf16 %v406_v20, %v406_v20 }
 0x20a   : > { %796 = vmatmul.mubr.msk.bf16.vlgmr.msra.gmra.mrb[0].mxu0 %vm378_vm0, %v407_v21 }
 0x2dd   : > { %v468_v30 = vpop.f32.mrb[0].mxu0 }
 0x2de   : > { %v469_v31 = vadd.f32 %v762_v29, %v468_v30  ;;  %v797_v32 = vpop.f32.mrb[1].mxu0 }
 0x2df   : > { %v471_v33 = vpop.f32.mrb[2].mxu0 }
 0x2e0   : > { %v475_v34 = vmul.f32 0.044715, %v469_v31  ;;  %v798_v35 = vpop.f32.mrb[3].mxu0  ;;  %v474_v41 = vmul.f32 0.5, %v469_v31 }
 0x2e2   : > { %v476_v36 = vmul.f32 %v475_v34, %v469_v31 }
 0x2e4   : > { %v477_v37 = vmul.f32 %v476_v36, %v469_v31 }
 0x2e6   : > { %v478_v38 = vadd.f32 %v477_v37, %v469_v31 }
 0x2e8   : > { %v479_v39 = vmul.f32 0.7978846, %v478_v38 }
 0x2ea   : > { %942 = vtanh.f32 %v479_v39 }
 0x2f4   : > { %v943_v40 = vpop.eup %942 }
 0x2f5   : > { %v481_v42 = vadd.f32 1.0, %v943_v40 }
 0x2f7   : > { %v482_v43 = vmul.f32 %v481_v42, %v474_v41 }
 0x2f9   : > { %v483_v44 = vpack.c.bf16 %v482_v43, %v482_v43 }
 0x2fb   : > { %816 = vmatmul.mubr.bf16.vlgmr.msra.gmra.mrb[0].mxu1 %v483_v44 }
 0x3ce   : > { %v589_v46 = vpop.f32.mrb[0].mxu1 }
 0x3cf   : > { %v590_v47 = vadd.f32 %v766_v45, %v589_v46  ;;  %v817_v48 = vpop.f32.mrb[1].mxu1 }
 0x3d0   : > { %v592_v49 = vpop.f32.mrb[2].mxu1 }
 0x3d1   : > { %v595_v50 = vadd.f32 %v590_v47, %v1549_v1  ;;  %v818_v51 = vpop.f32.mrb[3].mxu1 }
 0x3d3   : > { %v596_v52 = vpack.c.bf16 %v595_v50, %v595_v50 }
 0x3d5   : > { %598 = vst.msk [vmem:[%s372_s22] sm:$0xf] %vm597_vm2, %v596_v52 }
 0x3d6   : > { %1155 = shalt.err (!%p1152_p0)
}
 0x3d7   : > { %s1156_s13 = scalar_lea.hbm %s1563_s20, 64  ;;  %s1160_s12 = scalar_lea.hbm %s1614_s7, 128 }
 0x3d8   : > { %p1157_p10 = scmp.ne.s32.totalorder %s1563_s20, %s1156_s13  ;;  %p1161_p8 = scmp.lt.u32.totalorder %s1563_s20, %s1614_s7 }
 0x3d9   : > { %p1162_p5 = scmp.lt.u32.totalorder %s1160_s12, %s1156_s13  ;;  %p1164_p6 = scmp.lt.u32.totalorder %s1156_s13, %s1563_s20 }
 0x3da   : > { %p1158_p11 = pnand %p1157_p10, %p1634_p9 }
 0x3db   : > { %p1163_p7 = por %p1162_p5, %p1161_p8 }
 0x3dc   : > { %p1159_p12 = pneg %p1158_p11 }
 0x3dd   : > { %p1165_p4 = por %p1164_p6, %p1163_p7 }
 0x3df   : > { %p1166_p13 = pnand %p1165_p4, %p1159_p12 }
 0x3e1   : > { %1169 = shalt.err (!%p1166_p13)
}
 0x3e2   : > { %845 = dma.vmem_to_hbm [thread:$0]  (%p1634_p9), %s1565_s18, 64, %s1563_s20, %s600_s30  }
 0x3e3 PF: > { %s625_s28 = sand.u32 1, %s1208_s24   ;;  %p1635_p1 = scmp.ne.s32.totalorder %s1625_s14, 0 }
 0x3e4   : > { %p1636_p3 = scmp.ge.s32.totalorder %s1220_s27, 2  ;;  %s626_s19 = scalar_lea.sflag [#allocation4], %s625_s28 }
 0x3e6   : > { %p871_p2 = pnand %p1636_p3, %p1635_p1 }
 0x3e8   : > { %1203 = dma.done.wait (!%p871_p2), %s626_s19, 64  }
 0x3e9   : > { %1205 = vsyncadd (!%p871_p2), %s626_s19, 4294967232  ;;  %p23_p0 = scmp.ge.s32.totalorder %s1451_s11, 4   ;;  %s1637_s24 = smov %s1212_s25 }
 0x3ea   : > { %s1638_s25 = smov %s1216_s26  ;;  %s1639_s26 = smov %s1462_s21 }
 0x3eb   : > { %s1640_s27 = smov %s1451_s11  ;;  %25 = sbr.rel (!%p23_p0) target bundleno = 8 (0x8), region = 117 }
 0x3f2   :  { %631 = vsyncpa [#allocation3], 1 }
 0x3f3   :  { %633 = vsyncpa [#allocation3 + $0x1], 1 }
 0x3f4   :  { %634 = vsyncpa [#allocation6], 1 }
 0x3f5   :  { %635 = vsyncpa [#allocation9], 1 }
 0x3f6   :  { %636 = vsyncpa [#allocation12], 1 }
 0x3f7   :  { %637 = vsyncpa [#allocation4], 1 }
 0x3f8   :  { %639 = vsyncpa [#allocation4 + $0x1], 1 }

// kernel: _lambda_.33
= control target key start
LH: loop header
LB: loop body
LE: loop exit
PB: predicated region body
PF: predicated region fallthrough
CT: control target
= control target key end

     0   :  { %s296_s12 = smov 0   ;;  %s326_s0 = inlined_call_operand.vmem [shape: bf16[2,8,32], index: 0, kind: input, shape index: {}]   ;;  %s327_s1 = inlined_call_operand.vmem [shape: f32[1,32], index: 1, kind: input, shape index: {}]   ;;  %s328_s2 = inlined_call_operand.vmem [shape: f32[1,32], index: 2, kind: input, shape index: {}]   ;;  %s329_s3 = inlined_call_operand.vmem [shape: f32[2,1,32], index: 3, kind: output, shape index: {}]  }
   0x1 LB: > { %s250_s13 = sadd.s32 4294967295, %s274_s12   ;;  %p254_p0 = scmp.ge.s32.totalorder %s274_s12, 1  ;;  %s274_s12 = sphi %s296_s12, %s13_s12  }
   0x2   : > { %p136_p1 = scmp.lt.s32.totalorder %s274_s12, 3 }
   0x4   : > { %p137_p2 = pnand %p254_p0, %p136_p1 }
   0x5   : > { %p157_p3 = scmp.lt.s32.totalorder (!%p137_p2), %s250_s13, 1  ;;  %v166_v0 = vlaneseq (!%p137_p2)  ;;  %vm174_vm3 = vcmask (!%p137_p2), 261120   ;;  %v183_v23 = vld [vmem:[%s327_s1] sm:$0x1] (!%p137_p2)  ;;  %vm201_vm4 = vcmask (!%p137_p2), 253952  }
   0x6   : > { %140 = sbr.rel (%p137_p2) target bundleno = 349 (0x15d), region = 32  ;;  %v184_v25 = vld [vmem:[%s328_s2] sm:$0x1] (!%p137_p2) }
   0x7   : > { %v167_v1 = vshrl.u32 (!%p137_p2), %v166_v0, 7 }
   0x9   : > { %vm168_vm0 = vcmp.ge.s32.totalorder (!%p137_p2), %v167_v1, 1  ;;  %vm169_vm1 = vcmp.lt.s32.totalorder (!%p137_p2), %v167_v1, 5 }
   0xa   : > { %vm170_vm2 = vmand (!%p137_p2), %vm168_vm0, %vm169_vm1 }
   0xd   : > { %s331_s13 = smov (!%p157_p3, %s250_s13), 1 }
   0xe   : > { %s255_s14 = sshll.u32 %s331_s13, 2  ;;  %s163_s24 = scalar_lea.vmem %s329_s3, %s331_s13 }
   0xf   : > { %s160_s17 = scalar_lea.vmem %s326_s0, %s255_s14 }
  0x10   : > { %v164_v2 = vld [vmem:[%s160_s17] sm:$0xf] }
  0x11   : > { %v165_v3 = vunpack.c.l.bf16 %v164_v2 }
  0x13   : > { %v173_v4 = vsel %vm170_vm2, %v165_v3, 0.0 }
  0x14   : > { %v175_v5 = vsel %vm174_vm3, %v173_v4, 0.0 }
  0x15   : > { %v176_v6 = vrot.slane %v175_v5, 4 }
  0x17   : > { %v177_v7 = vadd.f32 %v176_v6, %v175_v5 }
  0x19   : > { %v178_v8 = vrot.slane %v177_v7, 2 }
  0x1b   : > { %v179_v9 = vadd.f32 %v178_v8, %v177_v7 }
  0x1d   : > { %v180_v10 = vrot.slane %v179_v9, 1 }
  0x1f   : > { %v181_v11 = vadd.f32 %v180_v10, %v179_v9 }
  0x21   : > { %v182_v12 = vmul.f32 0.25, %v181_v11 }
  0x23   : > { %v185_v13 = vsel %vm174_vm3, %v182_v12, 0.0 }
  0x24   : > { %186 = vadd.xlane.f32.xlu0 %v185_v13 }
  0xb1   : > { %v187_v14 = vpop.xlane.xlu0 %186 }
  0xb2   : > { %v189_v15 = vmul.f32 0.03125, %v187_v14 }
  0xb4   : > { %v190_v16 = vsub.f32 %v182_v12, %v189_v15 }
  0xb6   : > { %v191_v17 = vmul.f32 %v190_v16, %v190_v16 }
  0xb8   : > { %v192_v18 = vsel %vm174_vm3, %v191_v17, 0.0 }
  0xb9   : > { %193 = vadd.xlane.f32.xlu0 %v192_v18 }
 0x146   : > { %v194_v19 = vpop.xlane.xlu0 %193 }
 0x147   : > { %v195_v20 = vmul.f32 0.03125, %v194_v19 }
 0x149   : > { %v196_v21 = vadd.f32 1e-05, %v195_v20 }
 0x14b   : > { %266 = vrsqrt.f32 %v196_v21 }
 0x155   : > { %v267_v22 = vpop.eup %266 }
 0x156   : > { %v198_v24 = vmul.f32 %v267_v22, %v190_v16 }
 0x158   : > { %v199_v26 = vmul.f32 %v198_v24, %v183_v23 }
 0x15a   : > { %v200_v27 = vadd.f32 %v199_v26, %v184_v25 }
 0x15c   : > { %202 = vst.msk [vmem:[%s163_s24] sm:$0x1] %vm201_vm4, %v200_v27 }
 0x15d PF: > { %s13_s12 = sadd.s32 1, %s274_s12  }
 0x15e   : > { %p10_p4 = scmp.ge.s32.totalorder %s13_s12, 4  }
 0x160   :  { %12 = sbr.rel (!%p10_p4) target bundleno = 1 (0x1), region = 62 }

</bundles_post_ra>
